<compile_context>
chip_gen: v7x
topology: tpu7x:2x2x1
jax: 0.10.0
libtpu: 0.0.40
codegen_flags: <defaults>
</compile_context>

<pallas_src>
import math

import jax
import jax.numpy as jnp
from jax.experimental import pallas as pl
from jax.experimental.pallas import tpu as pltpu

D_IN = 768
D_HID = 256


def _round_up(x, m):
    return ((x + m - 1) // m) * m


def _cdiv(a, b):
    return (a + b - 1) // b


def vqa_kernel(img_ref, txt_ref, w_t_ref, fc1_wt_ref, fc1_b_ref,
               fin_wt_ref, fin_b_ref, out_ref):
    # bf16 inputs -> f32 for the normalization math.
    img = img_ref[...].astype(jnp.float32)
    txt = txt_ref[...].astype(jnp.float32)

    # torch.nn.functional.normalize(x, dim=1): x / max(||x||_2, 1e-12)
    #   == x * rsqrt(max(sum(x*x), (1e-12)^2))     (sqrt is monotone)
    eps2 = jnp.float32(1e-24)
    img_inv = jax.lax.rsqrt(
        jnp.maximum(jnp.sum(img * img, axis=-1, keepdims=True), eps2))
    txt_inv = jax.lax.rsqrt(
        jnp.maximum(jnp.sum(txt * txt, axis=-1, keepdims=True), eps2))

    # cross = normalize(img) * normalize(txt); grouping the scalars saves a
    # full-width VPU multiply.
    cross = (img * txt) * (img_inv * txt_inv)

    # weighted = relu(cross @ parameter.T)   -- bf16 operands, f32 accumulation
    weighted = jnp.dot(cross.astype(jnp.bfloat16), w_t_ref[...],
                       preferred_element_type=jnp.float32)
    weighted = jnp.maximum(weighted, 0.0)

    # down = bn1(fc1(weighted))  -- BN folded into fc1 weight/bias at init time
    down = jnp.dot(weighted.astype(jnp.bfloat16), fc1_wt_ref[...],
                   preferred_element_type=jnp.float32) + fc1_b_ref[...]

    # dropout(p=0.3) -> identity in eval mode

    # classify = final_layer(down)
    classify = jnp.dot(down.astype(jnp.bfloat16), fin_wt_ref[...],
                       preferred_element_type=jnp.float32) + fin_b_ref[...]
    out_ref[...] = classify.astype(out_ref.dtype)


def vqa_forward(image_embeddings, text_embeddings, params, num_labels):
    B = image_embeddings.shape[0]
    Lp = params["final_w_t"].shape[1]          # already lane-padded (mult of 128)

    # bf16 activations in (halves input HBM traffic when the producer can't
    # already emit bf16).
    if image_embeddings.dtype != jnp.bfloat16:
        image_embeddings = image_embeddings.astype(jnp.bfloat16)
    if text_embeddings.dtype != jnp.bfloat16:
        text_embeddings = text_embeddings.astype(jnp.bfloat16)

    # --- batch tiling -------------------------------------------------------
    # Pad only to a multiple of 8 sublanes, then derive TB from the padded
    # batch so the extra padding stays < TB rows.  Force >= 2 grid steps for
    # B >= 16 so the "parallel" axis can shard across v7x's 2 TensorCores.
    TB_CAP = 512                                # fits comfortably in VMEM
    B_pad = _round_up(max(B, 8), 8)
    min_steps = 2 if B_pad >= 16 else 1
    steps = max(min_steps, _cdiv(B_pad, TB_CAP))
    TB = min(_round_up(_cdiv(B_pad, steps), 8), TB_CAP)
    B_pad = _round_up(B_pad, TB)
    grid = (B_pad // TB,)

    if B_pad != B:
        pad = ((0, B_pad - B), (0, 0))
        image_embeddings = jnp.pad(image_embeddings, pad)
        text_embeddings = jnp.pad(text_embeddings, pad)

    flops = 2 * B_pad * (D_IN * D_IN + D_IN * D_HID + D_HID * Lp)
    bytes_accessed = (
        2 * B_pad * D_IN * 2            # img + txt in (bf16)
        + B_pad * Lp * 4                # out (f32)
        + (D_IN * D_IN + D_IN * D_HID + D_HID * Lp) * 2   # bf16 weights
        + (D_HID + Lp) * 4              # f32 biases
    )

    def _call(weight_kwargs):
        # activations: tiled over batch; weights: full-extent, resident across grid
        img_spec = pl.BlockSpec((TB, D_IN), lambda i: (i, 0))
        txt_spec = pl.BlockSpec((TB, D_IN), lambda i: (i, 0))
        w_spec = pl.BlockSpec((D_IN, D_IN), lambda i: (0, 0), **weight_kwargs)
        fc1_w_spec = pl.BlockSpec((D_IN, D_HID), lambda i: (0, 0), **weight_kwargs)
        fc1_b_spec = pl.BlockSpec((1, D_HID), lambda i: (0, 0), **weight_kwargs)
        fin_w_spec = pl.BlockSpec((D_HID, Lp), lambda i: (0, 0), **weight_kwargs)
        fin_b_spec = pl.BlockSpec((1, Lp), lambda i: (0, 0), **weight_kwargs)
        out_spec = pl.BlockSpec((TB, Lp), lambda i: (i, 0))

        return pl.pallas_call(
            vqa_kernel,
            out_shape=jax.ShapeDtypeStruct((B_pad, Lp), jnp.float32),
            grid=grid,
            in_specs=[img_spec, txt_spec, w_spec, fc1_w_spec, fc1_b_spec,
                      fin_w_spec, fin_b_spec],
            out_specs=out_spec,
            compiler_params=pltpu.CompilerParams(
                dimension_semantics=("parallel",),
                vmem_limit_bytes=32 * 1024 * 1024),
            cost_estimate=pl.CostEstimate(
                flops=flops,
                transcendentals=2 * B_pad,
                bytes_accessed=bytes_accessed),
        )(
            image_embeddings,
            text_embeddings,
            params["parameter_t"],
            params["fc1_w_t"],
            params["fc1_b"],
            params["final_w_t"],
            params["final_b"],
        )

    try:
        # Weights never change across the grid -> single pipeline buffer
        # (saves ~1.6 MiB of dead VMEM).
        out = jax.block_until_ready(_call({"pipeline_mode": pl.Buffered(1)}))
    except Exception:
        # Fallback for jax versions without BlockSpec pipeline_mode support.
        out = _call({})
    return out[:B, :num_labels]


def _kaiming_uniform(key, shape, fan_in, a=math.sqrt(5)):
    gain = math.sqrt(2.0 / (1.0 + a * a))
    bound = gain * math.sqrt(3.0 / fan_in)
    return jax.random.uniform(key, shape, jnp.float32, -bound, bound)


def init_params(key, num_labels):
    """Initialize PyTorch-equivalent parameters, fold BN into fc1, convert
    weights to bf16, transpose for row-major matmuls, and lane-pad labels."""
    keys = jax.random.split(key, 6)

    # nn.Parameter(768, 768) with kaiming_uniform_(a=sqrt(5)): fan_in = 768
    parameter = _kaiming_uniform(keys[0], (D_IN, D_IN), fan_in=D_IN)

    # fc1: Linear(768, 256), default PyTorch init
    fc1_w = _kaiming_uniform(keys[1], (D_HID, D_IN), fan_in=D_IN)
    b_bound = 1.0 / math.sqrt(D_IN)
    fc1_b = jax.random.uniform(keys[2], (D_HID,), jnp.float32, -b_bound, b_bound)

    # bn1: BatchNorm1d(256), fresh running stats (eval mode)
    bn_gamma = jnp.ones((D_HID,), jnp.float32)
    bn_beta = jnp.zeros((D_HID,), jnp.float32)
    bn_mean = jnp.zeros((D_HID,), jnp.float32)
    bn_var = jnp.ones((D_HID,), jnp.float32)
    bn_eps = 1e-5

    # Fold eval-mode BN into fc1:  y = (x@W.T + b - mean) * g*rsqrt(var+eps) + beta
    scale = bn_gamma * jax.lax.rsqrt(bn_var + bn_eps)          # (256,)
    fc1_w_folded = fc1_w * scale[:, None]                      # (256, 768)
    fc1_b_folded = (fc1_b - bn_mean) * scale + bn_beta         # (256,)

    # final_layer: Linear(256, num_labels)
    fin_w = _kaiming_uniform(keys[3], (num_labels, D_HID), fan_in=D_HID)
    fb_bound = 1.0 / math.sqrt(D_HID)
    fin_b = jax.random.uniform(keys[4], (num_labels,), jnp.float32,
                               -fb_bound, fb_bound)

    # Lane-pad the label dimension to a multiple of 128 (unmasked stores).
    Lp = max(_round_up(num_labels, 128), 128)
    fin_w_pad = jnp.zeros((Lp, D_HID), jnp.float32).at[:num_labels].set(fin_w)
    fin_b_pad = jnp.zeros((Lp,), jnp.float32).at[:num_labels].set(fin_b)

    return {
        "parameter_t": parameter.T.astype(jnp.bfloat16),         # (768, 768)
        "fc1_w_t": fc1_w_folded.T.astype(jnp.bfloat16),          # (768, 256)
        "fc1_b": fc1_b_folded.reshape(1, D_HID),                 # (1, 256) f32
        "final_w_t": fin_w_pad.T.astype(jnp.bfloat16),           # (256, Lp)
        "final_b": fin_b_pad.reshape(1, Lp),                     # (1, Lp) f32
    }


def _reference_forward(img, txt, params, num_labels):
    """Pure-JAX f32 reference using the same (bf16) inputs/weights upcast to
    f32; divergence from the kernel is only the in-kernel bf16 activation casts."""
    img = img.astype(jnp.float32)
    txt = txt.astype(jnp.float32)

    def _norm(x):
        n = jnp.sqrt(jnp.sum(x * x, axis=-1, keepdims=True))
        return x / jnp.maximum(n, 1e-12)

    cross = _norm(img) * _norm(txt)
    weighted = jnp.maximum(cross @ params["parameter_t"].astype(jnp.float32), 0.0)
    down = weighted @ params["fc1_w_t"].astype(jnp.float32) + params["fc1_b"]
    classify = down @ params["final_w_t"].astype(jnp.float32) + params["final_b"]
    return classify[:, :num_labels]


if __name__ == "__main__":
    key = jax.random.PRNGKey(0)
    k_img, k_txt, k_params = jax.random.split(key, 3)

    B = 24            # not a multiple of TB: exercises batch padding + 2-step grid
    NUM_LABELS = 100  # not a multiple of 128: exercises lane padding

    image_embeddings = jax.random.normal(
        k_img, (B, D_IN), jnp.float32).astype(jnp.bfloat16)
    text_embeddings = jax.random.normal(
        k_txt, (B, D_IN), jnp.float32).astype(jnp.bfloat16)
    params = init_params(k_params, NUM_LABELS)

    out = vqa_forward(image_embeddings, text_embeddings, params, NUM_LABELS)
    out = jax.block_until_ready(out)

    ref = _reference_forward(image_embeddings, text_embeddings, params, NUM_LABELS)
    max_err = float(jnp.max(jnp.abs(out - ref)))

    assert out.shape == (B, NUM_LABELS)
    assert out.dtype == jnp.float32
    assert bool(jnp.all(jnp.isfinite(out)))
    assert max_err < 5e-2, f"max abs err vs f32 reference: {max_err}"
    print("KERNEL_OK")
</pallas_src>

<mosaic_0001>
module attributes {stable_mosaic.version = 11 : i64} {
  func.func @vqa_kernel(%arg0: i32, %arg1: memref<16x768xbf16, #tpu.memory_space<vmem>>, %arg2: memref<16x768xbf16, #tpu.memory_space<vmem>>, %arg3: memref<768x768xbf16, #tpu.memory_space<vmem>>, %arg4: memref<768x256xbf16, #tpu.memory_space<vmem>>, %arg5: memref<1x256xf32, #tpu.memory_space<vmem>>, %arg6: memref<256x128xbf16, #tpu.memory_space<vmem>>, %arg7: memref<1x128xf32, #tpu.memory_space<vmem>>, %arg8: memref<16x128xf32, #tpu.memory_space<vmem>>) attributes {dimension_semantics = [#tpu.dimension_semantics<parallel>], iteration_bounds = array<i64: 2>, scalar_prefetch = 0 : i64, scratch_operands = 0 : i64, tpu.core_type = #tpu.core_type<tc>, window_params = [{transform_indices = @transform_0, window_bounds = array<i64: 16, 768>}, {transform_indices = @transform_1, window_bounds = array<i64: 16, 768>}, {pipeline_mode = #tpu.pipeline_mode<synchronous>, transform_indices = @transform_2, window_bounds = array<i64: 768, 768>}, {pipeline_mode = #tpu.pipeline_mode<synchronous>, transform_indices = @transform_3, window_bounds = array<i64: 768, 256>}, {pipeline_mode = #tpu.pipeline_mode<synchronous>, transform_indices = @transform_4, window_bounds = array<i64: 1, 256>}, {pipeline_mode = #tpu.pipeline_mode<synchronous>, transform_indices = @transform_5, window_bounds = array<i64: 256, 128>}, {pipeline_mode = #tpu.pipeline_mode<synchronous>, transform_indices = @transform_6, window_bounds = array<i64: 1, 128>}, {transform_indices = @transform_7, window_bounds = array<i64: 16, 128>}]} {
    %c0 = arith.constant 0 : index
    %c0_0 = arith.constant 0 : index
    %0 = vector.load %arg1[%c0, %c0_0] : memref<16x768xbf16, #tpu.memory_space<vmem>>, vector<16x768xbf16>
    %1 = arith.extf %0 : vector<16x768xbf16> to vector<16x768xf32>
    %c0_1 = arith.constant 0 : index
    %c0_2 = arith.constant 0 : index
    %2 = vector.load %arg2[%c0_1, %c0_2] : memref<16x768xbf16, #tpu.memory_space<vmem>>, vector<16x768xbf16>
    %3 = arith.extf %2 : vector<16x768xbf16> to vector<16x768xf32>
    %4 = arith.mulf %1, %1 : vector<16x768xf32>
    %cst = arith.constant dense<0.000000e+00> : vector<16xf32>
    %5 = vector.multi_reduction <add>, %4, %cst [1] : vector<16x768xf32> to vector<16xf32>
    %6 = vector.shape_cast %5 : vector<16xf32> to vector<16x1xf32>
    %cst_3 = arith.constant 1.000000e-24 : f32
    %7 = vector.broadcast %cst_3 : f32 to vector<16x1xf32>
    %8 = arith.maximumf %6, %7 : vector<16x1xf32>
    %9 = math.rsqrt %8 : vector<16x1xf32>
    %10 = arith.mulf %3, %3 : vector<16x768xf32>
    %cst_4 = arith.constant dense<0.000000e+00> : vector<16xf32>
    %11 = vector.multi_reduction <add>, %10, %cst_4 [1] : vector<16x768xf32> to vector<16xf32>
    %12 = vector.shape_cast %11 : vector<16xf32> to vector<16x1xf32>
    %cst_5 = arith.constant 1.000000e-24 : f32
    %13 = vector.broadcast %cst_5 : f32 to vector<16x1xf32>
    %14 = arith.maximumf %12, %13 : vector<16x1xf32>
    %15 = math.rsqrt %14 : vector<16x1xf32>
    %16 = arith.mulf %1, %3 : vector<16x768xf32>
    %17 = arith.mulf %9, %15 : vector<16x1xf32>
    %18 = vector.broadcast %17 : vector<16x1xf32> to vector<16x768xf32>
    %19 = arith.mulf %16, %18 : vector<16x768xf32>
    %20 = arith.truncf %19 : vector<16x768xf32> to vector<16x768xbf16>
    %c0_6 = arith.constant 0 : index
    %c0_7 = arith.constant 0 : index
    %21 = vector.load %arg3[%c0_6, %c0_7] : memref<768x768xbf16, #tpu.memory_space<vmem>>, vector<768x768xbf16>
    %cst_8 = arith.constant dense<0.000000e+00> : vector<16x768xf32>
    %22 = tpu.matmul %20, %21, %cst_8 {dimension_numbers = #tpu.dot_dimension_numbers<[1], [0], [0], [1], [0, 0, 1, 1], [], []>} : vector<16x768xbf16>, vector<768x768xbf16>, vector<16x768xf32> -> vector<16x768xf32>
    %cst_9 = arith.constant 0.000000e+00 : f32
    %23 = vector.broadcast %cst_9 : f32 to vector<16x768xf32>
    %24 = arith.maximumf %22, %23 : vector<16x768xf32>
    %25 = arith.truncf %24 : vector<16x768xf32> to vector<16x768xbf16>
    %c0_10 = arith.constant 0 : index
    %c0_11 = arith.constant 0 : index
    %26 = vector.load %arg4[%c0_10, %c0_11] : memref<768x256xbf16, #tpu.memory_space<vmem>>, vector<768x256xbf16>
    %cst_12 = arith.constant dense<0.000000e+00> : vector<16x256xf32>
    %27 = tpu.matmul %25, %26, %cst_12 {dimension_numbers = #tpu.dot_dimension_numbers<[1], [0], [0], [1], [0, 0, 1, 1], [], []>} : vector<16x768xbf16>, vector<768x256xbf16>, vector<16x256xf32> -> vector<16x256xf32>
    %c0_13 = arith.constant 0 : index
    %c0_14 = arith.constant 0 : index
    %28 = vector.load %arg5[%c0_13, %c0_14] : memref<1x256xf32, #tpu.memory_space<vmem>>, vector<1x256xf32>
    %29 = vector.broadcast %28 : vector<1x256xf32> to vector<16x256xf32>
    %30 = arith.addf %27, %29 : vector<16x256xf32>
    %31 = arith.truncf %30 : vector<16x256xf32> to vector<16x256xbf16>
    %c0_15 = arith.constant 0 : index
    %c0_16 = arith.constant 0 : index
    %32 = vector.load %arg6[%c0_15, %c0_16] : memref<256x128xbf16, #tpu.memory_space<vmem>>, vector<256x128xbf16>
    %cst_17 = arith.constant dense<0.000000e+00> : vector<16x128xf32>
    %33 = tpu.matmul %31, %32, %cst_17 {dimension_numbers = #tpu.dot_dimension_numbers<[1], [0], [0], [1], [0, 0, 1, 1], [], []>} : vector<16x256xbf16>, vector<256x128xbf16>, vector<16x128xf32> -> vector<16x128xf32>
    %c0_18 = arith.constant 0 : index
    %c0_19 = arith.constant 0 : index
    %34 = vector.load %arg7[%c0_18, %c0_19] : memref<1x128xf32, #tpu.memory_space<vmem>>, vector<1x128xf32>
    %35 = vector.broadcast %34 : vector<1x128xf32> to vector<16x128xf32>
    %36 = arith.addf %33, %35 : vector<16x128xf32>
    %c0_20 = arith.constant 0 : index
    %c0_21 = arith.constant 0 : index
    %37 = vector.load %arg8[%c0_20, %c0_21] : memref<16x128xf32, #tpu.memory_space<vmem>>, vector<16x128xf32>
    tpu.vector_store %arg8[%c0_20, %c0_21], %36 {strides = array<i32>} : memref<16x128xf32, #tpu.memory_space<vmem>>, vector<16x128xf32>,
    return
  }
  func.func @transform_0(%arg0: i32) -> (i32, i32) {
    %c0_i32 = arith.constant 0 : i32
    %c0_i32_0 = arith.constant 0 : i32
    return %arg0, %c0_i32 : i32, i32
  }
  func.func @transform_1(%arg0: i32) -> (i32, i32) {
    %c0_i32 = arith.constant 0 : i32
    %c0_i32_0 = arith.constant 0 : i32
    return %arg0, %c0_i32 : i32, i32
  }
  func.func @transform_2(%arg0: i32) -> (i32, i32) {
    %c0_i32 = arith.constant 0 : i32
    %c0_i32_0 = arith.constant 0 : i32
    %c0_i32_1 = arith.constant 0 : i32
    return %c0_i32, %c0_i32_0 : i32, i32
  }
  func.func @transform_3(%arg0: i32) -> (i32, i32) {
    %c0_i32 = arith.constant 0 : i32
    %c0_i32_0 = arith.constant 0 : i32
    %c0_i32_1 = arith.constant 0 : i32
    return %c0_i32, %c0_i32_0 : i32, i32
  }
  func.func @transform_4(%arg0: i32) -> (i32, i32) {
    %c0_i32 = arith.constant 0 : i32
    %c0_i32_0 = arith.constant 0 : i32
    %c0_i32_1 = arith.constant 0 : i32
    return %c0_i32, %c0_i32_0 : i32, i32
  }
  func.func @transform_5(%arg0: i32) -> (i32, i32) {
    %c0_i32 = arith.constant 0 : i32
    %c0_i32_0 = arith.constant 0 : i32
    %c0_i32_1 = arith.constant 0 : i32
    return %c0_i32, %c0_i32_0 : i32, i32
  }
  func.func @transform_6(%arg0: i32) -> (i32, i32) {
    %c0_i32 = arith.constant 0 : i32
    %c0_i32_0 = arith.constant 0 : i32
    %c0_i32_1 = arith.constant 0 : i32
    return %c0_i32, %c0_i32_0 : i32, i32
  }
  func.func @transform_7(%arg0: i32) -> (i32, i32) {
    %c0_i32 = arith.constant 0 : i32
    %c0_i32_0 = arith.constant 0 : i32
    return %arg0, %c0_i32 : i32, i32
  }
}

module attributes {stable_mosaic.version = 11 : i64} {
  func.func @vqa_kernel(%arg0: i32, %arg1: memref<16x768xbf16, #tpu.memory_space<vmem>>, %arg2: memref<16x768xbf16, #tpu.memory_space<vmem>>, %arg3: memref<768x768xbf16, #tpu.memory_space<vmem>>, %arg4: memref<768x256xbf16, #tpu.memory_space<vmem>>, %arg5: memref<1x256xf32, #tpu.memory_space<vmem>>, %arg6: memref<256x128xbf16, #tpu.memory_space<vmem>>, %arg7: memref<1x128xf32, #tpu.memory_space<vmem>>, %arg8: memref<16x128xf32, #tpu.memory_space<vmem>>) attributes {dimension_semantics = [#tpu.dimension_semantics<parallel>], iteration_bounds = array<i64: 2>, scalar_prefetch = 0 : i64, scratch_operands = 0 : i64, tpu.core_type = #tpu.core_type<tc>, window_params = [{transform_indices = @transform_0, window_bounds = array<i64: 16, 768>}, {transform_indices = @transform_1, window_bounds = array<i64: 16, 768>}, {pipeline_mode = #tpu.pipeline_mode<synchronous>, transform_indices = @transform_2, window_bounds = array<i64: 768, 768>}, {pipeline_mode = #tpu.pipeline_mode<synchronous>, transform_indices = @transform_3, window_bounds = array<i64: 768, 256>}, {pipeline_mode = #tpu.pipeline_mode<synchronous>, transform_indices = @transform_4, window_bounds = array<i64: 1, 256>}, {pipeline_mode = #tpu.pipeline_mode<synchronous>, transform_indices = @transform_5, window_bounds = array<i64: 256, 128>}, {pipeline_mode = #tpu.pipeline_mode<synchronous>, transform_indices = @transform_6, window_bounds = array<i64: 1, 128>}, {transform_indices = @transform_7, window_bounds = array<i64: 16, 128>}]} {
    %c0 = arith.constant 0 : index
    %c0_0 = arith.constant 0 : index
    %0 = vector.load %arg1[%c0, %c0_0] : memref<16x768xbf16, #tpu.memory_space<vmem>>, vector<16x768xbf16>
    %1 = arith.extf %0 : vector<16x768xbf16> to vector<16x768xf32>
    %c0_1 = arith.constant 0 : index
    %c0_2 = arith.constant 0 : index
    %2 = vector.load %arg2[%c0_1, %c0_2] : memref<16x768xbf16, #tpu.memory_space<vmem>>, vector<16x768xbf16>
    %3 = arith.extf %2 : vector<16x768xbf16> to vector<16x768xf32>
    %4 = arith.mulf %1, %1 : vector<16x768xf32>
    %cst = arith.constant dense<0.000000e+00> : vector<16xf32>
    %5 = vector.multi_reduction <add>, %4, %cst [1] : vector<16x768xf32> to vector<16xf32>
    %6 = vector.shape_cast %5 : vector<16xf32> to vector<16x1xf32>
    %cst_3 = arith.constant 1.000000e-24 : f32
    %7 = vector.broadcast %cst_3 : f32 to vector<16x1xf32>
    %8 = arith.maximumf %6, %7 : vector<16x1xf32>
    %9 = math.rsqrt %8 : vector<16x1xf32>
    %10 = arith.mulf %3, %3 : vector<16x768xf32>
    %cst_4 = arith.constant dense<0.000000e+00> : vector<16xf32>
    %11 = vector.multi_reduction <add>, %10, %cst_4 [1] : vector<16x768xf32> to vector<16xf32>
    %12 = vector.shape_cast %11 : vector<16xf32> to vector<16x1xf32>
    %cst_5 = arith.constant 1.000000e-24 : f32
    %13 = vector.broadcast %cst_5 : f32 to vector<16x1xf32>
    %14 = arith.maximumf %12, %13 : vector<16x1xf32>
    %15 = math.rsqrt %14 : vector<16x1xf32>
    %16 = arith.mulf %1, %3 : vector<16x768xf32>
    %17 = arith.mulf %9, %15 : vector<16x1xf32>
    %18 = vector.broadcast %17 : vector<16x1xf32> to vector<16x768xf32>
    %19 = arith.mulf %16, %18 : vector<16x768xf32>
    %20 = arith.truncf %19 : vector<16x768xf32> to vector<16x768xbf16>
    %c0_6 = arith.constant 0 : index
    %c0_7 = arith.constant 0 : index
    %21 = vector.load %arg3[%c0_6, %c0_7] : memref<768x768xbf16, #tpu.memory_space<vmem>>, vector<768x768xbf16>
    %cst_8 = arith.constant dense<0.000000e+00> : vector<16x768xf32>
    %22 = tpu.matmul %20, %21, %cst_8 {dimension_numbers = #tpu.dot_dimension_numbers<[1], [0], [0], [1], [0, 0, 1, 1], [], []>} : vector<16x768xbf16>, vector<768x768xbf16>, vector<16x768xf32> -> vector<16x768xf32>
    %cst_9 = arith.constant 0.000000e+00 : f32
    %23 = vector.broadcast %cst_9 : f32 to vector<16x768xf32>
    %24 = arith.maximumf %22, %23 : vector<16x768xf32>
    %25 = arith.truncf %24 : vector<16x768xf32> to vector<16x768xbf16>
    %c0_10 = arith.constant 0 : index
    %c0_11 = arith.constant 0 : index
    %26 = vector.load %arg4[%c0_10, %c0_11] : memref<768x256xbf16, #tpu.memory_space<vmem>>, vector<768x256xbf16>
    %cst_12 = arith.constant dense<0.000000e+00> : vector<16x256xf32>
    %27 = tpu.matmul %25, %26, %cst_12 {dimension_numbers = #tpu.dot_dimension_numbers<[1], [0], [0], [1], [0, 0, 1, 1], [], []>} : vector<16x768xbf16>, vector<768x256xbf16>, vector<16x256xf32> -> vector<16x256xf32>
    %c0_13 = arith.constant 0 : index
    %c0_14 = arith.constant 0 : index
    %28 = vector.load %arg5[%c0_13, %c0_14] : memref<1x256xf32, #tpu.memory_space<vmem>>, vector<1x256xf32>
    %29 = vector.broadcast %28 : vector<1x256xf32> to vector<16x256xf32>
    %30 = arith.addf %27, %29 : vector<16x256xf32>
    %31 = arith.truncf %30 : vector<16x256xf32> to vector<16x256xbf16>
    %c0_15 = arith.constant 0 : index
    %c0_16 = arith.constant 0 : index
    %32 = vector.load %arg6[%c0_15, %c0_16] : memref<256x128xbf16, #tpu.memory_space<vmem>>, vector<256x128xbf16>
    %cst_17 = arith.constant dense<0.000000e+00> : vector<16x128xf32>
    %33 = tpu.matmul %31, %32, %cst_17 {dimension_numbers = #tpu.dot_dimension_numbers<[1], [0], [0], [1], [0, 0, 1, 1], [], []>} : vector<16x256xbf16>, vector<256x128xbf16>, vector<16x128xf32> -> vector<16x128xf32>
    %c0_18 = arith.constant 0 : index
    %c0_19 = arith.constant 0 : index
    %34 = vector.load %arg7[%c0_18, %c0_19] : memref<1x128xf32, #tpu.memory_space<vmem>>, vector<1x128xf32>
    %35 = vector.broadcast %34 : vector<1x128xf32> to vector<16x128xf32>
    %36 = arith.addf %33, %35 : vector<16x128xf32>
    %c0_20 = arith.constant 0 : index
    %c0_21 = arith.constant 0 : index
    %37 = vector.load %arg8[%c0_20, %c0_21] : memref<16x128xf32, #tpu.memory_space<vmem>>, vector<16x128xf32>
    tpu.vector_store %arg8[%c0_20, %c0_21], %36 {strides = array<i32>} : memref<16x128xf32, #tpu.memory_space<vmem>>, vector<16x128xf32>,
    return
  }
  func.func @transform_0(%arg0: i32) -> (i32, i32) {
    %c0_i32 = arith.constant 0 : i32
    %c0_i32_0 = arith.constant 0 : i32
    return %arg0, %c0_i32 : i32, i32
  }
  func.func @transform_1(%arg0: i32) -> (i32, i32) {
    %c0_i32 = arith.constant 0 : i32
    %c0_i32_0 = arith.constant 0 : i32
    return %arg0, %c0_i32 : i32, i32
  }
  func.func @transform_2(%arg0: i32) -> (i32, i32) {
    %c0_i32 = arith.constant 0 : i32
    %c0_i32_0 = arith.constant 0 : i32
    %c0_i32_1 = arith.constant 0 : i32
    return %c0_i32, %c0_i32_0 : i32, i32
  }
  func.func @transform_3(%arg0: i32) -> (i32, i32) {
    %c0_i32 = arith.constant 0 : i32
    %c0_i32_0 = arith.constant 0 : i32
    %c0_i32_1 = arith.constant 0 : i32
    return %c0_i32, %c0_i32_0 : i32, i32
  }
  func.func @transform_4(%arg0: i32) -> (i32, i32) {
    %c0_i32 = arith.constant 0 : i32
    %c0_i32_0 = arith.constant 0 : i32
    %c0_i32_1 = arith.constant 0 : i32
    return %c0_i32, %c0_i32_0 : i32, i32
  }
  func.func @transform_5(%arg0: i32) -> (i32, i32) {
    %c0_i32 = arith.constant 0 : i32
    %c0_i32_0 = arith.constant 0 : i32
    %c0_i32_1 = arith.constant 0 : i32
    return %c0_i32, %c0_i32_0 : i32, i32
  }
  func.func @transform_6(%arg0: i32) -> (i32, i32) {
    %c0_i32 = arith.constant 0 : i32
    %c0_i32_0 = arith.constant 0 : i32
    %c0_i32_1 = arith.constant 0 : i32
    return %c0_i32, %c0_i32_0 : i32, i32
  }
  func.func @transform_7(%arg0: i32) -> (i32, i32) {
    %c0_i32 = arith.constant 0 : i32
    %c0_i32_0 = arith.constant 0 : i32
    return %arg0, %c0_i32 : i32, i32
  }
}

</mosaic_0001>

<bundles_post_ra>
// kernel: tpu_custom_call.1
= control target key start
LH: loop header
LB: loop body
LE: loop exit
PB: predicated region body
PF: predicated region fallthrough
CT: control target
= control target key end

     0   :  { %s5770_s0 = inlined_call_operand.hbm [shape: bf16[32,768], index: 0, kind: input, shape index: {}]   ;;  %s5771_s1 = inlined_call_operand.hbm [shape: bf16[32,768], index: 1, kind: input, shape index: {}]   ;;  %s5772_s2 = inlined_call_operand.hbm [shape: bf16[768,768], index: 2, kind: input, shape index: {}]   ;;  %s5773_s3 = inlined_call_operand.hbm [shape: bf16[768,256], index: 3, kind: input, shape index: {}]   ;;  %s5774_s4 = inlined_call_operand.hbm [shape: f32[1,256], index: 4, kind: input, shape index: {}]   ;;  %s5775_s5 = inlined_call_operand.hbm [shape: bf16[256,128], index: 5, kind: input, shape index: {}]   ;;  %s5776_s6 = inlined_call_operand.hbm [shape: f32[1,128], index: 6, kind: input, shape index: {}]   ;;  %s5777_s7 = inlined_call_operand.hbm [shape: f32[32,128], index: 7, kind: output, shape index: {}]  }
   0x1   :  { %5786 = sst [smem:[#allocation21_spill]] %s5770_s0 }
   0x2   :  { %5787 = sst [smem:[#allocation22_spill]] %s5772_s2 }
   0x3   :  { %5788 = sst [smem:[#allocation23_spill]] %s5773_s3 }
   0x4   :  { %5789 = sst [smem:[#allocation24_spill]] %s5774_s4 }
   0x5   :  { %12 = vsyncpa [#allocation3], 0 }
   0x6   :  { %14 = vsyncpa [#allocation3 + $0x1], 0 }
   0x7   :  { %15 = vsyncpa [#allocation6], 0 }
   0x8   :  { %17 = vsyncpa [#allocation6 + $0x1], 0 }
   0x9   :  { %18 = vsyncpa [#allocation9], 0 }
   0xa   :  { %19 = vsyncpa [#allocation12], 0 }
   0xb   :  { %20 = vsyncpa [#allocation4], 0 }
   0xc   :  { %22 = vsyncpa [#allocation4 + $0x1], 0  ;;  %s5267_s24 = smov 0   ;;  %s5269_s25 = smov 0  }
   0xd   :  { %s5271_s26 = smov 0   ;;  %s5273_s27 = smov 0  }
   0xe LB: > { %s5211_s28 = smov [#allocation7]   ;;  %s5288_s30 = sadd.s32 4294967295, %s5209_s27   ;;  %s5209_s27 = sphi %s5273_s27, %s5819_s27   ;;  %s5205_s26 = sphi %s5271_s26, %s5818_s26   ;;  %s5201_s25 = sphi %s5269_s25, %s5817_s25   ;;  %s5197_s24 = sphi %s5267_s24, %s5816_s24  }
   0xf   : > { %s228_s29 = sshll.u32 %s5211_s28, 4  ;;  %p3727_p0 = scmp.ge.s32.totalorder %s5209_s27, 1  ;;  %s5293_s29 = int_to_ptr.vmem [resolvable:$true] %s228_s29 }
  0x10   : > { %p5778_p1 = scmp.eq.s32.totalorder %s5288_s30, 0  ;;  %p216_p2 = scmp.lt.s32.totalorder %s5209_s27, 3 }
  0x11   : > { %s5212_s9 = smov [#allocation8]   ;;  %s5213_s12 = smov [#allocation11]  }
  0x12   : > { %p5295_p3 = pnand %p3727_p0, %p216_p2  ;;  %s241_s10 = sshll.u32 %s5212_s9, 4  ;;  %s5308_s10 = int_to_ptr.vmem [resolvable:$true] %s241_s10 }
  0x13   : > { %s5310_s13 = sshll.u32 %s5213_s12, 4  ;;  %s5792_s2 = sld [smem:[#allocation22_spill]]  ;;  %s266_s13 = int_to_ptr.vmem [resolvable:$true] %s5310_s13 }
  0x14   : > { %s5790_s8 = scalar_select %p5295_p3, 1, 0 }
  0x15   : > { %p4243_p5 = pneg %p5295_p3 }
  0x17   : > { %p5304_p6 = pnand %p4243_p5, %p5778_p1 }
  0x19   : > { %s4927_s16 = scalar_lea.hbm %s5792_s2, 36864  ;;  %p5320_p8 = pneg %p5304_p6 }
  0x1a   : > { %p4928_p7 = scmp.ne.s32.totalorder %s5792_s2, %s4927_s16  ;;  %p4934_p11 = scmp.lt.u32.totalorder %s4927_s16, %s5792_s2 }
  0x1c   : > { %p4930_p9 = pnand %p5320_p8, %p4928_p7 }
  0x1e   : > { %p4931_p10 = pneg %p4930_p9 }
  0x20   : > { %p4936_p12 = pnand %p4934_p11, %p4931_p10 }
  0x22   : > { %4939 = shalt.err (!%p4936_p12)
}
  0x23   : > { %s4940_s22 = scalar_lea.vmem %s5293_s29, 36864  ;;  %p4948_p5 = scmp.lt.s32.totalorder %s5293_s29, %s5293_s29 }
  0x24   : > { %p4941_p13 = scmp.ne.s32.totalorder %s5293_s29, %s4940_s22  ;;  %p4949_p4 = scmp.lt.s32.totalorder %s4940_s22, %s4940_s22 }
  0x26   : > { %p4943_p0 = pnand %p4941_p13, %p5320_p8  ;;  %p4950_p7 = por %p4949_p4, %p4948_p5 }
  0x28   : > { %p4944_p2 = pneg %p4943_p0 }
  0x2a   : > { %p4951_p9 = pnand %p4950_p7, %p4944_p2 }
  0x2c   : > { %4954 = shalt.err (!%p4951_p9)
}
  0x2d   : > { %s5780_s23 = smov 384   ;;  %s5782_s28 = smov 24  }
  0x2e   : > { %4246 = dma.hbm_to_vmem [thread:$0]  (!%p5304_p6), %s5792_s2, 36864, %s5293_s29, [#allocation6], %s5780_s23, %s5780_s23, %s5782_s28  }
  0x2f   : > { %s5794_s3 = sld [smem:[#allocation23_spill]] }
  0x35   : > { %s4955_s16 = scalar_lea.hbm %s5794_s3, 12288 }
  0x36   : > { %p4956_p4 = scmp.ne.s32.totalorder %s5794_s3, %s4955_s16  ;;  %p4962_p12 = scmp.lt.u32.totalorder %s4955_s16, %s5794_s3 }
  0x38   : > { %p4958_p10 = pnand %p4956_p4, %p5320_p8 }
  0x3a   : > { %p4959_p11 = pneg %p4958_p10 }
  0x3c   : > { %p4964_p13 = pnand %p4962_p12, %p4959_p11 }
  0x3e   : > { %4967 = shalt.err (!%p4964_p13)
}
  0x3f   : > { %s4968_s29 = scalar_lea.vmem %s5308_s10, 12288  ;;  %p4976_p7 = scmp.lt.s32.totalorder %s5308_s10, %s5308_s10 }
  0x40   : > { %p4969_p0 = scmp.ne.s32.totalorder %s5308_s10, %s4968_s29  ;;  %p4977_p9 = scmp.lt.s32.totalorder %s4968_s29, %s4968_s29 }
  0x42   : > { %p4971_p2 = pnand %p4969_p0, %p5320_p8  ;;  %p4978_p4 = por %p4977_p9, %p4976_p7 }
  0x44   : > { %p4972_p5 = pneg %p4971_p2 }
  0x46   : > { %p4979_p10 = pnand %p4978_p4, %p4972_p5 }
  0x48   : > { %4982 = shalt.err (!%p4979_p10)
}
  0x49   : > { %s5216_s22 = smov 128   ;;  %s5217_s9 = smov 8  }
  0x4a   : > { %4249 = dma.hbm_to_vmem [thread:$0]  (!%p5304_p6), %s5794_s3, 12288, %s5308_s10, [#allocation9], %s5216_s22, %s5216_s22, %s5217_s9  }
  0x4b   : > { %s4983_s17 = scalar_lea.hbm %s5775_s5, 2048 }
  0x4c   : > { %p4984_p11 = scmp.ne.s32.totalorder %s5775_s5, %s4983_s17  ;;  %p4990_p0 = scmp.lt.u32.totalorder %s4983_s17, %s5775_s5 }
  0x4e   : > { %p4986_p12 = pnand %p4984_p11, %p5320_p8 }
  0x50   : > { %p4987_p13 = pneg %p4986_p12 }
  0x52   : > { %p4992_p2 = pnand %p4990_p0, %p4987_p13 }
  0x54   : > { %4995 = shalt.err (!%p4992_p2)
}
  0x55   : > { %s4996_s12 = scalar_lea.vmem %s266_s13, 2048  ;;  %p5004_p4 = scmp.lt.s32.totalorder %s266_s13, %s266_s13 }
  0x56   : > { %p4997_p5 = scmp.ne.s32.totalorder %s266_s13, %s4996_s12  ;;  %p5005_p10 = scmp.lt.s32.totalorder %s4996_s12, %s4996_s12 }
  0x58   : > { %p4999_p7 = pnand %p4997_p5, %p5320_p8  ;;  %p5006_p1 = por %p5005_p10, %p5004_p4 }
  0x5a   : > { %p5000_p9 = pneg %p4999_p7 }
  0x5c   : > { %p5007_p3 = pnand %p5006_p1, %p5000_p9 }
  0x5e   : > { %5010 = shalt.err (!%p5007_p3)
}
  0x5f   : > { %s5218_s10 = smov 64   ;;  %s5219_s22 = smov 4  }
  0x60   : > { %4255 = dma.hbm_to_vmem [thread:$0]  (!%p5304_p6), %s5775_s5, 2048, %s266_s13, [#allocation12], %s5218_s10, %s5218_s10, %s5219_s22  }
  0x61   : > { %s5220_s15 = smov [#allocation10]   ;;  %s5221_s17 = smov [#allocation13]  }
  0x62   : > { %s255_s16 = sshll.u32 %s5220_s15, 4  ;;  %s279_s18 = sshll.u32 %s5221_s17, 4  ;;  %s256_s16 = int_to_ptr.vmem [resolvable:$true] %s255_s16  ;;  %s280_s18 = int_to_ptr.vmem [resolvable:$true] %s279_s18 }
  0x63   : > { %s5795_s4 = sld [smem:[#allocation24_spill]] }
  0x69   : > { %s5011_s29 = scalar_lea.hbm %s5795_s4, 32 }
  0x6a   : > { %p5012_p1 = scmp.ne.s32.totalorder %s5795_s4, %s5011_s29  ;;  %p5018_p12 = scmp.lt.u32.totalorder %s5011_s29, %s5795_s4 }
  0x6c   : > { %p5014_p3 = pnand %p5012_p1, %p5320_p8 }
  0x6e   : > { %p5015_p11 = pneg %p5014_p3 }
  0x70   : > { %p5020_p13 = pnand %p5018_p12, %p5015_p11 }
  0x72   : > { %5023 = shalt.err (!%p5020_p13)
}
  0x73   : > { %s5024_s13 = scalar_lea.vmem %s256_s16, 32  ;;  %p5032_p7 = scmp.lt.s32.totalorder %s256_s16, %s256_s16 }
  0x74   : > { %p5025_p0 = scmp.ne.s32.totalorder %s256_s16, %s5024_s13  ;;  %p5033_p9 = scmp.lt.s32.totalorder %s5024_s13, %s5024_s13 }
  0x76   : > { %p5027_p2 = pnand %p5025_p0, %p5320_p8  ;;  %p5034_p4 = por %p5033_p9, %p5032_p7 }
  0x78   : > { %p5028_p5 = pneg %p5027_p2 }
  0x7a   : > { %p5035_p10 = pnand %p5034_p4, %p5028_p5 }
  0x7c   : > { %5038 = shalt.err (!%p5035_p10)
}
  0x7d   : > { %4252 = dma.hbm_to_vmem [thread:$0]  (!%p5304_p6), %s5795_s4, 32, %s256_s16, [#allocation9]  }
  0x7e   : > { %s5039_s22 = scalar_lea.hbm %s5776_s6, 16 }
  0x7f   : > { %p5040_p1 = scmp.ne.s32.totalorder %s5776_s6, %s5039_s22  ;;  %p5046_p12 = scmp.lt.u32.totalorder %s5039_s22, %s5776_s6 }
  0x81   : > { %p5042_p3 = pnand %p5040_p1, %p5320_p8 }
  0x83   : > { %p5043_p11 = pneg %p5042_p3 }
  0x85   : > { %p5048_p13 = pnand %p5046_p12, %p5043_p11 }
  0x87   : > { %5051 = shalt.err (!%p5048_p13)
}
  0x88   : > { %s5052_s20 = scalar_lea.vmem %s280_s18, 16  ;;  %s5059_s16 = scalar_lea.vmem %s280_s18, 32 }
  0x89   : > { %p5053_p0 = scmp.ne.s32.totalorder %s280_s18, %s5052_s20  ;;  %p5060_p7 = scmp.lt.s32.totalorder %s280_s18, %s280_s18 }
  0x8a   : > { %p5061_p9 = scmp.lt.s32.totalorder %s5059_s16, %s5052_s20 }
  0x8b   : > { %p5055_p2 = pnand %p5053_p0, %p5320_p8 }
  0x8c   : > { %p5062_p4 = por %p5061_p9, %p5060_p7 }
  0x8d   : > { %p5056_p5 = pneg %p5055_p2 }
  0x8f   : > { %p5063_p10 = pnand %p5062_p4, %p5056_p5 }
  0x91   : > { %5066 = shalt.err (!%p5063_p10)
}
  0x92   : > { %4258 = dma.hbm_to_vmem [thread:$0]  (!%p5304_p6), %s5776_s6, 16, %s280_s18, [#allocation12]  }
  0x93   : > { %s3726_s19 = sadd.s32 4294967294, %s5209_s27   ;;  %s5424_s11 = sadd.s32 1, %s5209_s27  }
  0x94   : > { %s35_s12 = sadd.s32 1, %s5205_s26  ;;  %s32_s13 = ssub.s32 %s5209_s27, %s5424_s11 }
  0x95   : > { %p42_p8 = scmp.ne.s32.totalorder %s5205_s26, %s5201_s25  ;;  %p33_p1 = scmp.eq.s32.totalorder %s32_s13, 0 }
  0x96   : > { %p43_p3 = scmp.eq.s32.totalorder %s5209_s27, 0  ;;  %p48_p11 = scmp.ne.s32.totalorder %s5201_s25, %s5197_s24 }
  0x97   : > { %p203_p12 = scmp.eq.s32.totalorder %s5288_s30, 1  ;;  %p5796_p0 = scmp.eq.s32.totalorder %s5288_s30, 0 }
  0x98   : > { %s5436_s23 = scalar_select %p33_p1, %s5205_s26, %s35_s12  }
  0x99   : > { %p44_p13 = por %p43_p3, %p42_p8  ;;  %p5440_p6 = por %p5796_p0, %p48_p11 }
  0x9a   : > { %p5444_p2 = por %p203_p12, %p42_p8  ;;  %p209_p5 = scmp.eq.s32.totalorder %s3726_s19, 1 }
  0x9b   : > { %p4275_p7 = scmp.lt.s32.totalorder %s5209_s27, 2  ;;  %s290_s2 = sand.u32 1, %s5205_s26  }
  0x9c   : > { %s5798_s10 = scalar_select %p5444_p2, 1, 0 }
  0x9d   : > { %p5450_p9 = por %p209_p5, %p48_p11  ;;  %s5454_s22 = smul.u32 48, %s290_s2 }
  0x9e   : > { %p5456_p4 = pnand %p4275_p7, %p44_p13  ;;  %s5784_s14 = smul.u32 768, %s5209_s27 }
  0x9f   : > { %s5799_s28 = scalar_select %p5450_p9, 1, 0 }
  0xa0   : > { %s5801_s0 = sld [smem:[#allocation21_spill]]  ;;  %s294_s21 = scalar_lea.vmem [#allocation2], %s5454_s22 }
  0xa1   : > { %s302_s29 = sshll.u32 %s294_s21, 4  ;;  %s5472_s19 = scalar_lea.sflag [#allocation3], %s290_s2  ;;  %s5470_s29 = int_to_ptr.vmem [resolvable:$true] %s302_s29 }
  0xa2   : > { %p5069_p8 = pneg %p5456_p4 }
  0xa6   : > { %s5467_s16 = scalar_lea.hbm %s5801_s0, %s5784_s14  ;;  %s5072_s20 = scalar_lea.hbm %s5801_s0, 1536 }
  0xa7   : > { %s5067_s12 = scalar_lea.hbm %s5467_s16, 768  ;;  %p5073_p11 = scmp.lt.u32.totalorder %s5467_s16, %s5801_s0 }
  0xa8   : > { %p5068_p10 = scmp.ne.s32.totalorder %s5467_s16, %s5067_s12  ;;  %p5074_p12 = scmp.lt.u32.totalorder %s5072_s20, %s5067_s12 }
  0xa9   : > { %p5076_p0 = scmp.lt.u32.totalorder %s5067_s12, %s5467_s16 }
  0xaa   : > { %p5070_p1 = pnand %p5069_p8, %p5068_p10  ;;  %p5075_p13 = por %p5074_p12, %p5073_p11 }
  0xac   : > { %p5071_p3 = pneg %p5070_p1  ;;  %p5077_p5 = por %p5076_p0, %p5075_p13 }
  0xae   : > { %p5078_p7 = pnand %p5077_p5, %p5071_p3 }
  0xb0   : > { %5081 = shalt.err (!%p5078_p7)
}
  0xb1   : > { %s5082_s2 = scalar_lea.vmem %s5470_s29, 768  ;;  %s5222_s21 = smov [#allocation2]  }
  0xb2   : > { %p5083_p10 = scmp.ne.s32.totalorder %s5470_s29, %s5082_s2  ;;  %s5087_s13 = sshll.u32 %s5222_s21, 4  ;;  %s5088_s13 = int_to_ptr.vmem [resolvable:$false] %s5087_s13 }
  0xb3   : > { %s5089_s14 = scalar_lea.vmem %s5088_s13, 1536  ;;  %p5090_p2 = scmp.lt.s32.totalorder %s5470_s29, %s5088_s13 }
  0xb4   : > { %p5085_p1 = pnand %p5083_p10, %p5069_p8  ;;  %p5091_p11 = scmp.lt.s32.totalorder %s5089_s14, %s5082_s2 }
  0xb6   : > { %p5086_p9 = pneg %p5085_p1  ;;  %p5092_p12 = por %p5091_p11, %p5090_p2 }
  0xb8   : > { %p5093_p13 = pnand %p5092_p12, %p5086_p9 }
  0xba   : > { %5096 = shalt.err (!%p5093_p13)
}
  0xbb   : > { %s5802_s15 = smov 24   ;;  %s5803_s12 = smov 384  }
  0xbc   : > { %4262 = dma.hbm_to_vmem [thread:$0]  (!%p5456_p4), %s5467_s16, 768, %s5470_s29, %s5472_s19, %s5803_s12, %s5803_s12, %s5802_s15  }
  0xbd   : > { %s5804_s17 = smul.u32 768, %s5209_s27  ;;  %s316_s13 = scalar_lea.vmem [#allocation5], %s5454_s22 }
  0xbe   : > { %s324_s14 = sshll.u32 %s316_s13, 4  ;;  %s5805_s0 = sand.u32 1, %s5209_s27   ;;  %s5511_s14 = int_to_ptr.vmem [resolvable:$true] %s324_s14 }
  0xbf   : > { %s5508_s2 = scalar_lea.hbm %s5771_s1, %s5804_s17  ;;  %s5515_s3 = scalar_lea.sflag [#allocation6], %s5805_s0 }
  0xc0   : > { %s5097_s4 = scalar_lea.hbm %s5508_s2, 768  ;;  %s5102_s19 = scalar_lea.hbm %s5771_s1, 1536 }
  0xc1   : > { %p5098_p2 = scmp.ne.s32.totalorder %s5508_s2, %s5097_s4  ;;  %p5103_p0 = scmp.lt.u32.totalorder %s5508_s2, %s5771_s1 }
  0xc2   : > { %p5104_p5 = scmp.lt.u32.totalorder %s5102_s19, %s5097_s4  ;;  %p5106_p10 = scmp.lt.u32.totalorder %s5097_s4, %s5508_s2 }
  0xc3   : > { %p5100_p9 = pnand %p5098_p2, %p5069_p8 }
  0xc4   : > { %p5105_p7 = por %p5104_p5, %p5103_p0 }
  0xc5   : > { %p5101_p3 = pneg %p5100_p9 }
  0xc6   : > { %p5107_p1 = por %p5106_p10, %p5105_p7 }
  0xc8   : > { %p5108_p11 = pnand %p5107_p1, %p5101_p3 }
  0xca   : > { %5111 = shalt.err (!%p5108_p11)
}
  0xcb   : > { %s5112_s0 = scalar_lea.vmem %s5511_s14, 768  ;;  %s5223_s22 = smov [#allocation5]  }
  0xcc   : > { %p5113_p12 = scmp.ne.s32.totalorder %s5511_s14, %s5112_s0  ;;  %s5117_s21 = sshll.u32 %s5223_s22, 4  ;;  %s5118_s21 = int_to_ptr.vmem [resolvable:$false] %s5117_s21 }
  0xcd   : > { %s5119_s13 = scalar_lea.vmem %s5118_s21, 1536  ;;  %p5120_p9 = scmp.lt.s32.totalorder %s5511_s14, %s5118_s21 }
  0xce   : > { %p5115_p13 = pnand %p5113_p12, %p5069_p8  ;;  %p5121_p0 = scmp.lt.s32.totalorder %s5119_s13, %s5112_s0 }
  0xd0   : > { %p5116_p2 = pneg %p5115_p13  ;;  %p5122_p5 = por %p5121_p0, %p5120_p9 }
  0xd2   : > { %p5123_p7 = pnand %p5122_p5, %p5116_p2 }
  0xd4   : > { %5126 = shalt.err (!%p5123_p7)
}
  0xd5   : > { %4265 = dma.hbm_to_vmem [thread:$0]  (!%p5456_p4), %s5508_s2, 768, %s5511_s14, %s5515_s3, %s5803_s12, %s5803_s12, %s5802_s15  }
  0xd6   : > { %p5806_p8 = scmp.ne.s32.totalorder %s5790_s8, 0 }
  0xd7   : > { %s5547_s4 = sand.u32 (!%p5806_p8), 1, %s5201_s25  }
  0xd8   : > { %336 = sbr.rel (%p5806_p8) target bundleno = 1419 (0x58b), region = 48  ;;  %s339_s29 = scalar_lea.sflag (!%p5806_p8), [#allocation3], %s5547_s4 }
  0xd9   : > { %s4216_s16 = smul.u32 (!%p5806_p8), 48, %s5547_s4 }
  0xdb   : > { %s5551_s19 = scalar_lea.vmem (!%p5806_p8), [#allocation2], %s4216_s16 }
  0xdf   : > { %5172 = dma.done.wait (%p5440_p6), %s339_s29, 768  }
  0xe0   : > { %5174 = vsyncadd (%p5440_p6), %s339_s29, 4294966528  ;;  %s347_s3 = sand.u32 1, %s5288_s30   ;;  %s5558_s9 = scalar_lea.vmem [#allocation5], %s4216_s16 }
  0xe1   : > { %s348_s8 = scalar_lea.sflag [#allocation6], %s347_s3 }
  0xe2   : > { %5176 = dma.done.wait (%p5440_p6), %s348_s8, 768  }
  0xe3   : > { %5178 = vsyncadd (%p5440_p6), %s348_s8, 4294966528  ;;  %p5807_p4 = scmp.eq.s32.totalorder %s5288_s30, 0 }
  0xe5   : > { %5180 = dma.done.wait (%p5807_p4), [#allocation6], 36864   ;;  %p5808_p3 = pmov %p5807_p4 }
  0xe7   : > { %5182 = vsyncadd (%p5808_p3), [#allocation6], 4294930432  ;;  %p5809_p10 = pmov %p5808_p3 }
  0xe8   : > { %p5810_p1 = pmov %p5808_p3 }
  0xe9   : > { %5184 = dma.done.wait (%p5809_p10), [#allocation9], 12320  }
  0xea   : > { %5186 = vsyncadd (%p5810_p1), [#allocation9], 4294954976  ;;  %p5811_p11 = pmov %p5810_p1 }
  0xeb   : > { %p5812_p12 = pmov %p5810_p1 }
  0xec   : > { %5188 = dma.done.wait (%p5811_p11), [#allocation12], 2064  }
  0xed   : > { %5190 = vsyncadd (%p5812_p12), [#allocation12], 4294965232  ;;  %v429_v0 = vld [vmem:[%s5558_s9] sm:$0xff]  ;;  %v430_v1 = vld [vmem:[%s5558_s9 + $0x8] sm:$0xff]  ;;  %s3746_s18 = sshll.u32 %s5547_s4, 4  ;;  %s4153_s2 = sshll.u32 %s5288_s30, 8 }
  0xee   : > { %v431_v2 = vld [vmem:[%s5558_s9 + $0x10] sm:$0xff]  ;;  %v5579_v3 = vunpack.c.l.bf16 %v429_v0  ;;  %v5581_v4 = vunpack.c.h.bf16 %v429_v0  ;;  %v5583_v5 = vunpack.c.l.bf16 %v430_v1  ;;  %v5585_v6 = vunpack.c.h.bf16 %v430_v1  ;;  %v411_v7 = vld [vmem:[%s5551_s19] sm:$0xff]  ;;  %v412_v8 = vld [vmem:[%s5551_s19 + $0x8] sm:$0xff]  ;;  %s406_s15 = scalar_lea.vmem [#allocation14], %s3746_s18  ;;  %s5726_s20 = scalar_lea.hbm %s5777_s7, %s4153_s2 }
  0xef   : > { %v439_v9 = vunpack.c.l.bf16 %v431_v2  ;;  %v413_v10 = vld [vmem:[%s5551_s19 + $0x10] sm:$0xff]  ;;  %v5590_v11 = vunpack.c.l.bf16 %v411_v7  ;;  %v5592_v12 = vunpack.c.h.bf16 %v411_v7  ;;  %v440_v13 = vunpack.c.h.bf16 %v431_v2  ;;  %v432_v17 = vld [vmem:[%s5558_s9 + $0x18] sm:$0xff]  ;;  %v433_v18 = vld [vmem:[%s5558_s9 + $0x20] sm:$0xff]  ;;  %s3583_s12 = sshll.u32 %s406_s15, 4  ;;  %s3570_s0 = scalar_lea.sflag [#allocation4], %s5547_s4  ;;  %s5721_s12 = int_to_ptr.vmem [resolvable:$true] %s3583_s12 }
  0xf0   : > { %v477_v14 = vmul.f32 %v5579_v3, %v5579_v3  ;;  %v478_v15 = vmul.f32 %v5581_v4, %v5581_v4  ;;  %v479_v16 = vmul.f32 %v5583_v5, %v5583_v5  ;;  %v480_v19 = vmul.f32 %v5585_v6, %v5585_v6  ;;  %v434_v22 = vld [vmem:[%s5558_s9 + $0x28] sm:$0xff]  ;;  %v414_v39 = vld [vmem:[%s5551_s19 + $0x18] sm:$0xff]  ;;  %v415_v45 = vld [vmem:[%s5551_s19 + $0x20] sm:$0xff]  ;;  %s5127_s22 = scalar_lea.vmem %s5721_s12, 256  ;;  %p5813_p13 = scmp.ne.s32.totalorder %s5798_s10, 0 }
  0xf1   : > { %v5604_v20 = vunpack.c.l.bf16 %v412_v8  ;;  %v5606_v21 = vunpack.c.h.bf16 %v412_v8  ;;  %v4327_v23 = vld [vmem:[#allocation7 + $0x4] ss:$24 sps:$4 sm:$0xff]   ;;  %v481_v24 = vmul.f32 %v439_v9, %v439_v9  ;;  %v421_v26 = vunpack.c.l.bf16 %v413_v10  ;;  %v4331_v33 = vld [vmem:[#allocation7] ss:$24 sps:$4 sm:$0xff]   ;;  %v4333_v40 = vld [vmem:[#allocation7 + $0x34] ss:$24 sps:$4 sm:$0xff]   ;;  %p5128_p6 = scmp.ne.s32.totalorder %s5721_s12, %s5127_s22 }
  0xf2   : > { %v489_v25 = vadd.f32 %v478_v15, %v477_v14  ;;  %v447_v27 = vmul.f32 %v5590_v11, %v5590_v11  ;;  %v4329_v28 = vld [vmem:[#allocation7 + $0xc] ss:$24 sps:$4 sm:$0xff]   ;;  %v422_v29 = vunpack.c.h.bf16 %v413_v10  ;;  %v448_v30 = vmul.f32 %v5592_v12, %v5592_v12  ;;  %2267 = vmatprep.subr.bf16.mxu0 %v4327_v23  ;;  %v4332_v34 = vld [vmem:[#allocation7 + $0x8] ss:$24 sps:$4 sm:$0xff]   ;;  %v4335_v46 = vld [vmem:[#allocation7 + $0x3c] ss:$24 sps:$4 sm:$0xff]  }
  0xf3   : > { %v449_v31 = vmul.f32 %v5604_v20, %v5604_v20  ;;  %v5615_v32 = vunpack.c.l.bf16 %v432_v17  ;;  %v482_v35 = vmul.f32 %v440_v13, %v440_v13  ;;  %v450_v37 = vmul.f32 %v5606_v21, %v5606_v21  ;;  %2396 = vmatprep.subr.bf16.mxu1 %v4329_v28  ;;  %2268 = vmatpush1.bf16.msra.mxu0 %v4331_v33  ;;  %v4337_v47 = vld [vmem:[#allocation7 + $0x30] ss:$24 sps:$4 sm:$0xff]   ;;  %v4339_v57 = vld [vmem:[#allocation7 + $0x64] ss:$24 sps:$4 sm:$0xff]   ;;  %v4343_v0 = vld [vmem:[#allocation7 + $0x60] ss:$24 sps:$4 sm:$0xff]   ;;  %p5129_p2 = pnand %p5128_p6, %p5813_p13 }
  0xf4   : > { %v490_v36 = vadd.f32 %v489_v25, %v479_v16  ;;  %v5619_v38 = vmul.f32 %v439_v9, %v421_v26  ;;  %v459_v41 = vadd.f32 %v448_v30, %v447_v27  ;;  %v5622_v42 = vmul.f32 %v440_v13, %v422_v29  ;;  %2397 = vmatpush1.bf16.msra.mxu1 %v4332_v34  ;;  %v4338_v52 = vld [vmem:[#allocation7 + $0x38] ss:$24 sps:$4 sm:$0xff]   ;;  %v4341_v63 = vld [vmem:[#allocation7 + $0x6c] ss:$24 sps:$4 sm:$0xff]   ;;  %v4344_v9 = vld [vmem:[#allocation7 + $0x68] ss:$24 sps:$4 sm:$0xff]  }
  0xf5   : > { %v5624_v43 = vunpack.c.h.bf16 %v432_v17  ;;  %v5626_v44 = vunpack.c.l.bf16 %v433_v18  ;;  %v451_v49 = vmul.f32 %v421_v26, %v421_v26  ;;  %v5629_v50 = vunpack.c.h.bf16 %v433_v18  ;;  %2269 = vmatprep.subr.bf16.mxu0 %v4333_v40  ;;  %2398 = vmatprep.subr.bf16.mxu1 %v4335_v46  ;;  %v416_v62 = vld [vmem:[%s5551_s19 + $0x28] sm:$0xff]  ;;  %p5130_p9 = pneg %p5129_p2  ;;  %s5224_s30 = smov [#allocation14]  }
  0xf6   : > { %v491_v48 = vadd.f32 %v490_v36, %v480_v19  ;;  %v445_v51 = vunpack.c.l.bf16 %v434_v22  ;;  %v460_v53 = vadd.f32 %v459_v41, %v449_v31  ;;  %v483_v54 = vmul.f32 %v5615_v32, %v5615_v32  ;;  %v4345_v16 = vld [vmem:[#allocation7 + $0x94] ss:$24 sps:$4 sm:$0xff]   ;;  %v4349_v31 = vld [vmem:[#allocation7 + $0x90] ss:$24 sps:$4 sm:$0xff]   ;;  %v4355_v46 = vld [vmem:[#allocation7 + $0xc0] ss:$24 sps:$4 sm:$0xff]  }
  0xf7   : > { %v484_v55 = vmul.f32 %v5624_v43, %v5624_v43  ;;  %v485_v56 = vmul.f32 %v5626_v44, %v5626_v44  ;;  %v452_v59 = vmul.f32 %v422_v29, %v422_v29  ;;  %v446_v60 = vunpack.c.h.bf16 %v434_v22  ;;  %2270 = vmatpush1.bf16.msra.mxu0 %v4337_v47  ;;  %v4347_v23 = vld [vmem:[#allocation7 + $0x9c] ss:$24 sps:$4 sm:$0xff]   ;;  %v4350_v33 = vld [vmem:[#allocation7 + $0x98] ss:$24 sps:$4 sm:$0xff]   ;;  %v4353_v40 = vld [vmem:[#allocation7 + $0xcc] ss:$24 sps:$4 sm:$0xff]  }
  0xf8   : > { %v492_v58 = vadd.f32 %v491_v48, %v481_v24  ;;  %v486_v61 = vmul.f32 %v5629_v50, %v5629_v50  ;;  %v461_v1 = vadd.f32 %v460_v53, %v450_v37  ;;  %v5640_v7 = vunpack.c.l.bf16 %v414_v39  ;;  %2399 = vmatpush1.bf16.msra.mxu1 %v4338_v52  ;;  %2271 = vmatprep.subr.bf16.mxu0 %v4339_v57  ;;  %v4351_v37 = vld [vmem:[#allocation7 + $0xc4] ss:$24 sps:$4 sm:$0xff]   ;;  %v4356_v48 = vld [vmem:[#allocation7 + $0xc8] ss:$24 sps:$4 sm:$0xff]   ;;  %v4357_v52 = vld [vmem:[#allocation7 + $0xf4] ss:$24 sps:$4 sm:$0xff]  }
  0xf9   : > { %v496_v2 = vadd.f32 %v484_v55, %v483_v54  ;;  %v5642_v8 = vunpack.c.h.bf16 %v414_v39  ;;  %v487_v13 = vmul.f32 %v445_v51, %v445_v51  ;;  %v5644_v14 = vunpack.c.l.bf16 %v415_v45  ;;  %2400 = vmatprep.subr.bf16.mxu1 %v4341_v63  ;;  %v4359_v53 = vld [vmem:[#allocation7 + $0xfc] ss:$24 sps:$4 sm:$0xff]   ;;  %v4361_v55 = vld [vmem:[#allocation7 + $0xf0] ss:$24 sps:$4 sm:$0xff]   ;;  %s5131_s21 = sshll.u32 %s5224_s30, 4  ;;  %s5132_s21 = int_to_ptr.vmem [resolvable:$false] %s5131_s21 }
  0xfa   : > { %v493_v10 = vadd.f32 %v492_v58, %v482_v35  ;;  %v5646_v15 = vunpack.c.h.bf16 %v415_v45  ;;  %v462_v17 = vadd.f32 %v461_v1, %v451_v49  ;;  %v427_v19 = vunpack.c.l.bf16 %v416_v62  ;;  %v4363_v58 = vld [vmem:[#allocation7 + $0x124] ss:$24 sps:$4 sm:$0xff]   ;;  %v4374_v1 = vld [vmem:[#allocation7 + $0x158] ss:$24 sps:$4 sm:$0xff]   ;;  %s5133_s13 = scalar_lea.vmem %s5132_s21, 512  ;;  %p5134_p0 = scmp.lt.s32.totalorder %s5721_s12, %s5132_s21 }
  0xfb   : > { %v497_v18 = vadd.f32 %v496_v2, %v485_v56  ;;  %v453_v22 = vmul.f32 %v5640_v7, %v5640_v7  ;;  %v428_v24 = vunpack.c.h.bf16 %v416_v62  ;;  %v454_v25 = vmul.f32 %v5642_v8, %v5642_v8  ;;  %2272 = vmatpush1.bf16.msra.mxu0 %v4343_v0  ;;  %v4362_v56 = vld [vmem:[#allocation7 + $0xf8] ss:$24 sps:$4 sm:$0xff]   ;;  %v4369_v62 = vld [vmem:[#allocation7 + $0x154] ss:$24 sps:$4 sm:$0xff]   ;;  %v4375_v2 = vld [vmem:[#allocation7 + $0x184] ss:$24 sps:$4 sm:$0xff]   ;;  %p5135_p5 = scmp.lt.s32.totalorder %s5133_s13, %s5127_s22 }
  0xfc   : > { %494 = vadd.xlane.f32.xlu1 %v493_v10  ;;  %v455_v26 = vmul.f32 %v5644_v14, %v5644_v14  ;;  %v463_v27 = vadd.f32 %v462_v17, %v452_v59  ;;  %v488_v28 = vmul.f32 %v446_v60, %v446_v60  ;;  %v5654_v30 = vmul.f32 %v445_v51, %v427_v19  ;;  %v4365_v59 = vld [vmem:[#allocation7 + $0x12c] ss:$24 sps:$4 sm:$0xff]   ;;  %v4371_v63 = vld [vmem:[#allocation7 + $0x15c] ss:$24 sps:$4 sm:$0xff]   ;;  %v4373_v0 = vld [vmem:[#allocation7 + $0x150] ss:$24 sps:$4 sm:$0xff]  }
  0xfd   : > { %v498_v29 = vadd.f32 %v497_v18, %v486_v61  ;;  %v456_v34 = vmul.f32 %v5646_v15, %v5646_v15  ;;  %v466_v35 = vadd.f32 %v454_v25, %v453_v22  ;;  %v5658_v36 = vmul.f32 %v446_v60, %v428_v24  ;;  %2401 = vmatpush1.bf16.msra.mxu1 %v4344_v9  ;;  %v4367_v60 = vld [vmem:[#allocation7 + $0x120] ss:$24 sps:$4 sm:$0xff]   ;;  %v4377_v9 = vld [vmem:[#allocation7 + $0x18c] ss:$24 sps:$4 sm:$0xff]   ;;  %v4383_v17 = vld [vmem:[#allocation7 + $0x1bc] ss:$24 sps:$4 sm:$0xff]   ;;  %p5136_p7 = por %p5135_p5, %p5134_p0 }
  0xfe   : > { %2273 = vmatprep.subr.bf16.mxu0 %v4345_v16  ;;  %464 = vadd.xlane.f32.xlu0 %v463_v27  ;;  %v457_v41 = vmul.f32 %v427_v19, %v427_v19  ;;  %v458_v49 = vmul.f32 %v428_v24, %v428_v24  ;;  %v4368_v61 = vld [vmem:[#allocation7 + $0x128] ss:$24 sps:$4 sm:$0xff]   ;;  %v4381_v16 = vld [vmem:[#allocation7 + $0x1b4] ss:$24 sps:$4 sm:$0xff]   ;;  %v4386_v19 = vld [vmem:[#allocation7 + $0x1b8] ss:$24 sps:$4 sm:$0xff]  }
  0xff   : > { %v499_v39 = vadd.f32 %v498_v29, %v487_v13  ;;  %2402 = vmatprep.subr.bf16.mxu1 %v4347_v23  ;;  %v467_v45 = vadd.f32 %v466_v35, %v455_v26  ;;  %2274 = vmatpush1.bf16.msra.mxu0 %v4349_v31  ;;  %v4379_v10 = vld [vmem:[#allocation7 + $0x180] ss:$24 sps:$4 sm:$0xff]   ;;  %v4385_v18 = vld [vmem:[#allocation7 + $0x1b0] ss:$24 sps:$4 sm:$0xff]   ;;  %v4387_v22 = vld [vmem:[#allocation7 + $0x1e4] ss:$24 sps:$4 sm:$0xff]   ;;  %v5662_v35 = vmul.f32 %v5581_v4, %v5592_v12  ;;  %p5137_p8 = pnand %p5136_p7, %p5130_p9 }
 0x100   : > { %2275 = vmatprep.subr.bf16.mxu0 %v4351_v37  ;;  %v4380_v13 = vld [vmem:[#allocation7 + $0x188] ss:$24 sps:$4 sm:$0xff]   ;;  %v4389_v23 = vld [vmem:[#allocation7 + $0x1ec] ss:$24 sps:$4 sm:$0xff]   ;;  %v4395_v27 = vld [vmem:[#allocation7 + $0x21c] ss:$24 sps:$4 sm:$0xff]   ;;  %v5666_v37 = vmul.f32 %v5579_v3, %v5590_v11  ;;  %v514_v4 = vmul.f32 %v5624_v43, %v5642_v8  ;;  %v513_v3 = vmul.f32 %v5615_v32, %v5640_v7 }
 0x101   : > { %v500_v47 = vadd.f32 %v499_v39, %v488_v28  ;;  %v468_v51 = vadd.f32 %v467_v45, %v456_v34  ;;  %2403 = vmatpush1.bf16.msra.mxu1 %v4350_v33  ;;  %v4391_v24 = vld [vmem:[#allocation7 + $0x1e0] ss:$24 sps:$4 sm:$0xff]   ;;  %v4393_v26 = vld [vmem:[#allocation7 + $0x214] ss:$24 sps:$4 sm:$0xff]   ;;  %v4397_v28 = vld [vmem:[#allocation7 + $0x210] ss:$24 sps:$4 sm:$0xff]   ;;  %v509_v45 = vmul.f32 %v5583_v5, %v5604_v20  ;;  %v515_v5 = vmul.f32 %v5626_v44, %v5644_v14 }
 0x102   : > { %2404 = vmatprep.subr.bf16.mxu1 %v4353_v40  ;;  %v4392_v25 = vld [vmem:[#allocation7 + $0x1e8] ss:$24 sps:$4 sm:$0xff]   ;;  %v4398_v29 = vld [vmem:[#allocation7 + $0x218] ss:$24 sps:$4 sm:$0xff]   ;;  %v4399_v31 = vld [vmem:[#allocation7 + $0x244] ss:$24 sps:$4 sm:$0xff]  }
 0x103   : > { %501 = vadd.xlane.f32.xlu1 %v500_v47  ;;  %v469_v54 = vadd.f32 %v468_v51, %v457_v41  ;;  %2276 = vmatpush1.bf16.msra.mxu0 %v4355_v46  ;;  %v4401_v33 = vld [vmem:[#allocation7 + $0x24c] ss:$24 sps:$4 sm:$0xff]   ;;  %v4403_v34 = vld [vmem:[#allocation7 + $0x240] ss:$24 sps:$4 sm:$0xff]   ;;  %v510_v41 = vmul.f32 %v5585_v6, %v5606_v21  ;;  %v4407_v46 = vld [vmem:[#allocation7 + $0x27c] ss:$24 sps:$4 sm:$0xff]   ;;  %v516_v6 = vmul.f32 %v5629_v50, %v5646_v15 }
 0x104   : > { %2277 = vmatprep.subr.bf16.mxu0 %v4357_v52  ;;  %v4404_v39 = vld [vmem:[#allocation7 + $0x248] ss:$24 sps:$4 sm:$0xff]   ;;  %v4405_v40 = vld [vmem:[#allocation7 + $0x274] ss:$24 sps:$4 sm:$0xff]   ;;  %v4410_v11 = vld [vmem:[#allocation7 + $0x278] ss:$24 sps:$4 sm:$0xff]  }
 0x105   : > { %v470_v57 = vadd.f32 %v469_v54, %v458_v49  ;;  %2405 = vmatpush1.bf16.msra.mxu1 %v4356_v48  ;;  %v4409_v47 = vld [vmem:[#allocation7 + $0x270] ss:$24 sps:$4 sm:$0xff]   ;;  %v4411_v12 = vld [vmem:[#allocation7 + $0x2a4] ss:$24 sps:$4 sm:$0xff]   ;;  %v4415_v21 = vld [vmem:[#allocation7 + $0x2a0] ss:$24 sps:$4 sm:$0xff]  }
 0x106   : > { %2406 = vmatprep.subr.bf16.mxu1 %v4359_v53  ;;  %v4413_v20 = vld [vmem:[#allocation7 + $0x2ac] ss:$24 sps:$4 sm:$0xff]   ;;  %v4416_v48 = vld [vmem:[#allocation7 + $0x2a8] ss:$24 sps:$4 sm:$0xff]   ;;  %v4419_v43 = vld [vmem:[#allocation7 + $0x2dc] ss:$24 sps:$4 sm:$0xff]  }
 0x107   : > { %471 = vadd.xlane.f32.xlu0 %v470_v57  ;;  %2278 = vmatpush1.bf16.msra.mxu0 %v4361_v55  ;;  %v4417_v49 = vld [vmem:[#allocation7 + $0x2d4] ss:$24 sps:$4 sm:$0xff]   ;;  %v4421_v32 = vld [vmem:[#allocation7 + $0x2d0] ss:$24 sps:$4 sm:$0xff]   ;;  %v4425_v50 = vld [vmem:[#allocation7 + $0x304] ss:$24 sps:$4 sm:$0xff]  }
 0x108   : > { %2279 = vmatprep.subr.bf16.mxu0 %v4363_v58  ;;  %v4422_v7 = vld [vmem:[#allocation7 + $0x2d8] ss:$24 sps:$4 sm:$0xff]   ;;  %v4428_v44 = vld [vmem:[#allocation7 + $0x30c] ss:$24 sps:$4 sm:$0xff]  }
 0x109   : > { %2407 = vmatpush1.bf16.msra.mxu1 %v4362_v56 }
 0x10a   : > { %2408 = vmatprep.subr.bf16.mxu1 %v4365_v59 }
 0x10b   : > { %2280 = vmatpush1.bf16.msra.mxu0 %v4367_v60 }
 0x10c   : > { %2281 = vmatprep.subr.bf16.mxu0 %v4369_v62 }
 0x10d   : > { %2409 = vmatpush1.bf16.msra.mxu1 %v4368_v61 }
 0x10e   : > { %2410 = vmatprep.subr.bf16.mxu1 %v4371_v63 }
 0x10f   : > { %2282 = vmatpush1.bf16.msra.mxu0 %v4373_v0 }
 0x110   : > { %2283 = vmatprep.subr.bf16.mxu0 %v4375_v2 }
 0x111   : > { %2411 = vmatpush1.bf16.msra.mxu1 %v4374_v1 }
 0x112   : > { %2412 = vmatprep.subr.bf16.mxu1 %v4377_v9 }
 0x113   : > { %2284 = vmatpush1.bf16.msra.mxu0 %v4379_v10 }
 0x114   : > { %2285 = vmatprep.subr.bf16.mxu0 %v4381_v16  ;;  %v4426_v16 = vld [vmem:[#allocation7 + $0x308] ss:$24 sps:$4 sm:$0xff]  }
 0x115   : > { %2413 = vmatpush1.bf16.msra.mxu1 %v4380_v13  ;;  %v4423_v13 = vld [vmem:[#allocation7 + $0x300] ss:$24 sps:$4 sm:$0xff]  }
 0x116   : > { %2414 = vmatprep.subr.bf16.mxu1 %v4383_v17 }
 0x117   : > { %2286 = vmatpush1.bf16.msra.mxu0 %v4385_v18 }
 0x118   : > { %2287 = vmatprep.subr.bf16.mxu0 %v4387_v22 }
 0x119   : > { %2415 = vmatpush1.bf16.msra.mxu1 %v4386_v19 }
 0x11a   : > { %2416 = vmatprep.subr.bf16.mxu1 %v4389_v23 }
 0x11b   : > { %2288 = vmatpush1.bf16.msra.mxu0 %v4391_v24 }
 0x11c   : > { %2289 = vmatprep.subr.bf16.mxu0 %v4393_v26 }
 0x11d   : > { %2417 = vmatpush1.bf16.msra.mxu1 %v4392_v25  ;;  %v4431_v25 = vld [vmem:[#allocation7 + $0x334] ss:$24 sps:$4 sm:$0xff]  }
 0x11e   : > { %2418 = vmatprep.subr.bf16.mxu1 %v4395_v27 }
 0x11f   : > { %2290 = vmatpush1.bf16.msra.mxu0 %v4397_v28 }
 0x120   : > { %2291 = vmatprep.subr.bf16.mxu0 %v4399_v31  ;;  %v4437_v31 = vld [vmem:[#allocation7 + $0x364] ss:$24 sps:$4 sm:$0xff]  }
 0x121   : > { %2419 = vmatpush1.bf16.msra.mxu1 %v4398_v29  ;;  %v4434_v29 = vld [vmem:[#allocation7 + $0x33c] ss:$24 sps:$4 sm:$0xff]  }
 0x122   : > { %2420 = vmatprep.subr.bf16.mxu1 %v4401_v33  ;;  %v4440_v33 = vld [vmem:[#allocation7 + $0x36c] ss:$24 sps:$4 sm:$0xff]  }
 0x123   : > { %2292 = vmatpush1.bf16.msra.mxu0 %v4403_v34  ;;  %v4435_v34 = vld [vmem:[#allocation7 + $0x360] ss:$24 sps:$4 sm:$0xff]  }
 0x124   : > { %2293 = vmatprep.subr.bf16.mxu0 %v4405_v40  ;;  %v4441_v40 = vld [vmem:[#allocation7 + $0x390] ss:$24 sps:$4 sm:$0xff]  }
 0x125   : > { %2421 = vmatpush1.bf16.msra.mxu1 %v4404_v39  ;;  %v4446_v39 = vld [vmem:[#allocation7 + $0x39c] ss:$24 sps:$4 sm:$0xff]  }
 0x126   : > { %2422 = vmatprep.subr.bf16.mxu1 %v4407_v46  ;;  %v4452_v46 = vld [vmem:[#allocation7 + $0x3cc] ss:$24 sps:$4 sm:$0xff]  }
 0x127   : > { %2294 = vmatpush1.bf16.msra.mxu0 %v4409_v47  ;;  %v4447_v47 = vld [vmem:[#allocation7 + $0x3c0] ss:$24 sps:$4 sm:$0xff]  }
 0x128   : > { %2295 = vmatprep.subr.bf16.mxu0 %v4411_v12  ;;  %v4453_v12 = vld [vmem:[#allocation7 + $0x3f0] ss:$24 sps:$4 sm:$0xff]  }
 0x129   : > { %2423 = vmatpush1.bf16.msra.mxu1 %v4410_v11  ;;  %v4458_v11 = vld [vmem:[#allocation7 + $0x3fc] ss:$24 sps:$4 sm:$0xff]  }
 0x12a   : > { %2424 = vmatprep.subr.bf16.mxu1 %v4413_v20  ;;  %v4464_v20 = vld [vmem:[#allocation7 + $0x42c] ss:$24 sps:$4 sm:$0xff]  }
 0x12b   : > { %2296 = vmatpush1.bf16.msra.mxu0 %v4415_v21  ;;  %v4459_v21 = vld [vmem:[#allocation7 + $0x420] ss:$24 sps:$4 sm:$0xff]  }
 0x12c   : > { %2297 = vmatprep.subr.bf16.mxu0 %v4417_v49  ;;  %v4467_v49 = vld [vmem:[#allocation7 + $0x454] ss:$24 sps:$4 sm:$0xff]  }
 0x12d   : > { %2425 = vmatpush1.bf16.msra.mxu1 %v4416_v48  ;;  %v4462_v48 = vld [vmem:[#allocation7 + $0x428] ss:$24 sps:$4 sm:$0xff]  }
 0x12e   : > { %2426 = vmatprep.subr.bf16.mxu1 %v4419_v43  ;;  %v4470_v43 = vld [vmem:[#allocation7 + $0x45c] ss:$24 sps:$4 sm:$0xff]  }
 0x12f   : > { %2298 = vmatpush1.bf16.msra.mxu0 %v4421_v32  ;;  %v4465_v32 = vld [vmem:[#allocation7 + $0x450] ss:$24 sps:$4 sm:$0xff]  }
 0x130   : > { %2310 = vmatprep.subr.bf16.mxu0 %v4425_v50  ;;  %v4473_v50 = vld [vmem:[#allocation7 + $0x484] ss:$24 sps:$4 sm:$0xff]  }
 0x131   : > { %2427 = vmatpush1.bf16.msra.mxu1 %v4422_v7  ;;  %v4468_v7 = vld [vmem:[#allocation7 + $0x458] ss:$24 sps:$4 sm:$0xff]  }
 0x132   : > { %2439 = vmatprep.subr.bf16.mxu1 %v4428_v44  ;;  %v4476_v44 = vld [vmem:[#allocation7 + $0x48c] ss:$24 sps:$4 sm:$0xff]  }
 0x189   : > { %v495_v8 = vpop.xlane.xlu1 %494 }
 0x18a   : > { %v503_v14 = vmax.f32 %v495_v8, 1e-24  ;;  %v4471_v8 = vld [vmem:[#allocation7 + $0x480] ss:$24 sps:$4 sm:$0xff]  }
 0x18b   : > { %v465_v15 = vpop.xlane.xlu0 %464 }
 0x18c   : > { %4919 = vrsqrt.f32 %v503_v14  ;;  %v473_v51 = vmax.f32 %v465_v15, 1e-24  ;;  %v4474_v14 = vld [vmem:[#allocation7 + $0x488] ss:$24 sps:$4 sm:$0xff]   ;;  %v4479_v15 = vld [vmem:[#allocation7 + $0x4b4] ss:$24 sps:$4 sm:$0xff]  }
 0x18e   : > { %4921 = vrsqrt.f32 %v473_v51  ;;  %v4482_v51 = vld [vmem:[#allocation7 + $0x4bc] ss:$24 sps:$4 sm:$0xff]  }
 0x190   : > { %v502_v52 = vpop.xlane.xlu1 %501 }
 0x191   : > { %v504_v53 = vmax.f32 %v502_v52, 1e-24  ;;  %v4477_v52 = vld [vmem:[#allocation7 + $0x4b0] ss:$24 sps:$4 sm:$0xff]  }
 0x193   : > { %4923 = vrsqrt.f32 %v504_v53  ;;  %v4480_v53 = vld [vmem:[#allocation7 + $0x4b8] ss:$24 sps:$4 sm:$0xff]  }
 0x194   : > { %v472_v54 = vpop.xlane.xlu0 %471 }
 0x195   : > { %v474_v55 = vmax.f32 %v472_v54, 1e-24  ;;  %v4485_v54 = vld [vmem:[#allocation7 + $0x4e4] ss:$24 sps:$4 sm:$0xff]  }
 0x196   : > { %v4920_v56 = vpop.eup %4919 }
 0x197   : > { %4925 = vrsqrt.f32 %v474_v55  ;;  %v4488_v55 = vld [vmem:[#allocation7 + $0x4ec] ss:$24 sps:$4 sm:$0xff]  }
 0x198   : > { %v4922_v57 = vpop.eup %4921 }
 0x199   : > { %v519_v58 = vmul.f32 %v4922_v57, %v4920_v56  ;;  %v4483_v56 = vld [vmem:[#allocation7 + $0x4e0] ss:$24 sps:$4 sm:$0xff]  }
 0x19a   : > { %v4486_v57 = vld [vmem:[#allocation7 + $0x4e8] ss:$24 sps:$4 sm:$0xff]  }
 0x19b   : > { %v523_v59 = vmul.f32 %v519_v58, %v509_v45  ;;  %v526_v60 = vmul.f32 %v519_v58, %v5622_v42  ;;  %v525_v61 = vmul.f32 %v519_v58, %v5619_v38  ;;  %v522_v1 = vmul.f32 %v519_v58, %v5662_v35  ;;  %v4438_v35 = vld [vmem:[#allocation7 + $0x368] ss:$24 sps:$4 sm:$0xff]   ;;  %v4449_v45 = vld [vmem:[#allocation7 + $0x3c4] ss:$24 sps:$4 sm:$0xff]  }
 0x19c   : > { %v521_v2 = vmul.f32 %v519_v58, %v5666_v37  ;;  %v524_v9 = vmul.f32 %v519_v58, %v510_v41  ;;  %v4443_v37 = vld [vmem:[#allocation7 + $0x394] ss:$24 sps:$4 sm:$0xff]   ;;  %v4444_v41 = vld [vmem:[#allocation7 + $0x398] ss:$24 sps:$4 sm:$0xff]  }
 0x19d   : > { %v4924_v62 = vpop.eup %4923  ;;  %v4491_v58 = vld [vmem:[#allocation7 + $0x514] ss:$24 sps:$4 sm:$0xff]  }
 0x1a1   : > { %v4926_v63 = vpop.eup %4925 }
 0x1a2   : > { %v520_v0 = vmul.f32 %v4926_v63, %v4924_v62  ;;  %v4497_v62 = vld [vmem:[#allocation7 + $0x544] ss:$24 sps:$4 sm:$0xff]  }
 0x1a3   : > { %v4500_v63 = vld [vmem:[#allocation7 + $0x54c] ss:$24 sps:$4 sm:$0xff]  }
 0x1a4   : > { %v528_v10 = vmul.f32 %v520_v0, %v514_v4  ;;  %v527_v17 = vmul.f32 %v520_v0, %v513_v3  ;;  %v530_v18 = vmul.f32 %v520_v0, %v516_v6  ;;  %v529_v19 = vmul.f32 %v520_v0, %v515_v5  ;;  %v4450_v4 = vld [vmem:[#allocation7 + $0x3c8] ss:$24 sps:$4 sm:$0xff]   ;;  %v4455_v3 = vld [vmem:[#allocation7 + $0x3f4] ss:$24 sps:$4 sm:$0xff]   ;;  %v4456_v6 = vld [vmem:[#allocation7 + $0x3f8] ss:$24 sps:$4 sm:$0xff]  }
 0x1a5   : > { %v532_v22 = vmul.f32 %v520_v0, %v5658_v36  ;;  %v531_v42 = vmul.f32 %v520_v0, %v5654_v30  ;;  %v4429_v36 = vld [vmem:[#allocation7 + $0x330] ss:$24 sps:$4 sm:$0xff]   ;;  %v4461_v5 = vld [vmem:[#allocation7 + $0x424] ss:$24 sps:$4 sm:$0xff]   ;;  %v4495_v0 = vld [vmem:[#allocation7 + $0x540] ss:$24 sps:$4 sm:$0xff]  }
 0x1a6   : > { %v5686_v23 = vpack.c.bf16 %v528_v10, %v522_v1  ;;  %v5688_v38 = vpack.c.bf16 %v527_v17, %v521_v2  ;;  %v5690_v24 = vpack.c.bf16 %v530_v18, %v524_v9  ;;  %v5692_v26 = vpack.c.bf16 %v529_v19, %v523_v59  ;;  %v4432_v30 = vld [vmem:[#allocation7 + $0x338] ss:$24 sps:$4 sm:$0xff]   ;;  %v4494_v59 = vld [vmem:[#allocation7 + $0x51c] ss:$24 sps:$4 sm:$0xff]   ;;  %v4498_v1 = vld [vmem:[#allocation7 + $0x548] ss:$24 sps:$4 sm:$0xff]  }
 0x1a7   : > { %v5694_v27 = vpack.c.bf16 %v532_v22, %v526_v60  ;;  %v5696_v28 = vpack.c.bf16 %v531_v42, %v525_v61  ;;  %v4489_v60 = vld [vmem:[#allocation7 + $0x510] ss:$24 sps:$4 sm:$0xff]   ;;  %v4503_v2 = vld [vmem:[#allocation7 + $0x574] ss:$24 sps:$4 sm:$0xff]   ;;  %v4507_v18 = vld [vmem:[#allocation7 + $0x5a0] ss:$24 sps:$4 sm:$0xff]  }
 0x1a8   : > { %2299 = vmatprep.mubr.bf16.mxu0 %v5686_v23  ;;  %2428 = vmatprep.mubr.bf16.mxu1 %v5686_v23  ;;  %v4492_v61 = vld [vmem:[#allocation7 + $0x518] ss:$24 sps:$4 sm:$0xff]   ;;  %v4506_v9 = vld [vmem:[#allocation7 + $0x57c] ss:$24 sps:$4 sm:$0xff]   ;;  %v4512_v17 = vld [vmem:[#allocation7 + $0x5ac] ss:$24 sps:$4 sm:$0xff]  }
 0x1a9   : > { %2300 = vmatmul.mubr.bf16.vlgmr.msra.gmra.mrb[0].mxu0 %v5688_v38  ;;  %2429 = vmatmul.mubr.bf16.vlgmr.msra.gmra.mrb[0].mxu1 %v5688_v38  ;;  %v4501_v10 = vld [vmem:[#allocation7 + $0x570] ss:$24 sps:$4 sm:$0xff]   ;;  %v4515_v22 = vld [vmem:[#allocation7 + $0x5d4] ss:$24 sps:$4 sm:$0xff]  }
 0x1aa   : > { %2311 = vmatpush1.bf16.msra.mxu0 %v4423_v13  ;;  %2440 = vmatpush1.bf16.msra.mxu1 %v4426_v16  ;;  %v4504_v13 = vld [vmem:[#allocation7 + $0x578] ss:$24 sps:$4 sm:$0xff]   ;;  %v4509_v16 = vld [vmem:[#allocation7 + $0x5a4] ss:$24 sps:$4 sm:$0xff]   ;;  %v4510_v19 = vld [vmem:[#allocation7 + $0x5a8] ss:$24 sps:$4 sm:$0xff]  }
 0x1ab   : > { %2342 = vmatprep.mubr.bf16.mxu0 %v5690_v24  ;;  %2471 = vmatprep.mubr.bf16.mxu1 %v5690_v24  ;;  %v4518_v42 = vld [vmem:[#allocation7 + $0x5dc] ss:$24 sps:$4 sm:$0xff]  }
 0x1ac   : > { %2312 = vmatprep.subr.bf16.mxu0 %v4431_v25  ;;  %2441 = vmatprep.subr.bf16.mxu1 %v4434_v29  ;;  %v4513_v25 = vld [vmem:[#allocation7 + $0x5d0] ss:$24 sps:$4 sm:$0xff]   ;;  %v4521_v29 = vld [vmem:[#allocation7 + $0x604] ss:$24 sps:$4 sm:$0xff]  }
 0x1ae   : > { %2313 = vmatpush1.bf16.msra.mxu0 %v4429_v36  ;;  %2442 = vmatpush1.bf16.msra.mxu1 %v4432_v30  ;;  %v4516_v36 = vld [vmem:[#allocation7 + $0x5d8] ss:$24 sps:$4 sm:$0xff]   ;;  %v4524_v30 = vld [vmem:[#allocation7 + $0x60c] ss:$24 sps:$4 sm:$0xff]  }
 0x1af   : > { %2314 = vmatprep.subr.bf16.mxu0 %v4437_v31  ;;  %2443 = vmatprep.subr.bf16.mxu1 %v4440_v33  ;;  %v4519_v31 = vld [vmem:[#allocation7 + $0x600] ss:$24 sps:$4 sm:$0xff]  }
 0x1b0   : > { %v4522_v33 = vld [vmem:[#allocation7 + $0x608] ss:$24 sps:$4 sm:$0xff]  }
 0x1b2   : > { %2315 = vmatpush1.bf16.msra.mxu0 %v4435_v34  ;;  %2444 = vmatpush1.bf16.msra.mxu1 %v4438_v35  ;;  %v4527_v34 = vld [vmem:[#allocation7 + $0x634] ss:$24 sps:$4 sm:$0xff]  }
 0x1b3   : > { %2316 = vmatprep.subr.bf16.mxu0 %v4443_v37  ;;  %2445 = vmatprep.subr.bf16.mxu1 %v4446_v39  ;;  %v4530_v35 = vld [vmem:[#allocation7 + $0x63c] ss:$24 sps:$4 sm:$0xff]   ;;  %v4525_v37 = vld [vmem:[#allocation7 + $0x630] ss:$24 sps:$4 sm:$0xff]  }
 0x1b4   : > { %v4528_v39 = vld [vmem:[#allocation7 + $0x638] ss:$24 sps:$4 sm:$0xff]  }
 0x1b6   : > { %2317 = vmatpush1.bf16.msra.mxu0 %v4441_v40  ;;  %2446 = vmatpush1.bf16.msra.mxu1 %v4444_v41  ;;  %v4533_v40 = vld [vmem:[#allocation7 + $0x664] ss:$24 sps:$4 sm:$0xff]  }
 0x1b7   : > { %2318 = vmatprep.subr.bf16.mxu0 %v4449_v45  ;;  %2447 = vmatprep.subr.bf16.mxu1 %v4452_v46  ;;  %v4536_v41 = vld [vmem:[#allocation7 + $0x66c] ss:$24 sps:$4 sm:$0xff]   ;;  %v4531_v45 = vld [vmem:[#allocation7 + $0x660] ss:$24 sps:$4 sm:$0xff]  }
 0x1b8   : > { %v4534_v46 = vld [vmem:[#allocation7 + $0x668] ss:$24 sps:$4 sm:$0xff]  }
 0x1ba   : > { %2319 = vmatpush1.bf16.msra.mxu0 %v4447_v47  ;;  %2448 = vmatpush1.bf16.msra.mxu1 %v4450_v4  ;;  %v4539_v47 = vld [vmem:[#allocation7 + $0x694] ss:$24 sps:$4 sm:$0xff]  }
 0x1bb   : > { %2320 = vmatprep.subr.bf16.mxu0 %v4455_v3  ;;  %2449 = vmatprep.subr.bf16.mxu1 %v4458_v11  ;;  %v4542_v4 = vld [vmem:[#allocation7 + $0x69c] ss:$24 sps:$4 sm:$0xff]   ;;  %v4537_v3 = vld [vmem:[#allocation7 + $0x690] ss:$24 sps:$4 sm:$0xff]  }
 0x1bc   : > { %v4540_v11 = vld [vmem:[#allocation7 + $0x698] ss:$24 sps:$4 sm:$0xff]  }
 0x1be   : > { %2321 = vmatpush1.bf16.msra.mxu0 %v4453_v12  ;;  %2450 = vmatpush1.bf16.msra.mxu1 %v4456_v6  ;;  %v4545_v12 = vld [vmem:[#allocation7 + $0x6c4] ss:$24 sps:$4 sm:$0xff]  }
 0x1bf   : > { %2322 = vmatprep.subr.bf16.mxu0 %v4461_v5  ;;  %2451 = vmatprep.subr.bf16.mxu1 %v4464_v20  ;;  %v4548_v6 = vld [vmem:[#allocation7 + $0x6cc] ss:$24 sps:$4 sm:$0xff]   ;;  %v4543_v5 = vld [vmem:[#allocation7 + $0x6c0] ss:$24 sps:$4 sm:$0xff]  }
 0x1c0   : > { %v4546_v20 = vld [vmem:[#allocation7 + $0x6c8] ss:$24 sps:$4 sm:$0xff]  }
 0x1c2   : > { %2323 = vmatpush1.bf16.msra.mxu0 %v4459_v21  ;;  %2452 = vmatpush1.bf16.msra.mxu1 %v4462_v48  ;;  %v4551_v21 = vld [vmem:[#allocation7 + $0x6f4] ss:$24 sps:$4 sm:$0xff]  }
 0x1c3   : > { %2324 = vmatprep.subr.bf16.mxu0 %v4467_v49  ;;  %2453 = vmatprep.subr.bf16.mxu1 %v4470_v43  ;;  %v4554_v48 = vld [vmem:[#allocation7 + $0x6fc] ss:$24 sps:$4 sm:$0xff]   ;;  %v4549_v49 = vld [vmem:[#allocation7 + $0x6f0] ss:$24 sps:$4 sm:$0xff]  }
 0x1c4   : > { %v4552_v43 = vld [vmem:[#allocation7 + $0x6f8] ss:$24 sps:$4 sm:$0xff]  }
 0x1c6   : > { %2325 = vmatpush1.bf16.msra.mxu0 %v4465_v32  ;;  %2454 = vmatpush1.bf16.msra.mxu1 %v4468_v7  ;;  %v4557_v32 = vld [vmem:[#allocation7 + $0x724] ss:$24 sps:$4 sm:$0xff]  }
 0x1c7   : > { %2326 = vmatprep.subr.bf16.mxu0 %v4473_v50  ;;  %2455 = vmatprep.subr.bf16.mxu1 %v4476_v44  ;;  %v4560_v7 = vld [vmem:[#allocation7 + $0x72c] ss:$24 sps:$4 sm:$0xff]   ;;  %v4555_v50 = vld [vmem:[#allocation7 + $0x720] ss:$24 sps:$4 sm:$0xff]  }
 0x1c8   : > { %v4558_v44 = vld [vmem:[#allocation7 + $0x728] ss:$24 sps:$4 sm:$0xff]  }
 0x1ca   : > { %2327 = vmatpush1.bf16.msra.mxu0 %v4471_v8  ;;  %2456 = vmatpush1.bf16.msra.mxu1 %v4474_v14  ;;  %v4563_v8 = vld [vmem:[#allocation7 + $0x754] ss:$24 sps:$4 sm:$0xff]  }
 0x1cb   : > { %2328 = vmatprep.subr.bf16.mxu0 %v4479_v15  ;;  %2457 = vmatprep.subr.bf16.mxu1 %v4482_v51  ;;  %v4566_v14 = vld [vmem:[#allocation7 + $0x75c] ss:$24 sps:$4 sm:$0xff]   ;;  %v4561_v15 = vld [vmem:[#allocation7 + $0x750] ss:$24 sps:$4 sm:$0xff]  }
 0x1cc   : > { %v4564_v51 = vld [vmem:[#allocation7 + $0x758] ss:$24 sps:$4 sm:$0xff]  }
 0x1ce   : > { %2329 = vmatpush1.bf16.msra.mxu0 %v4477_v52  ;;  %2458 = vmatpush1.bf16.msra.mxu1 %v4480_v53  ;;  %v4569_v52 = vld [vmem:[#allocation7 + $0x784] ss:$24 sps:$4 sm:$0xff]  }
 0x1cf   : > { %2330 = vmatprep.subr.bf16.mxu0 %v4485_v54  ;;  %2459 = vmatprep.subr.bf16.mxu1 %v4488_v55  ;;  %v4572_v53 = vld [vmem:[#allocation7 + $0x78c] ss:$24 sps:$4 sm:$0xff]   ;;  %v4567_v54 = vld [vmem:[#allocation7 + $0x780] ss:$24 sps:$4 sm:$0xff]  }
 0x1d0   : > { %v4570_v55 = vld [vmem:[#allocation7 + $0x788] ss:$24 sps:$4 sm:$0xff]  }
 0x1d2   : > { %2331 = vmatpush1.bf16.msra.mxu0 %v4483_v56  ;;  %2460 = vmatpush1.bf16.msra.mxu1 %v4486_v57  ;;  %v4575_v56 = vld [vmem:[#allocation7 + $0x7b4] ss:$24 sps:$4 sm:$0xff]  }
 0x1d3   : > { %2332 = vmatprep.subr.bf16.mxu0 %v4491_v58  ;;  %2461 = vmatprep.subr.bf16.mxu1 %v4494_v59  ;;  %v4578_v57 = vld [vmem:[#allocation7 + $0x7bc] ss:$24 sps:$4 sm:$0xff]   ;;  %v4573_v58 = vld [vmem:[#allocation7 + $0x7b0] ss:$24 sps:$4 sm:$0xff]  }
 0x1d4   : > { %v4576_v59 = vld [vmem:[#allocation7 + $0x7b8] ss:$24 sps:$4 sm:$0xff]  }
 0x1d6   : > { %2333 = vmatpush1.bf16.msra.mxu0 %v4489_v60  ;;  %2462 = vmatpush1.bf16.msra.mxu1 %v4492_v61  ;;  %v4581_v60 = vld [vmem:[#allocation7 + $0x7e4] ss:$24 sps:$4 sm:$0xff]  }
 0x1d7   : > { %2334 = vmatprep.subr.bf16.mxu0 %v4497_v62  ;;  %2463 = vmatprep.subr.bf16.mxu1 %v4500_v63  ;;  %v4584_v61 = vld [vmem:[#allocation7 + $0x7ec] ss:$24 sps:$4 sm:$0xff]   ;;  %v4579_v62 = vld [vmem:[#allocation7 + $0x7e0] ss:$24 sps:$4 sm:$0xff]  }
 0x1d8   : > { %v4582_v63 = vld [vmem:[#allocation7 + $0x7e8] ss:$24 sps:$4 sm:$0xff]  }
 0x1da   : > { %2335 = vmatpush1.bf16.msra.mxu0 %v4495_v0  ;;  %2464 = vmatpush1.bf16.msra.mxu1 %v4498_v1  ;;  %v4587_v0 = vld [vmem:[#allocation7 + $0x814] ss:$24 sps:$4 sm:$0xff]  }
 0x1db   : > { %2336 = vmatprep.subr.bf16.mxu0 %v4503_v2  ;;  %2465 = vmatprep.subr.bf16.mxu1 %v4506_v9  ;;  %v4590_v1 = vld [vmem:[#allocation7 + $0x81c] ss:$24 sps:$4 sm:$0xff]   ;;  %v4585_v2 = vld [vmem:[#allocation7 + $0x810] ss:$24 sps:$4 sm:$0xff]  }
 0x1dc   : > { %v4588_v9 = vld [vmem:[#allocation7 + $0x818] ss:$24 sps:$4 sm:$0xff]  }
 0x1de   : > { %2337 = vmatpush1.bf16.msra.mxu0 %v4501_v10  ;;  %2466 = vmatpush1.bf16.msra.mxu1 %v4504_v13  ;;  %v4593_v10 = vld [vmem:[#allocation7 + $0x844] ss:$24 sps:$4 sm:$0xff]  }
 0x1df   : > { %2338 = vmatprep.subr.bf16.mxu0 %v4509_v16  ;;  %2467 = vmatprep.subr.bf16.mxu1 %v4512_v17  ;;  %v4596_v13 = vld [vmem:[#allocation7 + $0x84c] ss:$24 sps:$4 sm:$0xff]   ;;  %v4591_v16 = vld [vmem:[#allocation7 + $0x840] ss:$24 sps:$4 sm:$0xff]  }
 0x1e0   : > { %v4594_v17 = vld [vmem:[#allocation7 + $0x848] ss:$24 sps:$4 sm:$0xff]  }
 0x1e2   : > { %2339 = vmatpush1.bf16.msra.mxu0 %v4507_v18  ;;  %2468 = vmatpush1.bf16.msra.mxu1 %v4510_v19  ;;  %v4599_v18 = vld [vmem:[#allocation7 + $0x874] ss:$24 sps:$4 sm:$0xff]  }
 0x1e3   : > { %2340 = vmatprep.subr.bf16.mxu0 %v4515_v22  ;;  %2469 = vmatprep.subr.bf16.mxu1 %v4518_v42  ;;  %v4602_v19 = vld [vmem:[#allocation7 + $0x87c] ss:$24 sps:$4 sm:$0xff]   ;;  %v4597_v22 = vld [vmem:[#allocation7 + $0x870] ss:$24 sps:$4 sm:$0xff]  }
 0x1e4   : > { %v4600_v42 = vld [vmem:[#allocation7 + $0x878] ss:$24 sps:$4 sm:$0xff]  }
 0x1e6   : > { %2341 = vmatpush1.bf16.msra.mxu0 %v4513_v25  ;;  %2470 = vmatpush1.bf16.msra.mxu1 %v4516_v36  ;;  %v4605_v25 = vld [vmem:[#allocation7 + $0x8a4] ss:$24 sps:$4 sm:$0xff]  }
 0x1e7   : > { %2353 = vmatprep.subr.bf16.mxu0 %v4521_v29  ;;  %2482 = vmatprep.subr.bf16.mxu1 %v4524_v30  ;;  %v4608_v36 = vld [vmem:[#allocation7 + $0x8ac] ss:$24 sps:$4 sm:$0xff]   ;;  %v4603_v29 = vld [vmem:[#allocation7 + $0x8a0] ss:$24 sps:$4 sm:$0xff]  }
 0x1e8   : > { %v4606_v30 = vld [vmem:[#allocation7 + $0x8a8] ss:$24 sps:$4 sm:$0xff]  }
 0x1e9   : > { %2343 = vmatmul.mubr.bf16.vlgmr.msra.gmra.mrb[0].mxu0 %v5692_v26  ;;  %2472 = vmatmul.mubr.bf16.vlgmr.msra.gmra.mrb[0].mxu1 %v5692_v26 }
 0x1ea   : > { %2354 = vmatpush1.bf16.msra.mxu0 %v4519_v31  ;;  %2385 = vmatprep.mubr.bf16.mxu0 %v5694_v27  ;;  %v4611_v31 = vld [vmem:[#allocation7 + $0x8d4] ss:$24 sps:$4 sm:$0xff]  }
 0x1eb   : > { %2483 = vmatpush1.bf16.msra.mxu1 %v4522_v33  ;;  %2514 = vmatprep.mubr.bf16.mxu1 %v5694_v27  ;;  %v4614_v33 = vld [vmem:[#allocation7 + $0x8dc] ss:$24 sps:$4 sm:$0xff]  }
 0x1ec   : > { %2355 = vmatprep.subr.bf16.mxu0 %v4527_v34  ;;  %2484 = vmatprep.subr.bf16.mxu1 %v4530_v35  ;;  %v4609_v34 = vld [vmem:[#allocation7 + $0x8d0] ss:$24 sps:$4 sm:$0xff]  }
 0x1ed   : > { %v4612_v35 = vld [vmem:[#allocation7 + $0x8d8] ss:$24 sps:$4 sm:$0xff]  }
 0x1ee   : > { %2356 = vmatpush1.bf16.msra.mxu0 %v4525_v37  ;;  %v4617_v37 = vld [vmem:[#allocation7 + $0x14] ss:$24 sps:$4 sm:$0xff]  }
 0x1ef   : > { %2485 = vmatpush1.bf16.msra.mxu1 %v4528_v39  ;;  %2357 = vmatprep.subr.bf16.mxu0 %v4533_v40  ;;  %v4615_v39 = vld [vmem:[#allocation7 + $0x10] ss:$24 sps:$4 sm:$0xff]   ;;  %v4620_v40 = vld [vmem:[#allocation7 + $0x44] ss:$24 sps:$4 sm:$0xff]  }
 0x1f0   : > { %2486 = vmatprep.subr.bf16.mxu1 %v4536_v41  ;;  %v4618_v41 = vld [vmem:[#allocation7 + $0x40] ss:$24 sps:$4 sm:$0xff]  }
 0x1f2   : > { %2358 = vmatpush1.bf16.msra.mxu0 %v4531_v45  ;;  %v4623_v45 = vld [vmem:[#allocation7 + $0x74] ss:$24 sps:$4 sm:$0xff]  }
 0x1f3   : > { %2487 = vmatpush1.bf16.msra.mxu1 %v4534_v46  ;;  %2359 = vmatprep.subr.bf16.mxu0 %v4539_v47  ;;  %v4621_v46 = vld [vmem:[#allocation7 + $0x70] ss:$24 sps:$4 sm:$0xff]   ;;  %v4626_v47 = vld [vmem:[#allocation7 + $0xa4] ss:$24 sps:$4 sm:$0xff]  }
 0x1f4   : > { %2488 = vmatprep.subr.bf16.mxu1 %v4542_v4  ;;  %v4624_v4 = vld [vmem:[#allocation7 + $0xa0] ss:$24 sps:$4 sm:$0xff]  }
 0x1f6   : > { %2360 = vmatpush1.bf16.msra.mxu0 %v4537_v3  ;;  %v4629_v3 = vld [vmem:[#allocation7 + $0xd4] ss:$24 sps:$4 sm:$0xff]  }
 0x1f7   : > { %2489 = vmatpush1.bf16.msra.mxu1 %v4540_v11  ;;  %2361 = vmatprep.subr.bf16.mxu0 %v4545_v12  ;;  %v4627_v11 = vld [vmem:[#allocation7 + $0xd0] ss:$24 sps:$4 sm:$0xff]   ;;  %v4632_v12 = vld [vmem:[#allocation7 + $0x104] ss:$24 sps:$4 sm:$0xff]  }
 0x1f8   : > { %2490 = vmatprep.subr.bf16.mxu1 %v4548_v6  ;;  %v4630_v6 = vld [vmem:[#allocation7 + $0x100] ss:$24 sps:$4 sm:$0xff]  }
 0x1fa   : > { %2362 = vmatpush1.bf16.msra.mxu0 %v4543_v5  ;;  %v4635_v5 = vld [vmem:[#allocation7 + $0x134] ss:$24 sps:$4 sm:$0xff]  }
 0x1fb   : > { %2491 = vmatpush1.bf16.msra.mxu1 %v4546_v20  ;;  %2363 = vmatprep.subr.bf16.mxu0 %v4551_v21  ;;  %v4638_v20 = vld [vmem:[#allocation7 + $0x164] ss:$24 sps:$4 sm:$0xff]   ;;  %v4636_v21 = vld [vmem:[#allocation7 + $0x160] ss:$24 sps:$4 sm:$0xff]  }
 0x1fc   : > { %2492 = vmatprep.subr.bf16.mxu1 %v4554_v48  ;;  %v4732_v48 = vld [vmem:[#allocation8] ss:$8 sps:$4 sm:$0xff]  }
 0x1fe   : > { %2364 = vmatpush1.bf16.msra.mxu0 %v4549_v49  ;;  %v4734_v49 = vld [vmem:[#allocation8 + $0x4] ss:$8 sps:$4 sm:$0xff]  }
 0x1ff   : > { %2493 = vmatpush1.bf16.msra.mxu1 %v4552_v43  ;;  %2365 = vmatprep.subr.bf16.mxu0 %v4557_v32  ;;  %v4641_v43 = vld [vmem:[#allocation7 + $0x194] ss:$24 sps:$4 sm:$0xff]   ;;  %v4639_v32 = vld [vmem:[#allocation7 + $0x190] ss:$24 sps:$4 sm:$0xff]  }
 0x200   : > { %2494 = vmatprep.subr.bf16.mxu1 %v4560_v7  ;;  %v4738_v7 = vld [vmem:[#allocation8 + $0x10] ss:$8 sps:$4 sm:$0xff]  }
 0x202   : > { %2366 = vmatpush1.bf16.msra.mxu0 %v4555_v50  ;;  %v4740_v50 = vld [vmem:[#allocation8 + $0x14] ss:$8 sps:$4 sm:$0xff]  }
 0x203   : > { %2495 = vmatpush1.bf16.msra.mxu1 %v4558_v44  ;;  %2367 = vmatprep.subr.bf16.mxu0 %v4563_v8  ;;  %v4644_v44 = vld [vmem:[#allocation7 + $0x1c4] ss:$24 sps:$4 sm:$0xff]   ;;  %v4642_v8 = vld [vmem:[#allocation7 + $0x1c0] ss:$24 sps:$4 sm:$0xff]  }
 0x204   : > { %2496 = vmatprep.subr.bf16.mxu1 %v4566_v14  ;;  %v4744_v14 = vld [vmem:[#allocation8 + $0x20] ss:$8 sps:$4 sm:$0xff]  }
 0x206   : > { %2368 = vmatpush1.bf16.msra.mxu0 %v4561_v15  ;;  %v4746_v15 = vld [vmem:[#allocation8 + $0x24] ss:$8 sps:$4 sm:$0xff]  }
 0x207   : > { %2497 = vmatpush1.bf16.msra.mxu1 %v4564_v51  ;;  %2369 = vmatprep.subr.bf16.mxu0 %v4569_v52  ;;  %v4647_v51 = vld [vmem:[#allocation7 + $0x1f4] ss:$24 sps:$4 sm:$0xff]   ;;  %v4645_v52 = vld [vmem:[#allocation7 + $0x1f0] ss:$24 sps:$4 sm:$0xff]  }
 0x208   : > { %2498 = vmatprep.subr.bf16.mxu1 %v4572_v53  ;;  %v4750_v53 = vld [vmem:[#allocation8 + $0x30] ss:$8 sps:$4 sm:$0xff]  }
 0x20a   : > { %2370 = vmatpush1.bf16.msra.mxu0 %v4567_v54  ;;  %v4752_v54 = vld [vmem:[#allocation8 + $0x34] ss:$8 sps:$4 sm:$0xff]  }
 0x20b   : > { %2499 = vmatpush1.bf16.msra.mxu1 %v4570_v55  ;;  %2371 = vmatprep.subr.bf16.mxu0 %v4575_v56  ;;  %v4650_v55 = vld [vmem:[#allocation7 + $0x224] ss:$24 sps:$4 sm:$0xff]   ;;  %v4648_v56 = vld [vmem:[#allocation7 + $0x220] ss:$24 sps:$4 sm:$0xff]  }
 0x20c   : > { %2500 = vmatprep.subr.bf16.mxu1 %v4578_v57  ;;  %v4756_v57 = vld [vmem:[#allocation8 + $0x40] ss:$8 sps:$4 sm:$0xff]  }
 0x20e   : > { %2372 = vmatpush1.bf16.msra.mxu0 %v4573_v58  ;;  %v4758_v58 = vld [vmem:[#allocation8 + $0x44] ss:$8 sps:$4 sm:$0xff]  }
 0x20f   : > { %2501 = vmatpush1.bf16.msra.mxu1 %v4576_v59  ;;  %2373 = vmatprep.subr.bf16.mxu0 %v4581_v60  ;;  %v4653_v59 = vld [vmem:[#allocation7 + $0x254] ss:$24 sps:$4 sm:$0xff]   ;;  %v4651_v60 = vld [vmem:[#allocation7 + $0x250] ss:$24 sps:$4 sm:$0xff]  }
 0x210   : > { %2502 = vmatprep.subr.bf16.mxu1 %v4584_v61  ;;  %v4762_v61 = vld [vmem:[#allocation8 + $0x50] ss:$8 sps:$4 sm:$0xff]  }
 0x212   : > { %2374 = vmatpush1.bf16.msra.mxu0 %v4579_v62  ;;  %v4764_v62 = vld [vmem:[#allocation8 + $0x54] ss:$8 sps:$4 sm:$0xff]  }
 0x213   : > { %2503 = vmatpush1.bf16.msra.mxu1 %v4582_v63  ;;  %2375 = vmatprep.subr.bf16.mxu0 %v4587_v0  ;;  %v4656_v63 = vld [vmem:[#allocation7 + $0x284] ss:$24 sps:$4 sm:$0xff]   ;;  %v4654_v0 = vld [vmem:[#allocation7 + $0x280] ss:$24 sps:$4 sm:$0xff]  }
 0x214   : > { %2504 = vmatprep.subr.bf16.mxu1 %v4590_v1  ;;  %v4768_v1 = vld [vmem:[#allocation8 + $0x60] ss:$8 sps:$4 sm:$0xff]  }
 0x216   : > { %2376 = vmatpush1.bf16.msra.mxu0 %v4585_v2  ;;  %v4770_v2 = vld [vmem:[#allocation8 + $0x64] ss:$8 sps:$4 sm:$0xff]  }
 0x217   : > { %2505 = vmatpush1.bf16.msra.mxu1 %v4588_v9  ;;  %2377 = vmatprep.subr.bf16.mxu0 %v4593_v10  ;;  %v4659_v9 = vld [vmem:[#allocation7 + $0x2b4] ss:$24 sps:$4 sm:$0xff]   ;;  %v4657_v10 = vld [vmem:[#allocation7 + $0x2b0] ss:$24 sps:$4 sm:$0xff]  }
 0x218   : > { %2506 = vmatprep.subr.bf16.mxu1 %v4596_v13  ;;  %v4774_v13 = vld [vmem:[#allocation8 + $0x70] ss:$8 sps:$4 sm:$0xff]  }
 0x21a   : > { %2378 = vmatpush1.bf16.msra.mxu0 %v4591_v16  ;;  %v4776_v16 = vld [vmem:[#allocation8 + $0x74] ss:$8 sps:$4 sm:$0xff]  }
 0x21b   : > { %2507 = vmatpush1.bf16.msra.mxu1 %v4594_v17  ;;  %2379 = vmatprep.subr.bf16.mxu0 %v4599_v18  ;;  %v4662_v17 = vld [vmem:[#allocation7 + $0x2e4] ss:$24 sps:$4 sm:$0xff]   ;;  %v4660_v18 = vld [vmem:[#allocation7 + $0x2e0] ss:$24 sps:$4 sm:$0xff]  }
 0x21c   : > { %2508 = vmatprep.subr.bf16.mxu1 %v4602_v19  ;;  %v4780_v19 = vld [vmem:[#allocation8 + $0x80] ss:$8 sps:$4 sm:$0xff]  }
 0x21e   : > { %2380 = vmatpush1.bf16.msra.mxu0 %v4597_v22  ;;  %v4782_v22 = vld [vmem:[#allocation8 + $0x84] ss:$8 sps:$4 sm:$0xff]  }
 0x21f   : > { %2509 = vmatpush1.bf16.msra.mxu1 %v4600_v42  ;;  %2381 = vmatprep.subr.bf16.mxu0 %v4605_v25  ;;  %v4665_v42 = vld [vmem:[#allocation7 + $0x314] ss:$24 sps:$4 sm:$0xff]   ;;  %v4663_v25 = vld [vmem:[#allocation7 + $0x310] ss:$24 sps:$4 sm:$0xff]  }
 0x220   : > { %2510 = vmatprep.subr.bf16.mxu1 %v4608_v36  ;;  %v4786_v36 = vld [vmem:[#allocation8 + $0x90] ss:$8 sps:$4 sm:$0xff]  }
 0x222   : > { %2382 = vmatpush1.bf16.msra.mxu0 %v4603_v29  ;;  %v4788_v29 = vld [vmem:[#allocation8 + $0x94] ss:$8 sps:$4 sm:$0xff]  }
 0x223   : > { %2511 = vmatpush1.bf16.msra.mxu1 %v4606_v30  ;;  %2383 = vmatprep.subr.bf16.mxu0 %v4611_v31  ;;  %v4668_v30 = vld [vmem:[#allocation7 + $0x344] ss:$24 sps:$4 sm:$0xff]   ;;  %v4789_v31 = vld [vmem:[#allocation8 + $0xa0] ss:$8 sps:$4 sm:$0xff]  }
 0x224   : > { %2512 = vmatprep.subr.bf16.mxu1 %v4614_v33  ;;  %v4791_v33 = vld [vmem:[#allocation8 + $0xa4] ss:$8 sps:$4 sm:$0xff]  }
 0x226   : > { %2384 = vmatpush1.bf16.msra.mxu0 %v4609_v34  ;;  %v4666_v34 = vld [vmem:[#allocation7 + $0x340] ss:$24 sps:$4 sm:$0xff]  }
 0x227   : > { %2513 = vmatpush1.bf16.msra.mxu1 %v4612_v35  ;;  %2525 = vmatprep.subr.bf16.mxu0 %v4617_v37  ;;  %v4794_v35 = vld [vmem:[#allocation8 + $0xb4] ss:$8 sps:$4 sm:$0xff]  }
 0x228   : > { %3260 = vmatprep.subr.bf16.mxu1 %v4734_v49  ;;  %v4671_v37 = vld [vmem:[#allocation7 + $0x374] ss:$24 sps:$4 sm:$0xff]   ;;  %v4804_v49 = vld [vmem:[#allocation8 + $0xf0] ss:$8 sps:$4 sm:$0xff]  }
 0x229   : > { %2386 = vmatmul.mubr.bf16.vlgmr.msra.gmra.mrb[0].mxu0 %v5696_v28 }
 0x22a   : > { %2515 = vmatmul.mubr.bf16.vlgmr.msra.gmra.mrb[0].mxu1 %v5696_v28  ;;  %2526 = vmatpush1.bf16.msra.mxu0 %v4615_v39  ;;  %v4792_v39 = vld [vmem:[#allocation8 + $0xb0] ss:$8 sps:$4 sm:$0xff]  }
 0x22b   : > { %2557 = vmatprep.mubr.bf16.mxu0 %v5686_v23  ;;  %2527 = vmatprep.subr.bf16.mxu0 %v4620_v40  ;;  %v4633_v23 = vld [vmem:[#allocation7 + $0x130] ss:$24 sps:$4 sm:$0xff]  }
 0x22c   : > { %3261 = vmatpush1.bf16.msra.mxu1 %v4732_v48  ;;  %v4669_v40 = vld [vmem:[#allocation7 + $0x370] ss:$24 sps:$4 sm:$0xff]   ;;  %v4806_v48 = vld [vmem:[#allocation8 + $0xf4] ss:$8 sps:$4 sm:$0xff]  }
 0x22d   : > { %3262 = vmatprep.subr.bf16.mxu1 %v4740_v50  ;;  %v4687_v50 = vld [vmem:[#allocation7 + $0x490] ss:$24 sps:$4 sm:$0xff]  }
 0x22e   : > { %2528 = vmatpush1.bf16.msra.mxu0 %v4618_v41  ;;  %v4797_v41 = vld [vmem:[#allocation8 + $0xc4] ss:$8 sps:$4 sm:$0xff]  }
 0x22f   : > { %2529 = vmatprep.subr.bf16.mxu0 %v4623_v45  ;;  %v4674_v45 = vld [vmem:[#allocation7 + $0x3a4] ss:$24 sps:$4 sm:$0xff]  }
 0x230   : > { %3263 = vmatpush1.bf16.msra.mxu1 %v4738_v7  ;;  %v4809_v7 = vld [vmem:[#allocation8 + $0x104] ss:$8 sps:$4 sm:$0xff]  }
 0x231   : > { %3264 = vmatprep.subr.bf16.mxu1 %v4746_v15  ;;  %v4693_v15 = vld [vmem:[#allocation7 + $0x4f0] ss:$24 sps:$4 sm:$0xff]  }
 0x232   : > { %2530 = vmatpush1.bf16.msra.mxu0 %v4621_v46  ;;  %v4672_v46 = vld [vmem:[#allocation7 + $0x3a0] ss:$24 sps:$4 sm:$0xff]  }
 0x233   : > { %2531 = vmatprep.subr.bf16.mxu0 %v4626_v47  ;;  %v4800_v47 = vld [vmem:[#allocation8 + $0xd4] ss:$8 sps:$4 sm:$0xff]  }
 0x234   : > { %3265 = vmatpush1.bf16.msra.mxu1 %v4744_v14  ;;  %v4695_v14 = vld [vmem:[#allocation7 + $0x4f4] ss:$24 sps:$4 sm:$0xff]  }
 0x235   : > { %3266 = vmatprep.subr.bf16.mxu1 %v4752_v54  ;;  %v4699_v54 = vld [vmem:[#allocation7 + $0x550] ss:$24 sps:$4 sm:$0xff]  }
 0x236   : > { %2532 = vmatpush1.bf16.msra.mxu0 %v4624_v4  ;;  %v4798_v4 = vld [vmem:[#allocation8 + $0xd0] ss:$8 sps:$4 sm:$0xff]  }
 0x237   : > { %2533 = vmatprep.subr.bf16.mxu0 %v4629_v3  ;;  %v4675_v3 = vld [vmem:[#allocation7 + $0x3d0] ss:$24 sps:$4 sm:$0xff]  }
 0x238   : > { %3267 = vmatpush1.bf16.msra.mxu1 %v4750_v53  ;;  %v4701_v53 = vld [vmem:[#allocation7 + $0x554] ss:$24 sps:$4 sm:$0xff]  }
 0x239   : > { %3268 = vmatprep.subr.bf16.mxu1 %v4758_v58  ;;  %v4705_v58 = vld [vmem:[#allocation7 + $0x5b0] ss:$24 sps:$4 sm:$0xff]  }
 0x23a   : > { %2534 = vmatpush1.bf16.msra.mxu0 %v4627_v11  ;;  %v4680_v11 = vld [vmem:[#allocation7 + $0x404] ss:$24 sps:$4 sm:$0xff]  }
 0x23b   : > { %2535 = vmatprep.subr.bf16.mxu0 %v4632_v12  ;;  %v4678_v12 = vld [vmem:[#allocation7 + $0x400] ss:$24 sps:$4 sm:$0xff]  }
 0x23c   : > { %3269 = vmatpush1.bf16.msra.mxu1 %v4756_v57  ;;  %v4707_v57 = vld [vmem:[#allocation7 + $0x5b4] ss:$24 sps:$4 sm:$0xff]  }
 0x23d   : > { %3270 = vmatprep.subr.bf16.mxu1 %v4764_v62  ;;  %v4711_v62 = vld [vmem:[#allocation7 + $0x610] ss:$24 sps:$4 sm:$0xff]  }
 0x23e   : > { %2536 = vmatpush1.bf16.msra.mxu0 %v4630_v6  ;;  %v4683_v6 = vld [vmem:[#allocation7 + $0x434] ss:$24 sps:$4 sm:$0xff]  }
 0x23f   : > { %2537 = vmatprep.subr.bf16.mxu0 %v4635_v5  ;;  %v4803_v5 = vld [vmem:[#allocation8 + $0xe4] ss:$8 sps:$4 sm:$0xff]  }
 0x240   : > { %3271 = vmatpush1.bf16.msra.mxu1 %v4762_v61  ;;  %v4713_v61 = vld [vmem:[#allocation7 + $0x614] ss:$24 sps:$4 sm:$0xff]  }
 0x241   : > { %3272 = vmatprep.subr.bf16.mxu1 %v4770_v2  ;;  %v4717_v2 = vld [vmem:[#allocation7 + $0x670] ss:$24 sps:$4 sm:$0xff]  }
 0x242   : > { %2538 = vmatpush1.bf16.msra.mxu0 %v4633_v23  ;;  %v4801_v23 = vld [vmem:[#allocation8 + $0xe0] ss:$8 sps:$4 sm:$0xff]  }
 0x243   : > { %2539 = vmatprep.subr.bf16.mxu0 %v4638_v20  ;;  %v4681_v20 = vld [vmem:[#allocation7 + $0x430] ss:$24 sps:$4 sm:$0xff]  }
 0x244   : > { %3273 = vmatpush1.bf16.msra.mxu1 %v4768_v1  ;;  %v4719_v1 = vld [vmem:[#allocation7 + $0x674] ss:$24 sps:$4 sm:$0xff]  }
 0x245   : > { %3274 = vmatprep.subr.bf16.mxu1 %v4776_v16  ;;  %v4723_v16 = vld [vmem:[#allocation7 + $0x6d0] ss:$24 sps:$4 sm:$0xff]  }
 0x246   : > { %2540 = vmatpush1.bf16.msra.mxu0 %v4636_v21  ;;  %v4686_v21 = vld [vmem:[#allocation7 + $0x464] ss:$24 sps:$4 sm:$0xff]  }
 0x247   : > { %2541 = vmatprep.subr.bf16.mxu0 %v4641_v43  ;;  %v4684_v43 = vld [vmem:[#allocation7 + $0x460] ss:$24 sps:$4 sm:$0xff]  }
 0x248   : > { %3275 = vmatpush1.bf16.msra.mxu1 %v4774_v13  ;;  %v4725_v13 = vld [vmem:[#allocation7 + $0x6d4] ss:$24 sps:$4 sm:$0xff]  }
 0x249   : > { %3276 = vmatprep.subr.bf16.mxu1 %v4782_v22  ;;  %v4735_v22 = vld [vmem:[#allocation7 + $0x760] ss:$24 sps:$4 sm:$0xff]  }
 0x24a   : > { %2542 = vmatpush1.bf16.msra.mxu0 %v4639_v32  ;;  %v4689_v32 = vld [vmem:[#allocation7 + $0x494] ss:$24 sps:$4 sm:$0xff]  }
 0x24b   : > { %2543 = vmatprep.subr.bf16.mxu0 %v4644_v44  ;;  %v4692_v44 = vld [vmem:[#allocation7 + $0x4c4] ss:$24 sps:$4 sm:$0xff]  }
 0x24c   : > { %3277 = vmatpush1.bf16.msra.mxu1 %v4780_v19  ;;  %v4737_v19 = vld [vmem:[#allocation7 + $0x764] ss:$24 sps:$4 sm:$0xff]  }
 0x24d   : > { %3278 = vmatprep.subr.bf16.mxu1 %v4788_v29  ;;  %v4747_v29 = vld [vmem:[#allocation7 + $0x7c0] ss:$24 sps:$4 sm:$0xff]  }
 0x24e   : > { %2544 = vmatpush1.bf16.msra.mxu0 %v4642_v8  ;;  %v4690_v8 = vld [vmem:[#allocation7 + $0x4c0] ss:$24 sps:$4 sm:$0xff]  }
 0x24f   : > { %2545 = vmatprep.subr.bf16.mxu0 %v4647_v51  ;;  %v4698_v51 = vld [vmem:[#allocation7 + $0x524] ss:$24 sps:$4 sm:$0xff]  }
 0x250   : > { %3279 = vmatpush1.bf16.msra.mxu1 %v4786_v36  ;;  %v4749_v36 = vld [vmem:[#allocation7 + $0x7c4] ss:$24 sps:$4 sm:$0xff]  }
 0x251   : > { %3280 = vmatprep.subr.bf16.mxu1 %v4791_v33  ;;  %v4761_v33 = vld [vmem:[#allocation7 + $0x824] ss:$24 sps:$4 sm:$0xff]  }
 0x252   : > { %2546 = vmatpush1.bf16.msra.mxu0 %v4645_v52  ;;  %v4696_v52 = vld [vmem:[#allocation7 + $0x520] ss:$24 sps:$4 sm:$0xff]  }
 0x253   : > { %2547 = vmatprep.subr.bf16.mxu0 %v4650_v55  ;;  %v4704_v55 = vld [vmem:[#allocation7 + $0x584] ss:$24 sps:$4 sm:$0xff]  }
 0x254   : > { %3281 = vmatpush1.bf16.msra.mxu1 %v4789_v31  ;;  %v4753_v31 = vld [vmem:[#allocation7 + $0x7f0] ss:$24 sps:$4 sm:$0xff]  }
 0x255   : > { %3282 = vmatprep.subr.bf16.mxu1 %v4794_v35  ;;  %v4767_v35 = vld [vmem:[#allocation7 + $0x854] ss:$24 sps:$4 sm:$0xff]  }
 0x256   : > { %2548 = vmatpush1.bf16.msra.mxu0 %v4648_v56  ;;  %v4702_v56 = vld [vmem:[#allocation7 + $0x580] ss:$24 sps:$4 sm:$0xff]  }
 0x257   : > { %2549 = vmatprep.subr.bf16.mxu0 %v4653_v59  ;;  %v4710_v59 = vld [vmem:[#allocation7 + $0x5e4] ss:$24 sps:$4 sm:$0xff]  }
 0x258   : > { %3283 = vmatpush1.bf16.msra.mxu1 %v4792_v39  ;;  %v4773_v39 = vld [vmem:[#allocation7 + $0x884] ss:$24 sps:$4 sm:$0xff]  }
 0x259   : > { %3284 = vmatprep.subr.bf16.mxu1 %v4797_v41  ;;  %v4779_v41 = vld [vmem:[#allocation7 + $0x8b4] ss:$24 sps:$4 sm:$0xff]  }
 0x25a   : > { %2550 = vmatpush1.bf16.msra.mxu0 %v4651_v60  ;;  %v4708_v60 = vld [vmem:[#allocation7 + $0x5e0] ss:$24 sps:$4 sm:$0xff]  }
 0x25b   : > { %2551 = vmatprep.subr.bf16.mxu0 %v4656_v63  ;;  %v4716_v63 = vld [vmem:[#allocation7 + $0x644] ss:$24 sps:$4 sm:$0xff]  }
 0x25e   : > { %2552 = vmatpush1.bf16.msra.mxu0 %v4654_v0  ;;  %v4714_v0 = vld [vmem:[#allocation7 + $0x640] ss:$24 sps:$4 sm:$0xff]  }
 0x25f   : > { %2553 = vmatprep.subr.bf16.mxu0 %v4659_v9  ;;  %v4722_v9 = vld [vmem:[#allocation7 + $0x6a4] ss:$24 sps:$4 sm:$0xff]  }
 0x262   : > { %2554 = vmatpush1.bf16.msra.mxu0 %v4657_v10  ;;  %v4720_v10 = vld [vmem:[#allocation7 + $0x6a0] ss:$24 sps:$4 sm:$0xff]  }
 0x263   : > { %2555 = vmatprep.subr.bf16.mxu0 %v4662_v17  ;;  %v4728_v17 = vld [vmem:[#allocation7 + $0x704] ss:$24 sps:$4 sm:$0xff]  }
 0x266   : > { %2556 = vmatpush1.bf16.msra.mxu0 %v4660_v18  ;;  %v4731_v18 = vld [vmem:[#allocation7 + $0x734] ss:$24 sps:$4 sm:$0xff]  }
 0x267   : > { %2568 = vmatprep.subr.bf16.mxu0 %v4665_v42  ;;  %v4743_v42 = vld [vmem:[#allocation7 + $0x794] ss:$24 sps:$4 sm:$0xff]  }
 0x269   : > { %2558 = vmatmul.mubr.bf16.vlgmr.msra.gmra.mrb[4].mxu0 %v5688_v38  ;;  %v4795_v38 = vld [vmem:[#allocation8 + $0xc0] ss:$8 sps:$4 sm:$0xff]  }
 0x26a   : > { %2569 = vmatpush1.bf16.msra.mxu0 %v4663_v25  ;;  %2600 = vmatprep.mubr.bf16.mxu0 %v5690_v24  ;;  %v4677_v24 = vld [vmem:[#allocation7 + $0x3d4] ss:$24 sps:$4 sm:$0xff]   ;;  %v4741_v25 = vld [vmem:[#allocation7 + $0x790] ss:$24 sps:$4 sm:$0xff]  }
 0x26b   : > { %2570 = vmatprep.subr.bf16.mxu0 %v4668_v30  ;;  %3285 = vmatpush1.bf16.msra.mxu1 %v4795_v38  ;;  %v4755_v30 = vld [vmem:[#allocation7 + $0x7f4] ss:$24 sps:$4 sm:$0xff]   ;;  %v4785_v38 = vld [vmem:[#allocation7 + $0x8e4] ss:$24 sps:$4 sm:$0xff]  }
 0x26c   : > { %3286 = vmatprep.subr.bf16.mxu1 %v4800_v47 }
 0x26e   : > { %2571 = vmatpush1.bf16.msra.mxu0 %v4666_v34  ;;  %v4759_v34 = vld [vmem:[#allocation7 + $0x820] ss:$24 sps:$4 sm:$0xff]  }
 0x26f   : > { %2572 = vmatprep.subr.bf16.mxu0 %v4671_v37  ;;  %3287 = vmatpush1.bf16.msra.mxu1 %v4798_v4  ;;  %v4765_v37 = vld [vmem:[#allocation7 + $0x850] ss:$24 sps:$4 sm:$0xff]  }
 0x270   : > { %3288 = vmatprep.subr.bf16.mxu1 %v4803_v5 }
 0x272   : > { %2573 = vmatpush1.bf16.msra.mxu0 %v4669_v40  ;;  %v4771_v40 = vld [vmem:[#allocation7 + $0x880] ss:$24 sps:$4 sm:$0xff]  }
 0x273   : > { %2574 = vmatprep.subr.bf16.mxu0 %v4674_v45  ;;  %3289 = vmatpush1.bf16.msra.mxu1 %v4801_v23  ;;  %v4777_v45 = vld [vmem:[#allocation7 + $0x8b0] ss:$24 sps:$4 sm:$0xff]  }
 0x274   : > { %3290 = vmatprep.subr.bf16.mxu1 %v4806_v48 }
 0x276   : > { %2575 = vmatpush1.bf16.msra.mxu0 %v4672_v46  ;;  %v4783_v46 = vld [vmem:[#allocation7 + $0x8e0] ss:$24 sps:$4 sm:$0xff]  }
 0x277   : > { %2576 = vmatprep.subr.bf16.mxu0 %v4677_v24  ;;  %3291 = vmatpush1.bf16.msra.mxu1 %v4804_v49 }
 0x278   : > { %3303 = vmatprep.subr.bf16.mxu1 %v4809_v7 }
 0x27a   : > { %2577 = vmatpush1.bf16.msra.mxu0 %v4675_v3 }
 0x27b   : > { %2578 = vmatprep.subr.bf16.mxu0 %v4680_v11 }
 0x27e   : > { %2579 = vmatpush1.bf16.msra.mxu0 %v4678_v12 }
 0x27f   : > { %2580 = vmatprep.subr.bf16.mxu0 %v4683_v6 }
 0x282   : > { %2581 = vmatpush1.bf16.msra.mxu0 %v4681_v20 }
 0x283   : > { %2582 = vmatprep.subr.bf16.mxu0 %v4686_v21 }
 0x286   : > { %2583 = vmatpush1.bf16.msra.mxu0 %v4684_v43 }
 0x287   : > { %2584 = vmatprep.subr.bf16.mxu0 %v4689_v32 }
 0x28a   : > { %2585 = vmatpush1.bf16.msra.mxu0 %v4687_v50 }
 0x28b   : > { %2586 = vmatprep.subr.bf16.mxu0 %v4692_v44 }
 0x28e   : > { %2587 = vmatpush1.bf16.msra.mxu0 %v4690_v8  ;;  %v4807_v8 = vld [vmem:[#allocation8 + $0x100] ss:$8 sps:$4 sm:$0xff]  }
 0x28f   : > { %2588 = vmatprep.subr.bf16.mxu0 %v4695_v14 }
 0x292   : > { %2589 = vmatpush1.bf16.msra.mxu0 %v4693_v15  ;;  %v4812_v15 = vld [vmem:[#allocation8 + $0x114] ss:$8 sps:$4 sm:$0xff]  }
 0x293   : > { %2590 = vmatprep.subr.bf16.mxu0 %v4698_v51  ;;  %v4810_v51 = vld [vmem:[#allocation8 + $0x110] ss:$8 sps:$4 sm:$0xff]  }
 0x296   : > { %2591 = vmatpush1.bf16.msra.mxu0 %v4696_v52  ;;  %v4815_v52 = vld [vmem:[#allocation8 + $0x124] ss:$8 sps:$4 sm:$0xff]  }
 0x297   : > { %2592 = vmatprep.subr.bf16.mxu0 %v4701_v53  ;;  %v4813_v53 = vld [vmem:[#allocation8 + $0x120] ss:$8 sps:$4 sm:$0xff]  }
 0x29a   : > { %2593 = vmatpush1.bf16.msra.mxu0 %v4699_v54  ;;  %v4818_v54 = vld [vmem:[#allocation8 + $0x134] ss:$8 sps:$4 sm:$0xff]  }
 0x29b   : > { %2594 = vmatprep.subr.bf16.mxu0 %v4704_v55  ;;  %v4816_v55 = vld [vmem:[#allocation8 + $0x130] ss:$8 sps:$4 sm:$0xff]  }
 0x29e   : > { %2595 = vmatpush1.bf16.msra.mxu0 %v4702_v56  ;;  %v4821_v56 = vld [vmem:[#allocation8 + $0x144] ss:$8 sps:$4 sm:$0xff]  }
 0x29f   : > { %2596 = vmatprep.subr.bf16.mxu0 %v4707_v57  ;;  %v4819_v57 = vld [vmem:[#allocation8 + $0x140] ss:$8 sps:$4 sm:$0xff]  }
 0x2a2   : > { %2597 = vmatpush1.bf16.msra.mxu0 %v4705_v58  ;;  %v4824_v58 = vld [vmem:[#allocation8 + $0x154] ss:$8 sps:$4 sm:$0xff]  }
 0x2a3   : > { %2598 = vmatprep.subr.bf16.mxu0 %v4710_v59  ;;  %v4822_v59 = vld [vmem:[#allocation8 + $0x150] ss:$8 sps:$4 sm:$0xff]  }
 0x2a6   : > { %2599 = vmatpush1.bf16.msra.mxu0 %v4708_v60  ;;  %v4827_v60 = vld [vmem:[#allocation8 + $0x164] ss:$8 sps:$4 sm:$0xff]  }
 0x2a7   : > { %2611 = vmatprep.subr.bf16.mxu0 %v4713_v61  ;;  %v4825_v61 = vld [vmem:[#allocation8 + $0x160] ss:$8 sps:$4 sm:$0xff]  }
 0x2a9   : > { %2601 = vmatmul.mubr.bf16.vlgmr.msra.gmra.mrb[4].mxu0 %v5692_v26  ;;  %v4726_v26 = vld [vmem:[#allocation7 + $0x700] ss:$24 sps:$4 sm:$0xff]  }
 0x2aa   : > { %2612 = vmatpush1.bf16.msra.mxu0 %v4711_v62  ;;  %2643 = vmatprep.mubr.bf16.mxu0 %v5694_v27  ;;  %v4729_v27 = vld [vmem:[#allocation7 + $0x730] ss:$24 sps:$4 sm:$0xff]   ;;  %v4830_v62 = vld [vmem:[#allocation8 + $0x174] ss:$8 sps:$4 sm:$0xff]  }
 0x2ab   : > { %2613 = vmatprep.subr.bf16.mxu0 %v4716_v63  ;;  %v4828_v63 = vld [vmem:[#allocation8 + $0x170] ss:$8 sps:$4 sm:$0xff]  }
 0x2ae   : > { %2614 = vmatpush1.bf16.msra.mxu0 %v4714_v0  ;;  %v4833_v0 = vld [vmem:[#allocation8 + $0x184] ss:$8 sps:$4 sm:$0xff]  }
 0x2af   : > { %2615 = vmatprep.subr.bf16.mxu0 %v4719_v1  ;;  %v4831_v1 = vld [vmem:[#allocation8 + $0x180] ss:$8 sps:$4 sm:$0xff]  }
 0x2b2   : > { %2616 = vmatpush1.bf16.msra.mxu0 %v4717_v2  ;;  %v4836_v2 = vld [vmem:[#allocation8 + $0x194] ss:$8 sps:$4 sm:$0xff]  }
 0x2b3   : > { %2617 = vmatprep.subr.bf16.mxu0 %v4722_v9  ;;  %v4834_v9 = vld [vmem:[#allocation8 + $0x190] ss:$8 sps:$4 sm:$0xff]  }
 0x2b6   : > { %2618 = vmatpush1.bf16.msra.mxu0 %v4720_v10  ;;  %v4839_v10 = vld [vmem:[#allocation8 + $0x1a4] ss:$8 sps:$4 sm:$0xff]  }
 0x2b7   : > { %2619 = vmatprep.subr.bf16.mxu0 %v4725_v13  ;;  %v4837_v13 = vld [vmem:[#allocation8 + $0x1a0] ss:$8 sps:$4 sm:$0xff]  }
 0x2ba   : > { %2620 = vmatpush1.bf16.msra.mxu0 %v4723_v16  ;;  %v4842_v16 = vld [vmem:[#allocation8 + $0x1b4] ss:$8 sps:$4 sm:$0xff]  }
 0x2bb   : > { %2621 = vmatprep.subr.bf16.mxu0 %v4728_v17  ;;  %v4840_v17 = vld [vmem:[#allocation8 + $0x1b0] ss:$8 sps:$4 sm:$0xff]  }
 0x2be   : > { %2622 = vmatpush1.bf16.msra.mxu0 %v4726_v26  ;;  %v4845_v26 = vld [vmem:[#allocation8 + $0x1c4] ss:$8 sps:$4 sm:$0xff]  }
 0x2bf   : > { %2623 = vmatprep.subr.bf16.mxu0 %v4731_v18  ;;  %v4843_v18 = vld [vmem:[#allocation8 + $0x1c0] ss:$8 sps:$4 sm:$0xff]  }
 0x2c2   : > { %2624 = vmatpush1.bf16.msra.mxu0 %v4729_v27  ;;  %v4848_v27 = vld [vmem:[#allocation8 + $0x1d4] ss:$8 sps:$4 sm:$0xff]  }
 0x2c3   : > { %2625 = vmatprep.subr.bf16.mxu0 %v4737_v19  ;;  %v4846_v19 = vld [vmem:[#allocation8 + $0x1d0] ss:$8 sps:$4 sm:$0xff]  }
 0x2c6   : > { %2626 = vmatpush1.bf16.msra.mxu0 %v4735_v22  ;;  %v4851_v22 = vld [vmem:[#allocation8 + $0x1e4] ss:$8 sps:$4 sm:$0xff]  }
 0x2c7   : > { %2627 = vmatprep.subr.bf16.mxu0 %v4743_v42  ;;  %v4849_v42 = vld [vmem:[#allocation8 + $0x1e0] ss:$8 sps:$4 sm:$0xff]  }
 0x2ca   : > { %2628 = vmatpush1.bf16.msra.mxu0 %v4741_v25  ;;  %v4854_v25 = vld [vmem:[#allocation8 + $0x1f4] ss:$8 sps:$4 sm:$0xff]  }
 0x2cb   : > { %2629 = vmatprep.subr.bf16.mxu0 %v4749_v36  ;;  %v4852_v36 = vld [vmem:[#allocation8 + $0x1f0] ss:$8 sps:$4 sm:$0xff]  }
 0x2ce   : > { %2630 = vmatpush1.bf16.msra.mxu0 %v4747_v29  ;;  %v4857_v29 = vld [vmem:[#allocation8 + $0x204] ss:$8 sps:$4 sm:$0xff]  }
 0x2cf   : > { %2631 = vmatprep.subr.bf16.mxu0 %v4755_v30  ;;  %v4855_v30 = vld [vmem:[#allocation8 + $0x200] ss:$8 sps:$4 sm:$0xff]  }
 0x2d2   : > { %2632 = vmatpush1.bf16.msra.mxu0 %v4753_v31  ;;  %v4860_v31 = vld [vmem:[#allocation8 + $0x214] ss:$8 sps:$4 sm:$0xff]  }
 0x2d3   : > { %2633 = vmatprep.subr.bf16.mxu0 %v4761_v33  ;;  %v4903_v33 = vld [vmem:[#allocation11 + $0x40] sm:$0xff]  }
 0x2d6   : > { %2634 = vmatpush1.bf16.msra.mxu0 %v4759_v34  ;;  %v4904_v34 = vld [vmem:[#allocation11] sm:$0xff]  }
 0x2d7   : > { %2635 = vmatprep.subr.bf16.mxu0 %v4767_v35  ;;  %v4905_v35 = vld [vmem:[#allocation11 + $0x48] sm:$0xff]  }
 0x2da   : > { %2636 = vmatpush1.bf16.msra.mxu0 %v4765_v37  ;;  %v4858_v37 = vld [vmem:[#allocation8 + $0x210] ss:$8 sps:$4 sm:$0xff]  }
 0x2db   : > { %2637 = vmatprep.subr.bf16.mxu0 %v4773_v39  ;;  %v4863_v39 = vld [vmem:[#allocation8 + $0x224] ss:$8 sps:$4 sm:$0xff]  }
 0x2de   : > { %2638 = vmatpush1.bf16.msra.mxu0 %v4771_v40  ;;  %v4906_v40 = vld [vmem:[#allocation11 + $0x8] sm:$0xff]  }
 0x2df   : > { %2639 = vmatprep.subr.bf16.mxu0 %v4779_v41  ;;  %v4907_v41 = vld [vmem:[#allocation11 + $0x50] sm:$0xff]  }
 0x2e2   : > { %2640 = vmatpush1.bf16.msra.mxu0 %v4777_v45  ;;  %v4861_v45 = vld [vmem:[#allocation8 + $0x220] ss:$8 sps:$4 sm:$0xff]  }
 0x2e3   : > { %2641 = vmatprep.subr.bf16.mxu0 %v4785_v38  ;;  %v4866_v38 = vld [vmem:[#allocation8 + $0x234] ss:$8 sps:$4 sm:$0xff]  }
 0x2e6   : > { %2642 = vmatpush1.bf16.msra.mxu0 %v4783_v46  ;;  %v4908_v46 = vld [vmem:[#allocation11 + $0x10] sm:$0xff]  }
 0x2e7   : > { %4154 = vmatprep.subr.bf16.mxu0 %v4903_v33 }
 0x2e9   : > { %2644 = vmatmul.mubr.bf16.vlgmr.msra.gmra.mrb[4].mxu0 %v5696_v28 }
 0x2ea   : > { %4155 = vmatpush3.bf16.msra.mxu0 %v4904_v34 }
 0x2eb   : > { %4156 = vmatprep.subr.bf16.mxu0 %v4905_v35 }
 0x2ee   : > { %4157 = vmatpush3.bf16.msra.mxu0 %v4906_v40 }
 0x2ef   : > { %4158 = vmatprep.subr.bf16.mxu0 %v4907_v41 }
 0x2f2   : > { %4159 = vmatpush3.bf16.msra.mxu0 %v4908_v46  ;;  %v4131_v46 = vld [vmem:[#allocation13] ss:$0 sm:$0xff] }
 0x2fc   : > { %v2387_v47 = vpop.f32.mrb[0].mxu0 }
 0x2fd   : > { %v2516_v24 = vpop.f32.mrb[0].mxu1  ;;  %v2389_v4 = vpop.f32.mrb[1].mxu0  ;;  %v2654_v12 = vmax.f32 %v2387_v47, 0.0  ;;  %v4909_v47 = vld [vmem:[#allocation11 + $0x58] sm:$0xff]  }
 0x2fe   : > { %v2518_v3 = vpop.f32.mrb[1].mxu1  ;;  %v2391_v11 = vpop.f32.mrb[2].mxu0  ;;  %v2656_v20 = vmax.f32 %v2516_v24, 0.0  ;;  %v2655_v21 = vmax.f32 %v2389_v4, 0.0  ;;  %v4864_v24 = vld [vmem:[#allocation8 + $0x230] ss:$8 sps:$4 sm:$0xff]   ;;  %4160 = vmatprep.subr.bf16.mxu0 %v4909_v47 }
 0x2ff   : > { %v2660_v6 = vmax.f32 %v2391_v11, 0.0  ;;  %v2520_v5 = vpop.f32.mrb[2].mxu1  ;;  %v2393_v23 = vpop.f32.mrb[3].mxu0  ;;  %v2657_v32 = vmax.f32 %v2518_v3, 0.0  ;;  %v4869_v4 = vld [vmem:[#allocation8 + $0x244] ss:$8 sps:$4 sm:$0xff]  }
 0x300   : > { %v2662_v48 = vmax.f32 %v2520_v5, 0.0  ;;  %v2661_v49 = vmax.f32 %v2393_v23, 0.0  ;;  %v2522_v43 = vpop.f32.mrb[3].mxu1  ;;  %v4910_v3 = vld [vmem:[#allocation11 + $0x18] sm:$0xff]   ;;  %v4911_v11 = vld [vmem:[#allocation11 + $0x60] sm:$0xff]   ;;  %v4913_v23 = vld [vmem:[#allocation11 + $0x68] sm:$0xff]  }
 0x301   : > { %v2666_v7 = vpack.c.bf16 %v2660_v6, %v2654_v12  ;;  %v2663_v50 = vmax.f32 %v2522_v43, 0.0  ;;  %v4867_v12 = vld [vmem:[#allocation8 + $0x240] ss:$8 sps:$4 sm:$0xff]   ;;  %v4872_v6 = vld [vmem:[#allocation8 + $0x254] ss:$8 sps:$4 sm:$0xff]   ;;  %4161 = vmatpush3.bf16.msra.mxu0 %v4910_v3 }
 0x302   : > { %v5716_v44 = vpack.c.bf16 %v2662_v48, %v2656_v20  ;;  %v2667_v28 = vpack.c.bf16 %v2661_v49, %v2655_v21  ;;  %v4912_v5 = vld [vmem:[#allocation11 + $0x20] sm:$0xff]   ;;  %4162 = vmatprep.subr.bf16.mxu0 %v4911_v11  ;;  %v4870_v20 = vld [vmem:[#allocation8 + $0x250] ss:$8 sps:$4 sm:$0xff]   ;;  %v4878_v43 = vld [vmem:[#allocation8 + $0x274] ss:$8 sps:$4 sm:$0xff]  }
 0x303   : > { %v2669_v14 = vpack.c.bf16 %v2663_v50, %v2657_v32  ;;  %v4875_v21 = vld [vmem:[#allocation8 + $0x264] ss:$8 sps:$4 sm:$0xff]   ;;  %v4873_v49 = vld [vmem:[#allocation8 + $0x260] ss:$8 sps:$4 sm:$0xff]   ;;  %v4876_v32 = vld [vmem:[#allocation8 + $0x270] ss:$8 sps:$4 sm:$0xff]  }
 0x304   : > { %3292 = vmatprep.mubr.bf16.mxu1 %v2667_v28  ;;  %v4914_v48 = vld [vmem:[#allocation11 + $0x28] sm:$0xff]  }
 0x305   : > { %3293 = vmatmul.mubr.bf16.vlgmr.msra.gmra.mrb[4].mxu1 %v2666_v7  ;;  %4163 = vmatpush3.bf16.msra.mxu0 %v4912_v5  ;;  %v4881_v7 = vld [vmem:[#allocation8 + $0x284] ss:$8 sps:$4 sm:$0xff]   ;;  %v4879_v50 = vld [vmem:[#allocation8 + $0x280] ss:$8 sps:$4 sm:$0xff]   ;;  %v4882_v28 = vld [vmem:[#allocation8 + $0x290] ss:$8 sps:$4 sm:$0xff]  }
 0x306   : > { %3304 = vmatpush1.bf16.msra.mxu1 %v4807_v8  ;;  %3335 = vmatprep.mubr.bf16.mxu1 %v2669_v14  ;;  %v4887_v8 = vld [vmem:[#allocation8 + $0x2a4] ss:$8 sps:$4 sm:$0xff]   ;;  %v4885_v14 = vld [vmem:[#allocation8 + $0x2a0] ss:$8 sps:$4 sm:$0xff]  }
 0x307   : > { %3305 = vmatprep.subr.bf16.mxu1 %v4812_v15  ;;  %4164 = vmatprep.subr.bf16.mxu0 %v4913_v23  ;;  %v4890_v15 = vld [vmem:[#allocation8 + $0x2b4] ss:$8 sps:$4 sm:$0xff]  }
 0x309   : > { %4165 = vmatpush3.bf16.msra.mxu0 %v4914_v48 }
 0x30a   : > { %3306 = vmatpush1.bf16.msra.mxu1 %v4810_v51  ;;  %v4888_v51 = vld [vmem:[#allocation8 + $0x2b0] ss:$8 sps:$4 sm:$0xff]  }
 0x30b   : > { %3307 = vmatprep.subr.bf16.mxu1 %v4815_v52  ;;  %v4893_v52 = vld [vmem:[#allocation8 + $0x2c4] ss:$8 sps:$4 sm:$0xff]  }
 0x30e   : > { %3308 = vmatpush1.bf16.msra.mxu1 %v4813_v53  ;;  %v4891_v53 = vld [vmem:[#allocation8 + $0x2c0] ss:$8 sps:$4 sm:$0xff]  }
 0x30f   : > { %3309 = vmatprep.subr.bf16.mxu1 %v4818_v54  ;;  %v4896_v54 = vld [vmem:[#allocation8 + $0x2d4] ss:$8 sps:$4 sm:$0xff]  }
 0x312   : > { %3310 = vmatpush1.bf16.msra.mxu1 %v4816_v55  ;;  %v4894_v55 = vld [vmem:[#allocation8 + $0x2d0] ss:$8 sps:$4 sm:$0xff]  }
 0x313   : > { %3311 = vmatprep.subr.bf16.mxu1 %v4821_v56  ;;  %v4899_v56 = vld [vmem:[#allocation8 + $0x2e4] ss:$8 sps:$4 sm:$0xff]  }
 0x316   : > { %3312 = vmatpush1.bf16.msra.mxu1 %v4819_v57  ;;  %v4897_v57 = vld [vmem:[#allocation8 + $0x2e0] ss:$8 sps:$4 sm:$0xff]  }
 0x317   : > { %3313 = vmatprep.subr.bf16.mxu1 %v4824_v58  ;;  %v4902_v58 = vld [vmem:[#allocation8 + $0x2f4] ss:$8 sps:$4 sm:$0xff]  }
 0x31a   : > { %3314 = vmatpush1.bf16.msra.mxu1 %v4822_v59  ;;  %v4900_v59 = vld [vmem:[#allocation8 + $0x2f0] ss:$8 sps:$4 sm:$0xff]  }
 0x31b   : > { %3315 = vmatprep.subr.bf16.mxu1 %v4827_v60 }
 0x31e   : > { %3316 = vmatpush1.bf16.msra.mxu1 %v4825_v61 }
 0x31f   : > { %3317 = vmatprep.subr.bf16.mxu1 %v4830_v62 }
 0x322   : > { %3318 = vmatpush1.bf16.msra.mxu1 %v4828_v63 }
 0x323   : > { %3319 = vmatprep.subr.bf16.mxu1 %v4833_v0 }
 0x326   : > { %3320 = vmatpush1.bf16.msra.mxu1 %v4831_v1 }
 0x327   : > { %3321 = vmatprep.subr.bf16.mxu1 %v4836_v2 }
 0x32a   : > { %3322 = vmatpush1.bf16.msra.mxu1 %v4834_v9 }
 0x32b   : > { %3323 = vmatprep.subr.bf16.mxu1 %v4839_v10 }
 0x32e   : > { %3324 = vmatpush1.bf16.msra.mxu1 %v4837_v13 }
 0x32f   : > { %3325 = vmatprep.subr.bf16.mxu1 %v4842_v16  ;;  %v4915_v16 = vld [vmem:[#allocation11 + $0x70] sm:$0xff]  }
 0x330   : > { %4166 = vmatprep.subr.bf16.mxu0 %v4915_v16 }
 0x332   : > { %3326 = vmatpush1.bf16.msra.mxu1 %v4840_v17  ;;  %v4916_v17 = vld [vmem:[#allocation11 + $0x30] sm:$0xff]  }
 0x333   : > { %3327 = vmatprep.subr.bf16.mxu1 %v4845_v26  ;;  %4167 = vmatpush3.bf16.msra.mxu0 %v4916_v17  ;;  %v4917_v26 = vld [vmem:[#allocation11 + $0x78] sm:$0xff]  }
 0x334   : > { %4168 = vmatprep.subr.bf16.mxu0 %v4917_v26 }
 0x336   : > { %3328 = vmatpush1.bf16.msra.mxu1 %v4843_v18  ;;  %v4918_v18 = vld [vmem:[#allocation11 + $0x38] sm:$0xff]  }
 0x337   : > { %3329 = vmatprep.subr.bf16.mxu1 %v4848_v27  ;;  %4169 = vmatpush3.bf16.msra.mxu0 %v4918_v18  ;;  %v2770_v27 = vlaneseq }
 0x33a   : > { %3330 = vmatpush1.bf16.msra.mxu1 %v4846_v19  ;;  %v2771_v19 = vshrl.u32 %v2770_v27, 7 }
 0x33b   : > { %3331 = vmatprep.subr.bf16.mxu1 %v4851_v22 }
 0x33c   : > { %v2772_v22 = vsub.s32 0, %v2771_v19 }
 0x33e   : > { %3332 = vmatpush1.bf16.msra.mxu1 %v4849_v42  ;;  %v2768_v42 = vld [vmem:[#allocation10] sm:$0x3] }
 0x33f   : > { %3333 = vmatprep.subr.bf16.mxu1 %v4854_v25  ;;  %v2776_v25 = vsub.s32 1, %v2771_v19 }
 0x342   : > { %3334 = vmatpush1.bf16.msra.mxu1 %v4852_v36  ;;  %v2773_v36 = vrot.slane %v2768_v42, %v2772_v22 }
 0x343   : > { %3346 = vmatprep.subr.bf16.mxu1 %v4857_v29 }
 0x345   : > { %3336 = vmatmul.mubr.bf16.vlgmr.msra.gmra.mrb[4].mxu1 %v5716_v44  ;;  %v4884_v44 = vld [vmem:[#allocation8 + $0x294] ss:$8 sps:$4 sm:$0xff]  }
 0x346   : > { %3347 = vmatpush1.bf16.msra.mxu1 %v4855_v30  ;;  %v2777_v30 = vrot.slane %v2768_v42, %v2776_v25 }
 0x347   : > { %3348 = vmatprep.subr.bf16.mxu1 %v4860_v31 }
 0x34a   : > { %3349 = vmatpush1.bf16.msra.mxu1 %v4858_v37 }
 0x34b   : > { %3350 = vmatprep.subr.bf16.mxu1 %v4863_v39 }
 0x34e   : > { %3351 = vmatpush1.bf16.msra.mxu1 %v4861_v45 }
 0x34f   : > { %3352 = vmatprep.subr.bf16.mxu1 %v4866_v38 }
 0x352   : > { %3353 = vmatpush1.bf16.msra.mxu1 %v4864_v24 }
 0x353   : > { %3354 = vmatprep.subr.bf16.mxu1 %v4869_v4 }
 0x356   : > { %3355 = vmatpush1.bf16.msra.mxu1 %v4867_v12 }
 0x357   : > { %3356 = vmatprep.subr.bf16.mxu1 %v4872_v6 }
 0x35a   : > { %3357 = vmatpush1.bf16.msra.mxu1 %v4870_v20 }
 0x35b   : > { %3358 = vmatprep.subr.bf16.mxu1 %v4875_v21 }
 0x35e   : > { %3359 = vmatpush1.bf16.msra.mxu1 %v4873_v49 }
 0x35f   : > { %3360 = vmatprep.subr.bf16.mxu1 %v4878_v43 }
 0x362   : > { %3361 = vmatpush1.bf16.msra.mxu1 %v4876_v32 }
 0x363   : > { %3362 = vmatprep.subr.bf16.mxu1 %v4881_v7 }
 0x366   : > { %3363 = vmatpush1.bf16.msra.mxu1 %v4879_v50 }
 0x367   : > { %3364 = vmatprep.subr.bf16.mxu1 %v4884_v44 }
 0x36a   : > { %3365 = vmatpush1.bf16.msra.mxu1 %v4882_v28 }
 0x36b   : > { %3366 = vmatprep.subr.bf16.mxu1 %v4887_v8 }
 0x36e   : > { %3367 = vmatpush1.bf16.msra.mxu1 %v4885_v14 }
 0x36f   : > { %3368 = vmatprep.subr.bf16.mxu1 %v4890_v15 }
 0x372   : > { %3369 = vmatpush1.bf16.msra.mxu1 %v4888_v51 }
 0x373   : > { %3370 = vmatprep.subr.bf16.mxu1 %v4893_v52 }
 0x376   : > { %3371 = vmatpush1.bf16.msra.mxu1 %v4891_v53 }
 0x377   : > { %3372 = vmatprep.subr.bf16.mxu1 %v4896_v54 }
 0x37a   : > { %3373 = vmatpush1.bf16.msra.mxu1 %v4894_v55 }
 0x37b   : > { %3374 = vmatprep.subr.bf16.mxu1 %v4899_v56 }
 0x37e   : > { %3375 = vmatpush1.bf16.msra.mxu1 %v4897_v57 }
 0x37f   : > { %3376 = vmatprep.subr.bf16.mxu1 %v4902_v58 }
 0x382   : > { %3377 = vmatpush1.bf16.msra.mxu1 %v4900_v59 }
 0x3bc   : > { %v2645_v60 = vpop.f32.mrb[4].mxu0 }
 0x3bd   : > { %v2647_v61 = vpop.f32.mrb[5].mxu0  ;;  %v2658_v63 = vmax.f32 %v2645_v60, 0.0 }
 0x3be   : > { %v2649_v62 = vpop.f32.mrb[6].mxu0  ;;  %v2659_v2 = vmax.f32 %v2647_v61, 0.0 }
 0x3bf   : > { %v2664_v0 = vmax.f32 %v2649_v62, 0.0  ;;  %v2651_v1 = vpop.f32.mrb[7].mxu0 }
 0x3c0   : > { %v2665_v9 = vmax.f32 %v2651_v1, 0.0 }
 0x3c1   : > { %v2670_v10 = vpack.c.bf16 %v2664_v0, %v2658_v63 }
 0x3c2   : > { %v2671_v13 = vpack.c.bf16 %v2665_v9, %v2659_v2 }
 0x3c4   : > { %3378 = vmatprep.mubr.bf16.mxu1 %v2671_v13 }
 0x3c5   : > { %3379 = vmatmul.mubr.bf16.vlgmr.msra.gmra.mrb[4].mxu1 %v2670_v10 }
 0x498   : > { %v3380_v29 = vpop.f32.mrb[4].mxu1 }
 0x499   : > { %v3382_v31 = vpop.f32.mrb[5].mxu1  ;;  %v4176_v34 = vadd.f32 %v3380_v29, %v2773_v36 }
 0x49a   : > { %v3384_v33 = vpop.f32.mrb[6].mxu1  ;;  %v4177_v39 = vadd.f32 %v3382_v31, %v2777_v30 }
 0x49b   : > { %v4178_v35 = vadd.f32 %v3384_v33, %v2773_v36  ;;  %v3386_v37 = vpop.f32.mrb[7].mxu1 }
 0x49c   : > { %v4179_v40 = vadd.f32 %v3386_v37, %v2777_v30 }
 0x49d   : > { %v3389_v41 = vpack.c.bf16 %v4178_v35, %v4176_v34 }
 0x49e   : > { %v3390_v45 = vpack.c.bf16 %v4179_v40, %v4177_v39 }
 0x4a0   : > { %3558 = vmatprep.mubr.bf16.mxu0 %v3390_v45 }
 0x4a1   : > { %3559 = vmatmul.mubr.bf16.vlgmr.msra.gmra.mrb[8].mxu0 %v3389_v41 }
 0x574   : > { %v4170_v38 = vpop.f32.mrb[8].mxu0 }
 0x575   : > { %v4171_v47 = vpop.f32.mrb[9].mxu0 }
 0x576   : > { %v4172_v24 = vadd.f32 %v4171_v47, %v4170_v38  ;;  %v4173_v4 = vpop.f32.mrb[10].mxu0 }
 0x577   : > { %v4174_v3 = vpop.f32.mrb[11].mxu0 }
 0x578   : > { %v3561_v11 = vadd.f32 %v4172_v24, %v4131_v46  ;;  %v4175_v12 = vadd.f32 %v4174_v3, %v4173_v4 }
 0x57a   : > { %3567 = vst [vmem:[%s406_s15] sm:$0xff] %v3561_v11  ;;  %v3564_v6 = vadd.f32 %v4175_v12, %v4131_v46 }
 0x57c   : > { %3568 = vst [vmem:[%s406_s15 + $0x8] sm:$0xff] %v3564_v6 }
 0x57d   : > { %5140 = shalt.err (!%p5137_p8)
}
 0x57e   : > { %s5141_s16 = scalar_lea.hbm %s5726_s20, 256  ;;  %s5145_s3 = scalar_lea.hbm %s5777_s7, 512 }
 0x57f   : > { %p5142_p4 = scmp.ne.s32.totalorder %s5726_s20, %s5141_s16  ;;  %p5146_p1 = scmp.lt.u32.totalorder %s5726_s20, %s5777_s7 }
 0x580   : > { %p5147_p11 = scmp.lt.u32.totalorder %s5145_s3, %s5141_s16  ;;  %p5149_p6 = scmp.lt.u32.totalorder %s5141_s16, %s5726_s20 }
 0x581   : > { %p5143_p3 = pnand %p5142_p4, %p5813_p13 }
 0x582   : > { %p5148_p12 = por %p5147_p11, %p5146_p1 }
 0x583   : > { %p5144_p10 = pneg %p5143_p3 }
 0x584   : > { %p5150_p2 = por %p5149_p6, %p5148_p12 }
 0x586   : > { %p5151_p9 = pnand %p5150_p2, %p5144_p10 }
 0x588   : > { %5154 = shalt.err (!%p5151_p9)
}
 0x589   : > { %s5225_s18 = smov 128   ;;  %s5226_s15 = smov 8  }
 0x58a   : > { %4241 = dma.vmem_to_hbm [thread:$0]  (%p5813_p13), %s5721_s12, 256, %s5726_s20, %s3570_s0, %s5225_s18, %s5225_s18, %s5226_s15  }
 0x58b PF: > { %s3598_s2 = sand.u32 1, %s5197_s24   ;;  %p5814_p0 = scmp.ne.s32.totalorder %s5799_s28, 0 }
 0x58c   : > { %p5815_p5 = scmp.ge.s32.totalorder %s5209_s27, 2  ;;  %s3599_s14 = scalar_lea.sflag [#allocation4], %s3598_s2 }
 0x58e   : > { %p4267_p7 = pnand %p5815_p5, %p5814_p0 }
 0x590   : > { %5192 = dma.done.wait (!%p4267_p7), %s3599_s14, 256  }
 0x591   : > { %5194 = vsyncadd (!%p4267_p7), %s3599_s14, 4294967040  ;;  %p25_p8 = scmp.ge.s32.totalorder %s5424_s11, 4   ;;  %s5816_s24 = smov %s5201_s25 }
 0x592   : > { %s5817_s25 = smov %s5205_s26  ;;  %s5818_s26 = smov %s5436_s23 }
 0x593   : > { %s5819_s27 = smov %s5424_s11  ;;  %27 = sbr.rel (!%p25_p8) target bundleno = 14 (0xe), region = 126 }
 0x59a   :  { %3604 = vsyncpa [#allocation3], 1 }
 0x59b   :  { %3606 = vsyncpa [#allocation3 + $0x1], 1 }
 0x59c   :  { %3607 = vsyncpa [#allocation6], 1 }
 0x59d   :  { %3609 = vsyncpa [#allocation6 + $0x1], 1 }
 0x59e   :  { %3610 = vsyncpa [#allocation9], 1 }
 0x59f   :  { %3611 = vsyncpa [#allocation12], 1 }
 0x5a0   :  { %3612 = vsyncpa [#allocation4], 1 }
 0x5a1   :  { %3614 = vsyncpa [#allocation4 + $0x1], 1 }

// kernel: tpu_custom_call.1
= control target key start
LH: loop header
LB: loop body
LE: loop exit
PB: predicated region body
PF: predicated region fallthrough
CT: control target
= control target key end

     0   :  { %s5770_s0 = inlined_call_operand.hbm [shape: bf16[32,768], index: 0, kind: input, shape index: {}]   ;;  %s5771_s1 = inlined_call_operand.hbm [shape: bf16[32,768], index: 1, kind: input, shape index: {}]   ;;  %s5772_s2 = inlined_call_operand.hbm [shape: bf16[768,768], index: 2, kind: input, shape index: {}]   ;;  %s5773_s3 = inlined_call_operand.hbm [shape: bf16[768,256], index: 3, kind: input, shape index: {}]   ;;  %s5774_s4 = inlined_call_operand.hbm [shape: f32[1,256], index: 4, kind: input, shape index: {}]   ;;  %s5775_s5 = inlined_call_operand.hbm [shape: bf16[256,128], index: 5, kind: input, shape index: {}]   ;;  %s5776_s6 = inlined_call_operand.hbm [shape: f32[1,128], index: 6, kind: input, shape index: {}]   ;;  %s5777_s7 = inlined_call_operand.hbm [shape: f32[32,128], index: 7, kind: output, shape index: {}]  }
   0x1   :  { %5786 = sst [smem:[#allocation21_spill]] %s5770_s0 }
   0x2   :  { %5787 = sst [smem:[#allocation22_spill]] %s5772_s2 }
   0x3   :  { %5788 = sst [smem:[#allocation23_spill]] %s5773_s3 }
   0x4   :  { %5789 = sst [smem:[#allocation24_spill]] %s5774_s4 }
   0x5   :  { %12 = vsyncpa [#allocation3], 0 }
   0x6   :  { %14 = vsyncpa [#allocation3 + $0x1], 0 }
   0x7   :  { %15 = vsyncpa [#allocation6], 0 }
   0x8   :  { %17 = vsyncpa [#allocation6 + $0x1], 0 }
   0x9   :  { %18 = vsyncpa [#allocation9], 0 }
   0xa   :  { %19 = vsyncpa [#allocation12], 0 }
   0xb   :  { %20 = vsyncpa [#allocation4], 0 }
   0xc   :  { %22 = vsyncpa [#allocation4 + $0x1], 0  ;;  %s5267_s24 = smov 0   ;;  %s5269_s25 = smov 0  }
   0xd   :  { %s5271_s26 = smov 0   ;;  %s5273_s27 = smov 0  }
   0xe LB: > { %s5211_s28 = smov [#allocation7]   ;;  %s5288_s30 = sadd.s32 4294967295, %s5209_s27   ;;  %s5209_s27 = sphi %s5273_s27, %s5819_s27   ;;  %s5205_s26 = sphi %s5271_s26, %s5818_s26   ;;  %s5201_s25 = sphi %s5269_s25, %s5817_s25   ;;  %s5197_s24 = sphi %s5267_s24, %s5816_s24  }
   0xf   : > { %s228_s29 = sshll.u32 %s5211_s28, 4  ;;  %p3727_p0 = scmp.ge.s32.totalorder %s5209_s27, 1  ;;  %s5293_s29 = int_to_ptr.vmem [resolvable:$true] %s228_s29 }
  0x10   : > { %p5778_p1 = scmp.eq.s32.totalorder %s5288_s30, 0  ;;  %p216_p2 = scmp.lt.s32.totalorder %s5209_s27, 3 }
  0x11   : > { %s5212_s9 = smov [#allocation8]   ;;  %s5213_s12 = smov [#allocation11]  }
  0x12   : > { %p5295_p3 = pnand %p3727_p0, %p216_p2  ;;  %s241_s10 = sshll.u32 %s5212_s9, 4  ;;  %s5308_s10 = int_to_ptr.vmem [resolvable:$true] %s241_s10 }
  0x13   : > { %s5310_s13 = sshll.u32 %s5213_s12, 4  ;;  %s5792_s2 = sld [smem:[#allocation22_spill]]  ;;  %s266_s13 = int_to_ptr.vmem [resolvable:$true] %s5310_s13 }
  0x14   : > { %s5790_s8 = scalar_select %p5295_p3, 1, 0 }
  0x15   : > { %p4243_p5 = pneg %p5295_p3 }
  0x17   : > { %p5304_p6 = pnand %p4243_p5, %p5778_p1 }
  0x19   : > { %s4927_s16 = scalar_lea.hbm %s5792_s2, 36864  ;;  %p5320_p8 = pneg %p5304_p6 }
  0x1a   : > { %p4928_p7 = scmp.ne.s32.totalorder %s5792_s2, %s4927_s16  ;;  %p4934_p11 = scmp.lt.u32.totalorder %s4927_s16, %s5792_s2 }
  0x1c   : > { %p4930_p9 = pnand %p5320_p8, %p4928_p7 }
  0x1e   : > { %p4931_p10 = pneg %p4930_p9 }
  0x20   : > { %p4936_p12 = pnand %p4934_p11, %p4931_p10 }
  0x22   : > { %4939 = shalt.err (!%p4936_p12)
}
  0x23   : > { %s4940_s22 = scalar_lea.vmem %s5293_s29, 36864  ;;  %p4948_p5 = scmp.lt.s32.totalorder %s5293_s29, %s5293_s29 }
  0x24   : > { %p4941_p13 = scmp.ne.s32.totalorder %s5293_s29, %s4940_s22  ;;  %p4949_p4 = scmp.lt.s32.totalorder %s4940_s22, %s4940_s22 }
  0x26   : > { %p4943_p0 = pnand %p4941_p13, %p5320_p8  ;;  %p4950_p7 = por %p4949_p4, %p4948_p5 }
  0x28   : > { %p4944_p2 = pneg %p4943_p0 }
  0x2a   : > { %p4951_p9 = pnand %p4950_p7, %p4944_p2 }
  0x2c   : > { %4954 = shalt.err (!%p4951_p9)
}
  0x2d   : > { %s5780_s23 = smov 384   ;;  %s5782_s28 = smov 24  }
  0x2e   : > { %4246 = dma.hbm_to_vmem [thread:$0]  (!%p5304_p6), %s5792_s2, 36864, %s5293_s29, [#allocation6], %s5780_s23, %s5780_s23, %s5782_s28  }
  0x2f   : > { %s5794_s3 = sld [smem:[#allocation23_spill]] }
  0x35   : > { %s4955_s16 = scalar_lea.hbm %s5794_s3, 12288 }
  0x36   : > { %p4956_p4 = scmp.ne.s32.totalorder %s5794_s3, %s4955_s16  ;;  %p4962_p12 = scmp.lt.u32.totalorder %s4955_s16, %s5794_s3 }
  0x38   : > { %p4958_p10 = pnand %p4956_p4, %p5320_p8 }
  0x3a   : > { %p4959_p11 = pneg %p4958_p10 }
  0x3c   : > { %p4964_p13 = pnand %p4962_p12, %p4959_p11 }
  0x3e   : > { %4967 = shalt.err (!%p4964_p13)
}
  0x3f   : > { %s4968_s29 = scalar_lea.vmem %s5308_s10, 12288  ;;  %p4976_p7 = scmp.lt.s32.totalorder %s5308_s10, %s5308_s10 }
  0x40   : > { %p4969_p0 = scmp.ne.s32.totalorder %s5308_s10, %s4968_s29  ;;  %p4977_p9 = scmp.lt.s32.totalorder %s4968_s29, %s4968_s29 }
  0x42   : > { %p4971_p2 = pnand %p4969_p0, %p5320_p8  ;;  %p4978_p4 = por %p4977_p9, %p4976_p7 }
  0x44   : > { %p4972_p5 = pneg %p4971_p2 }
  0x46   : > { %p4979_p10 = pnand %p4978_p4, %p4972_p5 }
  0x48   : > { %4982 = shalt.err (!%p4979_p10)
}
  0x49   : > { %s5216_s22 = smov 128   ;;  %s5217_s9 = smov 8  }
  0x4a   : > { %4249 = dma.hbm_to_vmem [thread:$0]  (!%p5304_p6), %s5794_s3, 12288, %s5308_s10, [#allocation9], %s5216_s22, %s5216_s22, %s5217_s9  }
  0x4b   : > { %s4983_s17 = scalar_lea.hbm %s5775_s5, 2048 }
  0x4c   : > { %p4984_p11 = scmp.ne.s32.totalorder %s5775_s5, %s4983_s17  ;;  %p4990_p0 = scmp.lt.u32.totalorder %s4983_s17, %s5775_s5 }
  0x4e   : > { %p4986_p12 = pnand %p4984_p11, %p5320_p8 }
  0x50   : > { %p4987_p13 = pneg %p4986_p12 }
  0x52   : > { %p4992_p2 = pnand %p4990_p0, %p4987_p13 }
  0x54   : > { %4995 = shalt.err (!%p4992_p2)
}
  0x55   : > { %s4996_s12 = scalar_lea.vmem %s266_s13, 2048  ;;  %p5004_p4 = scmp.lt.s32.totalorder %s266_s13, %s266_s13 }
  0x56   : > { %p4997_p5 = scmp.ne.s32.totalorder %s266_s13, %s4996_s12  ;;  %p5005_p10 = scmp.lt.s32.totalorder %s4996_s12, %s4996_s12 }
  0x58   : > { %p4999_p7 = pnand %p4997_p5, %p5320_p8  ;;  %p5006_p1 = por %p5005_p10, %p5004_p4 }
  0x5a   : > { %p5000_p9 = pneg %p4999_p7 }
  0x5c   : > { %p5007_p3 = pnand %p5006_p1, %p5000_p9 }
  0x5e   : > { %5010 = shalt.err (!%p5007_p3)
}
  0x5f   : > { %s5218_s10 = smov 64   ;;  %s5219_s22 = smov 4  }
  0x60   : > { %4255 = dma.hbm_to_vmem [thread:$0]  (!%p5304_p6), %s5775_s5, 2048, %s266_s13, [#allocation12], %s5218_s10, %s5218_s10, %s5219_s22  }
  0x61   : > { %s5220_s15 = smov [#allocation10]   ;;  %s5221_s17 = smov [#allocation13]  }
  0x62   : > { %s255_s16 = sshll.u32 %s5220_s15, 4  ;;  %s279_s18 = sshll.u32 %s5221_s17, 4  ;;  %s256_s16 = int_to_ptr.vmem [resolvable:$true] %s255_s16  ;;  %s280_s18 = int_to_ptr.vmem [resolvable:$true] %s279_s18 }
  0x63   : > { %s5795_s4 = sld [smem:[#allocation24_spill]] }
  0x69   : > { %s5011_s29 = scalar_lea.hbm %s5795_s4, 32 }
  0x6a   : > { %p5012_p1 = scmp.ne.s32.totalorder %s5795_s4, %s5011_s29  ;;  %p5018_p12 = scmp.lt.u32.totalorder %s5011_s29, %s5795_s4 }
  0x6c   : > { %p5014_p3 = pnand %p5012_p1, %p5320_p8 }
  0x6e   : > { %p5015_p11 = pneg %p5014_p3 }
  0x70   : > { %p5020_p13 = pnand %p5018_p12, %p5015_p11 }
  0x72   : > { %5023 = shalt.err (!%p5020_p13)
}
  0x73   : > { %s5024_s13 = scalar_lea.vmem %s256_s16, 32  ;;  %p5032_p7 = scmp.lt.s32.totalorder %s256_s16, %s256_s16 }
  0x74   : > { %p5025_p0 = scmp.ne.s32.totalorder %s256_s16, %s5024_s13  ;;  %p5033_p9 = scmp.lt.s32.totalorder %s5024_s13, %s5024_s13 }
  0x76   : > { %p5027_p2 = pnand %p5025_p0, %p5320_p8  ;;  %p5034_p4 = por %p5033_p9, %p5032_p7 }
  0x78   : > { %p5028_p5 = pneg %p5027_p2 }
  0x7a   : > { %p5035_p10 = pnand %p5034_p4, %p5028_p5 }
  0x7c   : > { %5038 = shalt.err (!%p5035_p10)
}
  0x7d   : > { %4252 = dma.hbm_to_vmem [thread:$0]  (!%p5304_p6), %s5795_s4, 32, %s256_s16, [#allocation9]  }
  0x7e   : > { %s5039_s22 = scalar_lea.hbm %s5776_s6, 16 }
  0x7f   : > { %p5040_p1 = scmp.ne.s32.totalorder %s5776_s6, %s5039_s22  ;;  %p5046_p12 = scmp.lt.u32.totalorder %s5039_s22, %s5776_s6 }
  0x81   : > { %p5042_p3 = pnand %p5040_p1, %p5320_p8 }
  0x83   : > { %p5043_p11 = pneg %p5042_p3 }
  0x85   : > { %p5048_p13 = pnand %p5046_p12, %p5043_p11 }
  0x87   : > { %5051 = shalt.err (!%p5048_p13)
}
  0x88   : > { %s5052_s20 = scalar_lea.vmem %s280_s18, 16  ;;  %s5059_s16 = scalar_lea.vmem %s280_s18, 32 }
  0x89   : > { %p5053_p0 = scmp.ne.s32.totalorder %s280_s18, %s5052_s20  ;;  %p5060_p7 = scmp.lt.s32.totalorder %s280_s18, %s280_s18 }
  0x8a   : > { %p5061_p9 = scmp.lt.s32.totalorder %s5059_s16, %s5052_s20 }
  0x8b   : > { %p5055_p2 = pnand %p5053_p0, %p5320_p8 }
  0x8c   : > { %p5062_p4 = por %p5061_p9, %p5060_p7 }
  0x8d   : > { %p5056_p5 = pneg %p5055_p2 }
  0x8f   : > { %p5063_p10 = pnand %p5062_p4, %p5056_p5 }
  0x91   : > { %5066 = shalt.err (!%p5063_p10)
}
  0x92   : > { %4258 = dma.hbm_to_vmem [thread:$0]  (!%p5304_p6), %s5776_s6, 16, %s280_s18, [#allocation12]  }
  0x93   : > { %s3726_s19 = sadd.s32 4294967294, %s5209_s27   ;;  %s5424_s11 = sadd.s32 1, %s5209_s27  }
  0x94   : > { %s35_s12 = sadd.s32 1, %s5205_s26  ;;  %s32_s13 = ssub.s32 %s5209_s27, %s5424_s11 }
  0x95   : > { %p42_p8 = scmp.ne.s32.totalorder %s5205_s26, %s5201_s25  ;;  %p33_p1 = scmp.eq.s32.totalorder %s32_s13, 0 }
  0x96   : > { %p43_p3 = scmp.eq.s32.totalorder %s5209_s27, 0  ;;  %p48_p11 = scmp.ne.s32.totalorder %s5201_s25, %s5197_s24 }
  0x97   : > { %p203_p12 = scmp.eq.s32.totalorder %s5288_s30, 1  ;;  %p5796_p0 = scmp.eq.s32.totalorder %s5288_s30, 0 }
  0x98   : > { %s5436_s23 = scalar_select %p33_p1, %s5205_s26, %s35_s12  }
  0x99   : > { %p44_p13 = por %p43_p3, %p42_p8  ;;  %p5440_p6 = por %p5796_p0, %p48_p11 }
  0x9a   : > { %p5444_p2 = por %p203_p12, %p42_p8  ;;  %p209_p5 = scmp.eq.s32.totalorder %s3726_s19, 1 }
  0x9b   : > { %p4275_p7 = scmp.lt.s32.totalorder %s5209_s27, 2  ;;  %s290_s2 = sand.u32 1, %s5205_s26  }
  0x9c   : > { %s5798_s10 = scalar_select %p5444_p2, 1, 0 }
  0x9d   : > { %p5450_p9 = por %p209_p5, %p48_p11  ;;  %s5454_s22 = smul.u32 48, %s290_s2 }
  0x9e   : > { %p5456_p4 = pnand %p4275_p7, %p44_p13  ;;  %s5784_s14 = smul.u32 768, %s5209_s27 }
  0x9f   : > { %s5799_s28 = scalar_select %p5450_p9, 1, 0 }
  0xa0   : > { %s5801_s0 = sld [smem:[#allocation21_spill]]  ;;  %s294_s21 = scalar_lea.vmem [#allocation2], %s5454_s22 }
  0xa1   : > { %s302_s29 = sshll.u32 %s294_s21, 4  ;;  %s5472_s19 = scalar_lea.sflag [#allocation3], %s290_s2  ;;  %s5470_s29 = int_to_ptr.vmem [resolvable:$true] %s302_s29 }
  0xa2   : > { %p5069_p8 = pneg %p5456_p4 }
  0xa6   : > { %s5467_s16 = scalar_lea.hbm %s5801_s0, %s5784_s14  ;;  %s5072_s20 = scalar_lea.hbm %s5801_s0, 1536 }
  0xa7   : > { %s5067_s12 = scalar_lea.hbm %s5467_s16, 768  ;;  %p5073_p11 = scmp.lt.u32.totalorder %s5467_s16, %s5801_s0 }
  0xa8   : > { %p5068_p10 = scmp.ne.s32.totalorder %s5467_s16, %s5067_s12  ;;  %p5074_p12 = scmp.lt.u32.totalorder %s5072_s20, %s5067_s12 }
  0xa9   : > { %p5076_p0 = scmp.lt.u32.totalorder %s5067_s12, %s5467_s16 }
  0xaa   : > { %p5070_p1 = pnand %p5069_p8, %p5068_p10  ;;  %p5075_p13 = por %p5074_p12, %p5073_p11 }
  0xac   : > { %p5071_p3 = pneg %p5070_p1  ;;  %p5077_p5 = por %p5076_p0, %p5075_p13 }
  0xae   : > { %p5078_p7 = pnand %p5077_p5, %p5071_p3 }
  0xb0   : > { %5081 = shalt.err (!%p5078_p7)
}
  0xb1   : > { %s5082_s2 = scalar_lea.vmem %s5470_s29, 768  ;;  %s5222_s21 = smov [#allocation2]  }
  0xb2   : > { %p5083_p10 = scmp.ne.s32.totalorder %s5470_s29, %s5082_s2  ;;  %s5087_s13 = sshll.u32 %s5222_s21, 4  ;;  %s5088_s13 = int_to_ptr.vmem [resolvable:$false] %s5087_s13 }
  0xb3   : > { %s5089_s14 = scalar_lea.vmem %s5088_s13, 1536  ;;  %p5090_p2 = scmp.lt.s32.totalorder %s5470_s29, %s5088_s13 }
  0xb4   : > { %p5085_p1 = pnand %p5083_p10, %p5069_p8  ;;  %p5091_p11 = scmp.lt.s32.totalorder %s5089_s14, %s5082_s2 }
  0xb6   : > { %p5086_p9 = pneg %p5085_p1  ;;  %p5092_p12 = por %p5091_p11, %p5090_p2 }
  0xb8   : > { %p5093_p13 = pnand %p5092_p12, %p5086_p9 }
  0xba   : > { %5096 = shalt.err (!%p5093_p13)
}
  0xbb   : > { %s5802_s15 = smov 24   ;;  %s5803_s12 = smov 384  }
  0xbc   : > { %4262 = dma.hbm_to_vmem [thread:$0]  (!%p5456_p4), %s5467_s16, 768, %s5470_s29, %s5472_s19, %s5803_s12, %s5803_s12, %s5802_s15  }
  0xbd   : > { %s5804_s17 = smul.u32 768, %s5209_s27  ;;  %s316_s13 = scalar_lea.vmem [#allocation5], %s5454_s22 }
  0xbe   : > { %s324_s14 = sshll.u32 %s316_s13, 4  ;;  %s5805_s0 = sand.u32 1, %s5209_s27   ;;  %s5511_s14 = int_to_ptr.vmem [resolvable:$true] %s324_s14 }
  0xbf   : > { %s5508_s2 = scalar_lea.hbm %s5771_s1, %s5804_s17  ;;  %s5515_s3 = scalar_lea.sflag [#allocation6], %s5805_s0 }
  0xc0   : > { %s5097_s4 = scalar_lea.hbm %s5508_s2, 768  ;;  %s5102_s19 = scalar_lea.hbm %s5771_s1, 1536 }
  0xc1   : > { %p5098_p2 = scmp.ne.s32.totalorder %s5508_s2, %s5097_s4  ;;  %p5103_p0 = scmp.lt.u32.totalorder %s5508_s2, %s5771_s1 }
  0xc2   : > { %p5104_p5 = scmp.lt.u32.totalorder %s5102_s19, %s5097_s4  ;;  %p5106_p10 = scmp.lt.u32.totalorder %s5097_s4, %s5508_s2 }
  0xc3   : > { %p5100_p9 = pnand %p5098_p2, %p5069_p8 }
  0xc4   : > { %p5105_p7 = por %p5104_p5, %p5103_p0 }
  0xc5   : > { %p5101_p3 = pneg %p5100_p9 }
  0xc6   : > { %p5107_p1 = por %p5106_p10, %p5105_p7 }
  0xc8   : > { %p5108_p11 = pnand %p5107_p1, %p5101_p3 }
  0xca   : > { %5111 = shalt.err (!%p5108_p11)
}
  0xcb   : > { %s5112_s0 = scalar_lea.vmem %s5511_s14, 768  ;;  %s5223_s22 = smov [#allocation5]  }
  0xcc   : > { %p5113_p12 = scmp.ne.s32.totalorder %s5511_s14, %s5112_s0  ;;  %s5117_s21 = sshll.u32 %s5223_s22, 4  ;;  %s5118_s21 = int_to_ptr.vmem [resolvable:$false] %s5117_s21 }
  0xcd   : > { %s5119_s13 = scalar_lea.vmem %s5118_s21, 1536  ;;  %p5120_p9 = scmp.lt.s32.totalorder %s5511_s14, %s5118_s21 }
  0xce   : > { %p5115_p13 = pnand %p5113_p12, %p5069_p8  ;;  %p5121_p0 = scmp.lt.s32.totalorder %s5119_s13, %s5112_s0 }
  0xd0   : > { %p5116_p2 = pneg %p5115_p13  ;;  %p5122_p5 = por %p5121_p0, %p5120_p9 }
  0xd2   : > { %p5123_p7 = pnand %p5122_p5, %p5116_p2 }
  0xd4   : > { %5126 = shalt.err (!%p5123_p7)
}
  0xd5   : > { %4265 = dma.hbm_to_vmem [thread:$0]  (!%p5456_p4), %s5508_s2, 768, %s5511_s14, %s5515_s3, %s5803_s12, %s5803_s12, %s5802_s15  }
  0xd6   : > { %p5806_p8 = scmp.ne.s32.totalorder %s5790_s8, 0 }
  0xd7   : > { %s5547_s4 = sand.u32 (!%p5806_p8), 1, %s5201_s25  }
  0xd8   : > { %336 = sbr.rel (%p5806_p8) target bundleno = 1419 (0x58b), region = 48  ;;  %s339_s29 = scalar_lea.sflag (!%p5806_p8), [#allocation3], %s5547_s4 }
  0xd9   : > { %s4216_s16 = smul.u32 (!%p5806_p8), 48, %s5547_s4 }
  0xdb   : > { %s5551_s19 = scalar_lea.vmem (!%p5806_p8), [#allocation2], %s4216_s16 }
  0xdf   : > { %5172 = dma.done.wait (%p5440_p6), %s339_s29, 768  }
  0xe0   : > { %5174 = vsyncadd (%p5440_p6), %s339_s29, 4294966528  ;;  %s347_s3 = sand.u32 1, %s5288_s30   ;;  %s5558_s9 = scalar_lea.vmem [#allocation5], %s4216_s16 }
  0xe1   : > { %s348_s8 = scalar_lea.sflag [#allocation6], %s347_s3 }
  0xe2   : > { %5176 = dma.done.wait (%p5440_p6), %s348_s8, 768  }
  0xe3   : > { %5178 = vsyncadd (%p5440_p6), %s348_s8, 4294966528  ;;  %p5807_p4 = scmp.eq.s32.totalorder %s5288_s30, 0 }
  0xe5   : > { %5180 = dma.done.wait (%p5807_p4), [#allocation6], 36864   ;;  %p5808_p3 = pmov %p5807_p4 }
  0xe7   : > { %5182 = vsyncadd (%p5808_p3), [#allocation6], 4294930432  ;;  %p5809_p10 = pmov %p5808_p3 }
  0xe8   : > { %p5810_p1 = pmov %p5808_p3 }
  0xe9   : > { %5184 = dma.done.wait (%p5809_p10), [#allocation9], 12320  }
  0xea   : > { %5186 = vsyncadd (%p5810_p1), [#allocation9], 4294954976  ;;  %p5811_p11 = pmov %p5810_p1 }
  0xeb   : > { %p5812_p12 = pmov %p5810_p1 }
  0xec   : > { %5188 = dma.done.wait (%p5811_p11), [#allocation12], 2064  }
  0xed   : > { %5190 = vsyncadd (%p5812_p12), [#allocation12], 4294965232  ;;  %v429_v0 = vld [vmem:[%s5558_s9] sm:$0xff]  ;;  %v430_v1 = vld [vmem:[%s5558_s9 + $0x8] sm:$0xff]  ;;  %s3746_s18 = sshll.u32 %s5547_s4, 4  ;;  %s4153_s2 = sshll.u32 %s5288_s30, 8 }
  0xee   : > { %v431_v2 = vld [vmem:[%s5558_s9 + $0x10] sm:$0xff]  ;;  %v5579_v3 = vunpack.c.l.bf16 %v429_v0  ;;  %v5581_v4 = vunpack.c.h.bf16 %v429_v0  ;;  %v5583_v5 = vunpack.c.l.bf16 %v430_v1  ;;  %v5585_v6 = vunpack.c.h.bf16 %v430_v1  ;;  %v411_v7 = vld [vmem:[%s5551_s19] sm:$0xff]  ;;  %v412_v8 = vld [vmem:[%s5551_s19 + $0x8] sm:$0xff]  ;;  %s406_s15 = scalar_lea.vmem [#allocation14], %s3746_s18  ;;  %s5726_s20 = scalar_lea.hbm %s5777_s7, %s4153_s2 }
  0xef   : > { %v439_v9 = vunpack.c.l.bf16 %v431_v2  ;;  %v413_v10 = vld [vmem:[%s5551_s19 + $0x10] sm:$0xff]  ;;  %v5590_v11 = vunpack.c.l.bf16 %v411_v7  ;;  %v5592_v12 = vunpack.c.h.bf16 %v411_v7  ;;  %v440_v13 = vunpack.c.h.bf16 %v431_v2  ;;  %v432_v17 = vld [vmem:[%s5558_s9 + $0x18] sm:$0xff]  ;;  %v433_v18 = vld [vmem:[%s5558_s9 + $0x20] sm:$0xff]  ;;  %s3583_s12 = sshll.u32 %s406_s15, 4  ;;  %s3570_s0 = scalar_lea.sflag [#allocation4], %s5547_s4  ;;  %s5721_s12 = int_to_ptr.vmem [resolvable:$true] %s3583_s12 }
  0xf0   : > { %v477_v14 = vmul.f32 %v5579_v3, %v5579_v3  ;;  %v478_v15 = vmul.f32 %v5581_v4, %v5581_v4  ;;  %v479_v16 = vmul.f32 %v5583_v5, %v5583_v5  ;;  %v480_v19 = vmul.f32 %v5585_v6, %v5585_v6  ;;  %v434_v22 = vld [vmem:[%s5558_s9 + $0x28] sm:$0xff]  ;;  %v414_v39 = vld [vmem:[%s5551_s19 + $0x18] sm:$0xff]  ;;  %v415_v45 = vld [vmem:[%s5551_s19 + $0x20] sm:$0xff]  ;;  %s5127_s22 = scalar_lea.vmem %s5721_s12, 256  ;;  %p5813_p13 = scmp.ne.s32.totalorder %s5798_s10, 0 }
  0xf1   : > { %v5604_v20 = vunpack.c.l.bf16 %v412_v8  ;;  %v5606_v21 = vunpack.c.h.bf16 %v412_v8  ;;  %v4327_v23 = vld [vmem:[#allocation7 + $0x4] ss:$24 sps:$4 sm:$0xff]   ;;  %v481_v24 = vmul.f32 %v439_v9, %v439_v9  ;;  %v421_v26 = vunpack.c.l.bf16 %v413_v10  ;;  %v4331_v33 = vld [vmem:[#allocation7] ss:$24 sps:$4 sm:$0xff]   ;;  %v4333_v40 = vld [vmem:[#allocation7 + $0x34] ss:$24 sps:$4 sm:$0xff]   ;;  %p5128_p6 = scmp.ne.s32.totalorder %s5721_s12, %s5127_s22 }
  0xf2   : > { %v489_v25 = vadd.f32 %v478_v15, %v477_v14  ;;  %v447_v27 = vmul.f32 %v5590_v11, %v5590_v11  ;;  %v4329_v28 = vld [vmem:[#allocation7 + $0xc] ss:$24 sps:$4 sm:$0xff]   ;;  %v422_v29 = vunpack.c.h.bf16 %v413_v10  ;;  %v448_v30 = vmul.f32 %v5592_v12, %v5592_v12  ;;  %2267 = vmatprep.subr.bf16.mxu0 %v4327_v23  ;;  %v4332_v34 = vld [vmem:[#allocation7 + $0x8] ss:$24 sps:$4 sm:$0xff]   ;;  %v4335_v46 = vld [vmem:[#allocation7 + $0x3c] ss:$24 sps:$4 sm:$0xff]  }
  0xf3   : > { %v449_v31 = vmul.f32 %v5604_v20, %v5604_v20  ;;  %v5615_v32 = vunpack.c.l.bf16 %v432_v17  ;;  %v482_v35 = vmul.f32 %v440_v13, %v440_v13  ;;  %v450_v37 = vmul.f32 %v5606_v21, %v5606_v21  ;;  %2396 = vmatprep.subr.bf16.mxu1 %v4329_v28  ;;  %2268 = vmatpush1.bf16.msra.mxu0 %v4331_v33  ;;  %v4337_v47 = vld [vmem:[#allocation7 + $0x30] ss:$24 sps:$4 sm:$0xff]   ;;  %v4339_v57 = vld [vmem:[#allocation7 + $0x64] ss:$24 sps:$4 sm:$0xff]   ;;  %v4343_v0 = vld [vmem:[#allocation7 + $0x60] ss:$24 sps:$4 sm:$0xff]   ;;  %p5129_p2 = pnand %p5128_p6, %p5813_p13 }
  0xf4   : > { %v490_v36 = vadd.f32 %v489_v25, %v479_v16  ;;  %v5619_v38 = vmul.f32 %v439_v9, %v421_v26  ;;  %v459_v41 = vadd.f32 %v448_v30, %v447_v27  ;;  %v5622_v42 = vmul.f32 %v440_v13, %v422_v29  ;;  %2397 = vmatpush1.bf16.msra.mxu1 %v4332_v34  ;;  %v4338_v52 = vld [vmem:[#allocation7 + $0x38] ss:$24 sps:$4 sm:$0xff]   ;;  %v4341_v63 = vld [vmem:[#allocation7 + $0x6c] ss:$24 sps:$4 sm:$0xff]   ;;  %v4344_v9 = vld [vmem:[#allocation7 + $0x68] ss:$24 sps:$4 sm:$0xff]  }
  0xf5   : > { %v5624_v43 = vunpack.c.h.bf16 %v432_v17  ;;  %v5626_v44 = vunpack.c.l.bf16 %v433_v18  ;;  %v451_v49 = vmul.f32 %v421_v26, %v421_v26  ;;  %v5629_v50 = vunpack.c.h.bf16 %v433_v18  ;;  %2269 = vmatprep.subr.bf16.mxu0 %v4333_v40  ;;  %2398 = vmatprep.subr.bf16.mxu1 %v4335_v46  ;;  %v416_v62 = vld [vmem:[%s5551_s19 + $0x28] sm:$0xff]  ;;  %p5130_p9 = pneg %p5129_p2  ;;  %s5224_s30 = smov [#allocation14]  }
  0xf6   : > { %v491_v48 = vadd.f32 %v490_v36, %v480_v19  ;;  %v445_v51 = vunpack.c.l.bf16 %v434_v22  ;;  %v460_v53 = vadd.f32 %v459_v41, %v449_v31  ;;  %v483_v54 = vmul.f32 %v5615_v32, %v5615_v32  ;;  %v4345_v16 = vld [vmem:[#allocation7 + $0x94] ss:$24 sps:$4 sm:$0xff]   ;;  %v4349_v31 = vld [vmem:[#allocation7 + $0x90] ss:$24 sps:$4 sm:$0xff]   ;;  %v4355_v46 = vld [vmem:[#allocation7 + $0xc0] ss:$24 sps:$4 sm:$0xff]  }
  0xf7   : > { %v484_v55 = vmul.f32 %v5624_v43, %v5624_v43  ;;  %v485_v56 = vmul.f32 %v5626_v44, %v5626_v44  ;;  %v452_v59 = vmul.f32 %v422_v29, %v422_v29  ;;  %v446_v60 = vunpack.c.h.bf16 %v434_v22  ;;  %2270 = vmatpush1.bf16.msra.mxu0 %v4337_v47  ;;  %v4347_v23 = vld [vmem:[#allocation7 + $0x9c] ss:$24 sps:$4 sm:$0xff]   ;;  %v4350_v33 = vld [vmem:[#allocation7 + $0x98] ss:$24 sps:$4 sm:$0xff]   ;;  %v4353_v40 = vld [vmem:[#allocation7 + $0xcc] ss:$24 sps:$4 sm:$0xff]  }
  0xf8   : > { %v492_v58 = vadd.f32 %v491_v48, %v481_v24  ;;  %v486_v61 = vmul.f32 %v5629_v50, %v5629_v50  ;;  %v461_v1 = vadd.f32 %v460_v53, %v450_v37  ;;  %v5640_v7 = vunpack.c.l.bf16 %v414_v39  ;;  %2399 = vmatpush1.bf16.msra.mxu1 %v4338_v52  ;;  %2271 = vmatprep.subr.bf16.mxu0 %v4339_v57  ;;  %v4351_v37 = vld [vmem:[#allocation7 + $0xc4] ss:$24 sps:$4 sm:$0xff]   ;;  %v4356_v48 = vld [vmem:[#allocation7 + $0xc8] ss:$24 sps:$4 sm:$0xff]   ;;  %v4357_v52 = vld [vmem:[#allocation7 + $0xf4] ss:$24 sps:$4 sm:$0xff]  }
  0xf9   : > { %v496_v2 = vadd.f32 %v484_v55, %v483_v54  ;;  %v5642_v8 = vunpack.c.h.bf16 %v414_v39  ;;  %v487_v13 = vmul.f32 %v445_v51, %v445_v51  ;;  %v5644_v14 = vunpack.c.l.bf16 %v415_v45  ;;  %2400 = vmatprep.subr.bf16.mxu1 %v4341_v63  ;;  %v4359_v53 = vld [vmem:[#allocation7 + $0xfc] ss:$24 sps:$4 sm:$0xff]   ;;  %v4361_v55 = vld [vmem:[#allocation7 + $0xf0] ss:$24 sps:$4 sm:$0xff]   ;;  %s5131_s21 = sshll.u32 %s5224_s30, 4  ;;  %s5132_s21 = int_to_ptr.vmem [resolvable:$false] %s5131_s21 }
  0xfa   : > { %v493_v10 = vadd.f32 %v492_v58, %v482_v35  ;;  %v5646_v15 = vunpack.c.h.bf16 %v415_v45  ;;  %v462_v17 = vadd.f32 %v461_v1, %v451_v49  ;;  %v427_v19 = vunpack.c.l.bf16 %v416_v62  ;;  %v4363_v58 = vld [vmem:[#allocation7 + $0x124] ss:$24 sps:$4 sm:$0xff]   ;;  %v4374_v1 = vld [vmem:[#allocation7 + $0x158] ss:$24 sps:$4 sm:$0xff]   ;;  %s5133_s13 = scalar_lea.vmem %s5132_s21, 512  ;;  %p5134_p0 = scmp.lt.s32.totalorder %s5721_s12, %s5132_s21 }
  0xfb   : > { %v497_v18 = vadd.f32 %v496_v2, %v485_v56  ;;  %v453_v22 = vmul.f32 %v5640_v7, %v5640_v7  ;;  %v428_v24 = vunpack.c.h.bf16 %v416_v62  ;;  %v454_v25 = vmul.f32 %v5642_v8, %v5642_v8  ;;  %2272 = vmatpush1.bf16.msra.mxu0 %v4343_v0  ;;  %v4362_v56 = vld [vmem:[#allocation7 + $0xf8] ss:$24 sps:$4 sm:$0xff]   ;;  %v4369_v62 = vld [vmem:[#allocation7 + $0x154] ss:$24 sps:$4 sm:$0xff]   ;;  %v4375_v2 = vld [vmem:[#allocation7 + $0x184] ss:$24 sps:$4 sm:$0xff]   ;;  %p5135_p5 = scmp.lt.s32.totalorder %s5133_s13, %s5127_s22 }
  0xfc   : > { %494 = vadd.xlane.f32.xlu1 %v493_v10  ;;  %v455_v26 = vmul.f32 %v5644_v14, %v5644_v14  ;;  %v463_v27 = vadd.f32 %v462_v17, %v452_v59  ;;  %v488_v28 = vmul.f32 %v446_v60, %v446_v60  ;;  %v5654_v30 = vmul.f32 %v445_v51, %v427_v19  ;;  %v4365_v59 = vld [vmem:[#allocation7 + $0x12c] ss:$24 sps:$4 sm:$0xff]   ;;  %v4371_v63 = vld [vmem:[#allocation7 + $0x15c] ss:$24 sps:$4 sm:$0xff]   ;;  %v4373_v0 = vld [vmem:[#allocation7 + $0x150] ss:$24 sps:$4 sm:$0xff]  }
  0xfd   : > { %v498_v29 = vadd.f32 %v497_v18, %v486_v61  ;;  %v456_v34 = vmul.f32 %v5646_v15, %v5646_v15  ;;  %v466_v35 = vadd.f32 %v454_v25, %v453_v22  ;;  %v5658_v36 = vmul.f32 %v446_v60, %v428_v24  ;;  %2401 = vmatpush1.bf16.msra.mxu1 %v4344_v9  ;;  %v4367_v60 = vld [vmem:[#allocation7 + $0x120] ss:$24 sps:$4 sm:$0xff]   ;;  %v4377_v9 = vld [vmem:[#allocation7 + $0x18c] ss:$24 sps:$4 sm:$0xff]   ;;  %v4383_v17 = vld [vmem:[#allocation7 + $0x1bc] ss:$24 sps:$4 sm:$0xff]   ;;  %p5136_p7 = por %p5135_p5, %p5134_p0 }
  0xfe   : > { %2273 = vmatprep.subr.bf16.mxu0 %v4345_v16  ;;  %464 = vadd.xlane.f32.xlu0 %v463_v27  ;;  %v457_v41 = vmul.f32 %v427_v19, %v427_v19  ;;  %v458_v49 = vmul.f32 %v428_v24, %v428_v24  ;;  %v4368_v61 = vld [vmem:[#allocation7 + $0x128] ss:$24 sps:$4 sm:$0xff]   ;;  %v4381_v16 = vld [vmem:[#allocation7 + $0x1b4] ss:$24 sps:$4 sm:$0xff]   ;;  %v4386_v19 = vld [vmem:[#allocation7 + $0x1b8] ss:$24 sps:$4 sm:$0xff]  }
  0xff   : > { %v499_v39 = vadd.f32 %v498_v29, %v487_v13  ;;  %2402 = vmatprep.subr.bf16.mxu1 %v4347_v23  ;;  %v467_v45 = vadd.f32 %v466_v35, %v455_v26  ;;  %2274 = vmatpush1.bf16.msra.mxu0 %v4349_v31  ;;  %v4379_v10 = vld [vmem:[#allocation7 + $0x180] ss:$24 sps:$4 sm:$0xff]   ;;  %v4385_v18 = vld [vmem:[#allocation7 + $0x1b0] ss:$24 sps:$4 sm:$0xff]   ;;  %v4387_v22 = vld [vmem:[#allocation7 + $0x1e4] ss:$24 sps:$4 sm:$0xff]   ;;  %v5662_v35 = vmul.f32 %v5581_v4, %v5592_v12  ;;  %p5137_p8 = pnand %p5136_p7, %p5130_p9 }
 0x100   : > { %2275 = vmatprep.subr.bf16.mxu0 %v4351_v37  ;;  %v4380_v13 = vld [vmem:[#allocation7 + $0x188] ss:$24 sps:$4 sm:$0xff]   ;;  %v4389_v23 = vld [vmem:[#allocation7 + $0x1ec] ss:$24 sps:$4 sm:$0xff]   ;;  %v4395_v27 = vld [vmem:[#allocation7 + $0x21c] ss:$24 sps:$4 sm:$0xff]   ;;  %v5666_v37 = vmul.f32 %v5579_v3, %v5590_v11  ;;  %v514_v4 = vmul.f32 %v5624_v43, %v5642_v8  ;;  %v513_v3 = vmul.f32 %v5615_v32, %v5640_v7 }
 0x101   : > { %v500_v47 = vadd.f32 %v499_v39, %v488_v28  ;;  %v468_v51 = vadd.f32 %v467_v45, %v456_v34  ;;  %2403 = vmatpush1.bf16.msra.mxu1 %v4350_v33  ;;  %v4391_v24 = vld [vmem:[#allocation7 + $0x1e0] ss:$24 sps:$4 sm:$0xff]   ;;  %v4393_v26 = vld [vmem:[#allocation7 + $0x214] ss:$24 sps:$4 sm:$0xff]   ;;  %v4397_v28 = vld [vmem:[#allocation7 + $0x210] ss:$24 sps:$4 sm:$0xff]   ;;  %v509_v45 = vmul.f32 %v5583_v5, %v5604_v20  ;;  %v515_v5 = vmul.f32 %v5626_v44, %v5644_v14 }
 0x102   : > { %2404 = vmatprep.subr.bf16.mxu1 %v4353_v40  ;;  %v4392_v25 = vld [vmem:[#allocation7 + $0x1e8] ss:$24 sps:$4 sm:$0xff]   ;;  %v4398_v29 = vld [vmem:[#allocation7 + $0x218] ss:$24 sps:$4 sm:$0xff]   ;;  %v4399_v31 = vld [vmem:[#allocation7 + $0x244] ss:$24 sps:$4 sm:$0xff]  }
 0x103   : > { %501 = vadd.xlane.f32.xlu1 %v500_v47  ;;  %v469_v54 = vadd.f32 %v468_v51, %v457_v41  ;;  %2276 = vmatpush1.bf16.msra.mxu0 %v4355_v46  ;;  %v4401_v33 = vld [vmem:[#allocation7 + $0x24c] ss:$24 sps:$4 sm:$0xff]   ;;  %v4403_v34 = vld [vmem:[#allocation7 + $0x240] ss:$24 sps:$4 sm:$0xff]   ;;  %v510_v41 = vmul.f32 %v5585_v6, %v5606_v21  ;;  %v4407_v46 = vld [vmem:[#allocation7 + $0x27c] ss:$24 sps:$4 sm:$0xff]   ;;  %v516_v6 = vmul.f32 %v5629_v50, %v5646_v15 }
 0x104   : > { %2277 = vmatprep.subr.bf16.mxu0 %v4357_v52  ;;  %v4404_v39 = vld [vmem:[#allocation7 + $0x248] ss:$24 sps:$4 sm:$0xff]   ;;  %v4405_v40 = vld [vmem:[#allocation7 + $0x274] ss:$24 sps:$4 sm:$0xff]   ;;  %v4410_v11 = vld [vmem:[#allocation7 + $0x278] ss:$24 sps:$4 sm:$0xff]  }
 0x105   : > { %v470_v57 = vadd.f32 %v469_v54, %v458_v49  ;;  %2405 = vmatpush1.bf16.msra.mxu1 %v4356_v48  ;;  %v4409_v47 = vld [vmem:[#allocation7 + $0x270] ss:$24 sps:$4 sm:$0xff]   ;;  %v4411_v12 = vld [vmem:[#allocation7 + $0x2a4] ss:$24 sps:$4 sm:$0xff]   ;;  %v4415_v21 = vld [vmem:[#allocation7 + $0x2a0] ss:$24 sps:$4 sm:$0xff]  }
 0x106   : > { %2406 = vmatprep.subr.bf16.mxu1 %v4359_v53  ;;  %v4413_v20 = vld [vmem:[#allocation7 + $0x2ac] ss:$24 sps:$4 sm:$0xff]   ;;  %v4416_v48 = vld [vmem:[#allocation7 + $0x2a8] ss:$24 sps:$4 sm:$0xff]   ;;  %v4419_v43 = vld [vmem:[#allocation7 + $0x2dc] ss:$24 sps:$4 sm:$0xff]  }
 0x107   : > { %471 = vadd.xlane.f32.xlu0 %v470_v57  ;;  %2278 = vmatpush1.bf16.msra.mxu0 %v4361_v55  ;;  %v4417_v49 = vld [vmem:[#allocation7 + $0x2d4] ss:$24 sps:$4 sm:$0xff]   ;;  %v4421_v32 = vld [vmem:[#allocation7 + $0x2d0] ss:$24 sps:$4 sm:$0xff]   ;;  %v4425_v50 = vld [vmem:[#allocation7 + $0x304] ss:$24 sps:$4 sm:$0xff]  }
 0x108   : > { %2279 = vmatprep.subr.bf16.mxu0 %v4363_v58  ;;  %v4422_v7 = vld [vmem:[#allocation7 + $0x2d8] ss:$24 sps:$4 sm:$0xff]   ;;  %v4428_v44 = vld [vmem:[#allocation7 + $0x30c] ss:$24 sps:$4 sm:$0xff]  }
 0x109   : > { %2407 = vmatpush1.bf16.msra.mxu1 %v4362_v56 }
 0x10a   : > { %2408 = vmatprep.subr.bf16.mxu1 %v4365_v59 }
 0x10b   : > { %2280 = vmatpush1.bf16.msra.mxu0 %v4367_v60 }
 0x10c   : > { %2281 = vmatprep.subr.bf16.mxu0 %v4369_v62 }
 0x10d   : > { %2409 = vmatpush1.bf16.msra.mxu1 %v4368_v61 }
 0x10e   : > { %2410 = vmatprep.subr.bf16.mxu1 %v4371_v63 }
 0x10f   : > { %2282 = vmatpush1.bf16.msra.mxu0 %v4373_v0 }
 0x110   : > { %2283 = vmatprep.subr.bf16.mxu0 %v4375_v2 }
 0x111   : > { %2411 = vmatpush1.bf16.msra.mxu1 %v4374_v1 }
 0x112   : > { %2412 = vmatprep.subr.bf16.mxu1 %v4377_v9 }
 0x113   : > { %2284 = vmatpush1.bf16.msra.mxu0 %v4379_v10 }
 0x114   : > { %2285 = vmatprep.subr.bf16.mxu0 %v4381_v16  ;;  %v4426_v16 = vld [vmem:[#allocation7 + $0x308] ss:$24 sps:$4 sm:$0xff]  }
 0x115   : > { %2413 = vmatpush1.bf16.msra.mxu1 %v4380_v13  ;;  %v4423_v13 = vld [vmem:[#allocation7 + $0x300] ss:$24 sps:$4 sm:$0xff]  }
 0x116   : > { %2414 = vmatprep.subr.bf16.mxu1 %v4383_v17 }
 0x117   : > { %2286 = vmatpush1.bf16.msra.mxu0 %v4385_v18 }
 0x118   : > { %2287 = vmatprep.subr.bf16.mxu0 %v4387_v22 }
 0x119   : > { %2415 = vmatpush1.bf16.msra.mxu1 %v4386_v19 }
 0x11a   : > { %2416 = vmatprep.subr.bf16.mxu1 %v4389_v23 }
 0x11b   : > { %2288 = vmatpush1.bf16.msra.mxu0 %v4391_v24 }
 0x11c   : > { %2289 = vmatprep.subr.bf16.mxu0 %v4393_v26 }
 0x11d   : > { %2417 = vmatpush1.bf16.msra.mxu1 %v4392_v25  ;;  %v4431_v25 = vld [vmem:[#allocation7 + $0x334] ss:$24 sps:$4 sm:$0xff]  }
 0x11e   : > { %2418 = vmatprep.subr.bf16.mxu1 %v4395_v27 }
 0x11f   : > { %2290 = vmatpush1.bf16.msra.mxu0 %v4397_v28 }
 0x120   : > { %2291 = vmatprep.subr.bf16.mxu0 %v4399_v31  ;;  %v4437_v31 = vld [vmem:[#allocation7 + $0x364] ss:$24 sps:$4 sm:$0xff]  }
 0x121   : > { %2419 = vmatpush1.bf16.msra.mxu1 %v4398_v29  ;;  %v4434_v29 = vld [vmem:[#allocation7 + $0x33c] ss:$24 sps:$4 sm:$0xff]  }
 0x122   : > { %2420 = vmatprep.subr.bf16.mxu1 %v4401_v33  ;;  %v4440_v33 = vld [vmem:[#allocation7 + $0x36c] ss:$24 sps:$4 sm:$0xff]  }
 0x123   : > { %2292 = vmatpush1.bf16.msra.mxu0 %v4403_v34  ;;  %v4435_v34 = vld [vmem:[#allocation7 + $0x360] ss:$24 sps:$4 sm:$0xff]  }
 0x124   : > { %2293 = vmatprep.subr.bf16.mxu0 %v4405_v40  ;;  %v4441_v40 = vld [vmem:[#allocation7 + $0x390] ss:$24 sps:$4 sm:$0xff]  }
 0x125   : > { %2421 = vmatpush1.bf16.msra.mxu1 %v4404_v39  ;;  %v4446_v39 = vld [vmem:[#allocation7 + $0x39c] ss:$24 sps:$4 sm:$0xff]  }
 0x126   : > { %2422 = vmatprep.subr.bf16.mxu1 %v4407_v46  ;;  %v4452_v46 = vld [vmem:[#allocation7 + $0x3cc] ss:$24 sps:$4 sm:$0xff]  }
 0x127   : > { %2294 = vmatpush1.bf16.msra.mxu0 %v4409_v47  ;;  %v4447_v47 = vld [vmem:[#allocation7 + $0x3c0] ss:$24 sps:$4 sm:$0xff]  }
 0x128   : > { %2295 = vmatprep.subr.bf16.mxu0 %v4411_v12  ;;  %v4453_v12 = vld [vmem:[#allocation7 + $0x3f0] ss:$24 sps:$4 sm:$0xff]  }
 0x129   : > { %2423 = vmatpush1.bf16.msra.mxu1 %v4410_v11  ;;  %v4458_v11 = vld [vmem:[#allocation7 + $0x3fc] ss:$24 sps:$4 sm:$0xff]  }
 0x12a   : > { %2424 = vmatprep.subr.bf16.mxu1 %v4413_v20  ;;  %v4464_v20 = vld [vmem:[#allocation7 + $0x42c] ss:$24 sps:$4 sm:$0xff]  }
 0x12b   : > { %2296 = vmatpush1.bf16.msra.mxu0 %v4415_v21  ;;  %v4459_v21 = vld [vmem:[#allocation7 + $0x420] ss:$24 sps:$4 sm:$0xff]  }
 0x12c   : > { %2297 = vmatprep.subr.bf16.mxu0 %v4417_v49  ;;  %v4467_v49 = vld [vmem:[#allocation7 + $0x454] ss:$24 sps:$4 sm:$0xff]  }
 0x12d   : > { %2425 = vmatpush1.bf16.msra.mxu1 %v4416_v48  ;;  %v4462_v48 = vld [vmem:[#allocation7 + $0x428] ss:$24 sps:$4 sm:$0xff]  }
 0x12e   : > { %2426 = vmatprep.subr.bf16.mxu1 %v4419_v43  ;;  %v4470_v43 = vld [vmem:[#allocation7 + $0x45c] ss:$24 sps:$4 sm:$0xff]  }
 0x12f   : > { %2298 = vmatpush1.bf16.msra.mxu0 %v4421_v32  ;;  %v4465_v32 = vld [vmem:[#allocation7 + $0x450] ss:$24 sps:$4 sm:$0xff]  }
 0x130   : > { %2310 = vmatprep.subr.bf16.mxu0 %v4425_v50  ;;  %v4473_v50 = vld [vmem:[#allocation7 + $0x484] ss:$24 sps:$4 sm:$0xff]  }
 0x131   : > { %2427 = vmatpush1.bf16.msra.mxu1 %v4422_v7  ;;  %v4468_v7 = vld [vmem:[#allocation7 + $0x458] ss:$24 sps:$4 sm:$0xff]  }
 0x132   : > { %2439 = vmatprep.subr.bf16.mxu1 %v4428_v44  ;;  %v4476_v44 = vld [vmem:[#allocation7 + $0x48c] ss:$24 sps:$4 sm:$0xff]  }
 0x189   : > { %v495_v8 = vpop.xlane.xlu1 %494 }
 0x18a   : > { %v503_v14 = vmax.f32 %v495_v8, 1e-24  ;;  %v4471_v8 = vld [vmem:[#allocation7 + $0x480] ss:$24 sps:$4 sm:$0xff]  }
 0x18b   : > { %v465_v15 = vpop.xlane.xlu0 %464 }
 0x18c   : > { %4919 = vrsqrt.f32 %v503_v14  ;;  %v473_v51 = vmax.f32 %v465_v15, 1e-24  ;;  %v4474_v14 = vld [vmem:[#allocation7 + $0x488] ss:$24 sps:$4 sm:$0xff]   ;;  %v4479_v15 = vld [vmem:[#allocation7 + $0x4b4] ss:$24 sps:$4 sm:$0xff]  }
 0x18e   : > { %4921 = vrsqrt.f32 %v473_v51  ;;  %v4482_v51 = vld [vmem:[#allocation7 + $0x4bc] ss:$24 sps:$4 sm:$0xff]  }
 0x190   : > { %v502_v52 = vpop.xlane.xlu1 %501 }
 0x191   : > { %v504_v53 = vmax.f32 %v502_v52, 1e-24  ;;  %v4477_v52 = vld [vmem:[#allocation7 + $0x4b0] ss:$24 sps:$4 sm:$0xff]  }
 0x193   : > { %4923 = vrsqrt.f32 %v504_v53  ;;  %v4480_v53 = vld [vmem:[#allocation7 + $0x4b8] ss:$24 sps:$4 sm:$0xff]  }
 0x194   : > { %v472_v54 = vpop.xlane.xlu0 %471 }
 0x195   : > { %v474_v55 = vmax.f32 %v472_v54, 1e-24  ;;  %v4485_v54 = vld [vmem:[#allocation7 + $0x4e4] ss:$24 sps:$4 sm:$0xff]  }
 0x196   : > { %v4920_v56 = vpop.eup %4919 }
 0x197   : > { %4925 = vrsqrt.f32 %v474_v55  ;;  %v4488_v55 = vld [vmem:[#allocation7 + $0x4ec] ss:$24 sps:$4 sm:$0xff]  }
 0x198   : > { %v4922_v57 = vpop.eup %4921 }
 0x199   : > { %v519_v58 = vmul.f32 %v4922_v57, %v4920_v56  ;;  %v4483_v56 = vld [vmem:[#allocation7 + $0x4e0] ss:$24 sps:$4 sm:$0xff]  }
 0x19a   : > { %v4486_v57 = vld [vmem:[#allocation7 + $0x4e8] ss:$24 sps:$4 sm:$0xff]  }
 0x19b   : > { %v523_v59 = vmul.f32 %v519_v58, %v509_v45  ;;  %v526_v60 = vmul.f32 %v519_v58, %v5622_v42  ;;  %v525_v61 = vmul.f32 %v519_v58, %v5619_v38  ;;  %v522_v1 = vmul.f32 %v519_v58, %v5662_v35  ;;  %v4438_v35 = vld [vmem:[#allocation7 + $0x368] ss:$24 sps:$4 sm:$0xff]   ;;  %v4449_v45 = vld [vmem:[#allocation7 + $0x3c4] ss:$24 sps:$4 sm:$0xff]  }
 0x19c   : > { %v521_v2 = vmul.f32 %v519_v58, %v5666_v37  ;;  %v524_v9 = vmul.f32 %v519_v58, %v510_v41  ;;  %v4443_v37 = vld [vmem:[#allocation7 + $0x394] ss:$24 sps:$4 sm:$0xff]   ;;  %v4444_v41 = vld [vmem:[#allocation7 + $0x398] ss:$24 sps:$4 sm:$0xff]  }
 0x19d   : > { %v4924_v62 = vpop.eup %4923  ;;  %v4491_v58 = vld [vmem:[#allocation7 + $0x514] ss:$24 sps:$4 sm:$0xff]  }
 0x1a1   : > { %v4926_v63 = vpop.eup %4925 }
 0x1a2   : > { %v520_v0 = vmul.f32 %v4926_v63, %v4924_v62  ;;  %v4497_v62 = vld [vmem:[#allocation7 + $0x544] ss:$24 sps:$4 sm:$0xff]  }
 0x1a3   : > { %v4500_v63 = vld [vmem:[#allocation7 + $0x54c] ss:$24 sps:$4 sm:$0xff]  }
 0x1a4   : > { %v528_v10 = vmul.f32 %v520_v0, %v514_v4  ;;  %v527_v17 = vmul.f32 %v520_v0, %v513_v3  ;;  %v530_v18 = vmul.f32 %v520_v0, %v516_v6  ;;  %v529_v19 = vmul.f32 %v520_v0, %v515_v5  ;;  %v4450_v4 = vld [vmem:[#allocation7 + $0x3c8] ss:$24 sps:$4 sm:$0xff]   ;;  %v4455_v3 = vld [vmem:[#allocation7 + $0x3f4] ss:$24 sps:$4 sm:$0xff]   ;;  %v4456_v6 = vld [vmem:[#allocation7 + $0x3f8] ss:$24 sps:$4 sm:$0xff]  }
 0x1a5   : > { %v532_v22 = vmul.f32 %v520_v0, %v5658_v36  ;;  %v531_v42 = vmul.f32 %v520_v0, %v5654_v30  ;;  %v4429_v36 = vld [vmem:[#allocation7 + $0x330] ss:$24 sps:$4 sm:$0xff]   ;;  %v4461_v5 = vld [vmem:[#allocation7 + $0x424] ss:$24 sps:$4 sm:$0xff]   ;;  %v4495_v0 = vld [vmem:[#allocation7 + $0x540] ss:$24 sps:$4 sm:$0xff]  }
 0x1a6   : > { %v5686_v23 = vpack.c.bf16 %v528_v10, %v522_v1  ;;  %v5688_v38 = vpack.c.bf16 %v527_v17, %v521_v2  ;;  %v5690_v24 = vpack.c.bf16 %v530_v18, %v524_v9  ;;  %v5692_v26 = vpack.c.bf16 %v529_v19, %v523_v59  ;;  %v4432_v30 = vld [vmem:[#allocation7 + $0x338] ss:$24 sps:$4 sm:$0xff]   ;;  %v4494_v59 = vld [vmem:[#allocation7 + $0x51c] ss:$24 sps:$4 sm:$0xff]   ;;  %v4498_v1 = vld [vmem:[#allocation7 + $0x548] ss:$24 sps:$4 sm:$0xff]  }
 0x1a7   : > { %v5694_v27 = vpack.c.bf16 %v532_v22, %v526_v60  ;;  %v5696_v28 = vpack.c.bf16 %v531_v42, %v525_v61  ;;  %v4489_v60 = vld [vmem:[#allocation7 + $0x510] ss:$24 sps:$4 sm:$0xff]   ;;  %v4503_v2 = vld [vmem:[#allocation7 + $0x574] ss:$24 sps:$4 sm:$0xff]   ;;  %v4507_v18 = vld [vmem:[#allocation7 + $0x5a0] ss:$24 sps:$4 sm:$0xff]  }
 0x1a8   : > { %2299 = vmatprep.mubr.bf16.mxu0 %v5686_v23  ;;  %2428 = vmatprep.mubr.bf16.mxu1 %v5686_v23  ;;  %v4492_v61 = vld [vmem:[#allocation7 + $0x518] ss:$24 sps:$4 sm:$0xff]   ;;  %v4506_v9 = vld [vmem:[#allocation7 + $0x57c] ss:$24 sps:$4 sm:$0xff]   ;;  %v4512_v17 = vld [vmem:[#allocation7 + $0x5ac] ss:$24 sps:$4 sm:$0xff]  }
 0x1a9   : > { %2300 = vmatmul.mubr.bf16.vlgmr.msra.gmra.mrb[0].mxu0 %v5688_v38  ;;  %2429 = vmatmul.mubr.bf16.vlgmr.msra.gmra.mrb[0].mxu1 %v5688_v38  ;;  %v4501_v10 = vld [vmem:[#allocation7 + $0x570] ss:$24 sps:$4 sm:$0xff]   ;;  %v4515_v22 = vld [vmem:[#allocation7 + $0x5d4] ss:$24 sps:$4 sm:$0xff]  }
 0x1aa   : > { %2311 = vmatpush1.bf16.msra.mxu0 %v4423_v13  ;;  %2440 = vmatpush1.bf16.msra.mxu1 %v4426_v16  ;;  %v4504_v13 = vld [vmem:[#allocation7 + $0x578] ss:$24 sps:$4 sm:$0xff]   ;;  %v4509_v16 = vld [vmem:[#allocation7 + $0x5a4] ss:$24 sps:$4 sm:$0xff]   ;;  %v4510_v19 = vld [vmem:[#allocation7 + $0x5a8] ss:$24 sps:$4 sm:$0xff]  }
 0x1ab   : > { %2342 = vmatprep.mubr.bf16.mxu0 %v5690_v24  ;;  %2471 = vmatprep.mubr.bf16.mxu1 %v5690_v24  ;;  %v4518_v42 = vld [vmem:[#allocation7 + $0x5dc] ss:$24 sps:$4 sm:$0xff]  }
 0x1ac   : > { %2312 = vmatprep.subr.bf16.mxu0 %v4431_v25  ;;  %2441 = vmatprep.subr.bf16.mxu1 %v4434_v29  ;;  %v4513_v25 = vld [vmem:[#allocation7 + $0x5d0] ss:$24 sps:$4 sm:$0xff]   ;;  %v4521_v29 = vld [vmem:[#allocation7 + $0x604] ss:$24 sps:$4 sm:$0xff]  }
 0x1ae   : > { %2313 = vmatpush1.bf16.msra.mxu0 %v4429_v36  ;;  %2442 = vmatpush1.bf16.msra.mxu1 %v4432_v30  ;;  %v4516_v36 = vld [vmem:[#allocation7 + $0x5d8] ss:$24 sps:$4 sm:$0xff]   ;;  %v4524_v30 = vld [vmem:[#allocation7 + $0x60c] ss:$24 sps:$4 sm:$0xff]  }
 0x1af   : > { %2314 = vmatprep.subr.bf16.mxu0 %v4437_v31  ;;  %2443 = vmatprep.subr.bf16.mxu1 %v4440_v33  ;;  %v4519_v31 = vld [vmem:[#allocation7 + $0x600] ss:$24 sps:$4 sm:$0xff]  }
 0x1b0   : > { %v4522_v33 = vld [vmem:[#allocation7 + $0x608] ss:$24 sps:$4 sm:$0xff]  }
 0x1b2   : > { %2315 = vmatpush1.bf16.msra.mxu0 %v4435_v34  ;;  %2444 = vmatpush1.bf16.msra.mxu1 %v4438_v35  ;;  %v4527_v34 = vld [vmem:[#allocation7 + $0x634] ss:$24 sps:$4 sm:$0xff]  }
 0x1b3   : > { %2316 = vmatprep.subr.bf16.mxu0 %v4443_v37  ;;  %2445 = vmatprep.subr.bf16.mxu1 %v4446_v39  ;;  %v4530_v35 = vld [vmem:[#allocation7 + $0x63c] ss:$24 sps:$4 sm:$0xff]   ;;  %v4525_v37 = vld [vmem:[#allocation7 + $0x630] ss:$24 sps:$4 sm:$0xff]  }
 0x1b4   : > { %v4528_v39 = vld [vmem:[#allocation7 + $0x638] ss:$24 sps:$4 sm:$0xff]  }
 0x1b6   : > { %2317 = vmatpush1.bf16.msra.mxu0 %v4441_v40  ;;  %2446 = vmatpush1.bf16.msra.mxu1 %v4444_v41  ;;  %v4533_v40 = vld [vmem:[#allocation7 + $0x664] ss:$24 sps:$4 sm:$0xff]  }
 0x1b7   : > { %2318 = vmatprep.subr.bf16.mxu0 %v4449_v45  ;;  %2447 = vmatprep.subr.bf16.mxu1 %v4452_v46  ;;  %v4536_v41 = vld [vmem:[#allocation7 + $0x66c] ss:$24 sps:$4 sm:$0xff]   ;;  %v4531_v45 = vld [vmem:[#allocation7 + $0x660] ss:$24 sps:$4 sm:$0xff]  }
 0x1b8   : > { %v4534_v46 = vld [vmem:[#allocation7 + $0x668] ss:$24 sps:$4 sm:$0xff]  }
 0x1ba   : > { %2319 = vmatpush1.bf16.msra.mxu0 %v4447_v47  ;;  %2448 = vmatpush1.bf16.msra.mxu1 %v4450_v4  ;;  %v4539_v47 = vld [vmem:[#allocation7 + $0x694] ss:$24 sps:$4 sm:$0xff]  }
 0x1bb   : > { %2320 = vmatprep.subr.bf16.mxu0 %v4455_v3  ;;  %2449 = vmatprep.subr.bf16.mxu1 %v4458_v11  ;;  %v4542_v4 = vld [vmem:[#allocation7 + $0x69c] ss:$24 sps:$4 sm:$0xff]   ;;  %v4537_v3 = vld [vmem:[#allocation7 + $0x690] ss:$24 sps:$4 sm:$0xff]  }
 0x1bc   : > { %v4540_v11 = vld [vmem:[#allocation7 + $0x698] ss:$24 sps:$4 sm:$0xff]  }
 0x1be   : > { %2321 = vmatpush1.bf16.msra.mxu0 %v4453_v12  ;;  %2450 = vmatpush1.bf16.msra.mxu1 %v4456_v6  ;;  %v4545_v12 = vld [vmem:[#allocation7 + $0x6c4] ss:$24 sps:$4 sm:$0xff]  }
 0x1bf   : > { %2322 = vmatprep.subr.bf16.mxu0 %v4461_v5  ;;  %2451 = vmatprep.subr.bf16.mxu1 %v4464_v20  ;;  %v4548_v6 = vld [vmem:[#allocation7 + $0x6cc] ss:$24 sps:$4 sm:$0xff]   ;;  %v4543_v5 = vld [vmem:[#allocation7 + $0x6c0] ss:$24 sps:$4 sm:$0xff]  }
 0x1c0   : > { %v4546_v20 = vld [vmem:[#allocation7 + $0x6c8] ss:$24 sps:$4 sm:$0xff]  }
 0x1c2   : > { %2323 = vmatpush1.bf16.msra.mxu0 %v4459_v21  ;;  %2452 = vmatpush1.bf16.msra.mxu1 %v4462_v48  ;;  %v4551_v21 = vld [vmem:[#allocation7 + $0x6f4] ss:$24 sps:$4 sm:$0xff]  }
 0x1c3   : > { %2324 = vmatprep.subr.bf16.mxu0 %v4467_v49  ;;  %2453 = vmatprep.subr.bf16.mxu1 %v4470_v43  ;;  %v4554_v48 = vld [vmem:[#allocation7 + $0x6fc] ss:$24 sps:$4 sm:$0xff]   ;;  %v4549_v49 = vld [vmem:[#allocation7 + $0x6f0] ss:$24 sps:$4 sm:$0xff]  }
 0x1c4   : > { %v4552_v43 = vld [vmem:[#allocation7 + $0x6f8] ss:$24 sps:$4 sm:$0xff]  }
 0x1c6   : > { %2325 = vmatpush1.bf16.msra.mxu0 %v4465_v32  ;;  %2454 = vmatpush1.bf16.msra.mxu1 %v4468_v7  ;;  %v4557_v32 = vld [vmem:[#allocation7 + $0x724] ss:$24 sps:$4 sm:$0xff]  }
 0x1c7   : > { %2326 = vmatprep.subr.bf16.mxu0 %v4473_v50  ;;  %2455 = vmatprep.subr.bf16.mxu1 %v4476_v44  ;;  %v4560_v7 = vld [vmem:[#allocation7 + $0x72c] ss:$24 sps:$4 sm:$0xff]   ;;  %v4555_v50 = vld [vmem:[#allocation7 + $0x720] ss:$24 sps:$4 sm:$0xff]  }
 0x1c8   : > { %v4558_v44 = vld [vmem:[#allocation7 + $0x728] ss:$24 sps:$4 sm:$0xff]  }
 0x1ca   : > { %2327 = vmatpush1.bf16.msra.mxu0 %v4471_v8  ;;  %2456 = vmatpush1.bf16.msra.mxu1 %v4474_v14  ;;  %v4563_v8 = vld [vmem:[#allocation7 + $0x754] ss:$24 sps:$4 sm:$0xff]  }
 0x1cb   : > { %2328 = vmatprep.subr.bf16.mxu0 %v4479_v15  ;;  %2457 = vmatprep.subr.bf16.mxu1 %v4482_v51  ;;  %v4566_v14 = vld [vmem:[#allocation7 + $0x75c] ss:$24 sps:$4 sm:$0xff]   ;;  %v4561_v15 = vld [vmem:[#allocation7 + $0x750] ss:$24 sps:$4 sm:$0xff]  }
 0x1cc   : > { %v4564_v51 = vld [vmem:[#allocation7 + $0x758] ss:$24 sps:$4 sm:$0xff]  }
 0x1ce   : > { %2329 = vmatpush1.bf16.msra.mxu0 %v4477_v52  ;;  %2458 = vmatpush1.bf16.msra.mxu1 %v4480_v53  ;;  %v4569_v52 = vld [vmem:[#allocation7 + $0x784] ss:$24 sps:$4 sm:$0xff]  }
 0x1cf   : > { %2330 = vmatprep.subr.bf16.mxu0 %v4485_v54  ;;  %2459 = vmatprep.subr.bf16.mxu1 %v4488_v55  ;;  %v4572_v53 = vld [vmem:[#allocation7 + $0x78c] ss:$24 sps:$4 sm:$0xff]   ;;  %v4567_v54 = vld [vmem:[#allocation7 + $0x780] ss:$24 sps:$4 sm:$0xff]  }
 0x1d0   : > { %v4570_v55 = vld [vmem:[#allocation7 + $0x788] ss:$24 sps:$4 sm:$0xff]  }
 0x1d2   : > { %2331 = vmatpush1.bf16.msra.mxu0 %v4483_v56  ;;  %2460 = vmatpush1.bf16.msra.mxu1 %v4486_v57  ;;  %v4575_v56 = vld [vmem:[#allocation7 + $0x7b4] ss:$24 sps:$4 sm:$0xff]  }
 0x1d3   : > { %2332 = vmatprep.subr.bf16.mxu0 %v4491_v58  ;;  %2461 = vmatprep.subr.bf16.mxu1 %v4494_v59  ;;  %v4578_v57 = vld [vmem:[#allocation7 + $0x7bc] ss:$24 sps:$4 sm:$0xff]   ;;  %v4573_v58 = vld [vmem:[#allocation7 + $0x7b0] ss:$24 sps:$4 sm:$0xff]  }
 0x1d4   : > { %v4576_v59 = vld [vmem:[#allocation7 + $0x7b8] ss:$24 sps:$4 sm:$0xff]  }
 0x1d6   : > { %2333 = vmatpush1.bf16.msra.mxu0 %v4489_v60  ;;  %2462 = vmatpush1.bf16.msra.mxu1 %v4492_v61  ;;  %v4581_v60 = vld [vmem:[#allocation7 + $0x7e4] ss:$24 sps:$4 sm:$0xff]  }
 0x1d7   : > { %2334 = vmatprep.subr.bf16.mxu0 %v4497_v62  ;;  %2463 = vmatprep.subr.bf16.mxu1 %v4500_v63  ;;  %v4584_v61 = vld [vmem:[#allocation7 + $0x7ec] ss:$24 sps:$4 sm:$0xff]   ;;  %v4579_v62 = vld [vmem:[#allocation7 + $0x7e0] ss:$24 sps:$4 sm:$0xff]  }
 0x1d8   : > { %v4582_v63 = vld [vmem:[#allocation7 + $0x7e8] ss:$24 sps:$4 sm:$0xff]  }
 0x1da   : > { %2335 = vmatpush1.bf16.msra.mxu0 %v4495_v0  ;;  %2464 = vmatpush1.bf16.msra.mxu1 %v4498_v1  ;;  %v4587_v0 = vld [vmem:[#allocation7 + $0x814] ss:$24 sps:$4 sm:$0xff]  }
 0x1db   : > { %2336 = vmatprep.subr.bf16.mxu0 %v4503_v2  ;;  %2465 = vmatprep.subr.bf16.mxu1 %v4506_v9  ;;  %v4590_v1 = vld [vmem:[#allocation7 + $0x81c] ss:$24 sps:$4 sm:$0xff]   ;;  %v4585_v2 = vld [vmem:[#allocation7 + $0x810] ss:$24 sps:$4 sm:$0xff]  }
 0x1dc   : > { %v4588_v9 = vld [vmem:[#allocation7 + $0x818] ss:$24 sps:$4 sm:$0xff]  }
 0x1de   : > { %2337 = vmatpush1.bf16.msra.mxu0 %v4501_v10  ;;  %2466 = vmatpush1.bf16.msra.mxu1 %v4504_v13  ;;  %v4593_v10 = vld [vmem:[#allocation7 + $0x844] ss:$24 sps:$4 sm:$0xff]  }
 0x1df   : > { %2338 = vmatprep.subr.bf16.mxu0 %v4509_v16  ;;  %2467 = vmatprep.subr.bf16.mxu1 %v4512_v17  ;;  %v4596_v13 = vld [vmem:[#allocation7 + $0x84c] ss:$24 sps:$4 sm:$0xff]   ;;  %v4591_v16 = vld [vmem:[#allocation7 + $0x840] ss:$24 sps:$4 sm:$0xff]  }
 0x1e0   : > { %v4594_v17 = vld [vmem:[#allocation7 + $0x848] ss:$24 sps:$4 sm:$0xff]  }
 0x1e2   : > { %2339 = vmatpush1.bf16.msra.mxu0 %v4507_v18  ;;  %2468 = vmatpush1.bf16.msra.mxu1 %v4510_v19  ;;  %v4599_v18 = vld [vmem:[#allocation7 + $0x874] ss:$24 sps:$4 sm:$0xff]  }
 0x1e3   : > { %2340 = vmatprep.subr.bf16.mxu0 %v4515_v22  ;;  %2469 = vmatprep.subr.bf16.mxu1 %v4518_v42  ;;  %v4602_v19 = vld [vmem:[#allocation7 + $0x87c] ss:$24 sps:$4 sm:$0xff]   ;;  %v4597_v22 = vld [vmem:[#allocation7 + $0x870] ss:$24 sps:$4 sm:$0xff]  }
 0x1e4   : > { %v4600_v42 = vld [vmem:[#allocation7 + $0x878] ss:$24 sps:$4 sm:$0xff]  }
 0x1e6   : > { %2341 = vmatpush1.bf16.msra.mxu0 %v4513_v25  ;;  %2470 = vmatpush1.bf16.msra.mxu1 %v4516_v36  ;;  %v4605_v25 = vld [vmem:[#allocation7 + $0x8a4] ss:$24 sps:$4 sm:$0xff]  }
 0x1e7   : > { %2353 = vmatprep.subr.bf16.mxu0 %v4521_v29  ;;  %2482 = vmatprep.subr.bf16.mxu1 %v4524_v30  ;;  %v4608_v36 = vld [vmem:[#allocation7 + $0x8ac] ss:$24 sps:$4 sm:$0xff]   ;;  %v4603_v29 = vld [vmem:[#allocation7 + $0x8a0] ss:$24 sps:$4 sm:$0xff]  }
 0x1e8   : > { %v4606_v30 = vld [vmem:[#allocation7 + $0x8a8] ss:$24 sps:$4 sm:$0xff]  }
 0x1e9   : > { %2343 = vmatmul.mubr.bf16.vlgmr.msra.gmra.mrb[0].mxu0 %v5692_v26  ;;  %2472 = vmatmul.mubr.bf16.vlgmr.msra.gmra.mrb[0].mxu1 %v5692_v26 }
 0x1ea   : > { %2354 = vmatpush1.bf16.msra.mxu0 %v4519_v31  ;;  %2385 = vmatprep.mubr.bf16.mxu0 %v5694_v27  ;;  %v4611_v31 = vld [vmem:[#allocation7 + $0x8d4] ss:$24 sps:$4 sm:$0xff]  }
 0x1eb   : > { %2483 = vmatpush1.bf16.msra.mxu1 %v4522_v33  ;;  %2514 = vmatprep.mubr.bf16.mxu1 %v5694_v27  ;;  %v4614_v33 = vld [vmem:[#allocation7 + $0x8dc] ss:$24 sps:$4 sm:$0xff]  }
 0x1ec   : > { %2355 = vmatprep.subr.bf16.mxu0 %v4527_v34  ;;  %2484 = vmatprep.subr.bf16.mxu1 %v4530_v35  ;;  %v4609_v34 = vld [vmem:[#allocation7 + $0x8d0] ss:$24 sps:$4 sm:$0xff]  }
 0x1ed   : > { %v4612_v35 = vld [vmem:[#allocation7 + $0x8d8] ss:$24 sps:$4 sm:$0xff]  }
 0x1ee   : > { %2356 = vmatpush1.bf16.msra.mxu0 %v4525_v37  ;;  %v4617_v37 = vld [vmem:[#allocation7 + $0x14] ss:$24 sps:$4 sm:$0xff]  }
 0x1ef   : > { %2485 = vmatpush1.bf16.msra.mxu1 %v4528_v39  ;;  %2357 = vmatprep.subr.bf16.mxu0 %v4533_v40  ;;  %v4615_v39 = vld [vmem:[#allocation7 + $0x10] ss:$24 sps:$4 sm:$0xff]   ;;  %v4620_v40 = vld [vmem:[#allocation7 + $0x44] ss:$24 sps:$4 sm:$0xff]  }
 0x1f0   : > { %2486 = vmatprep.subr.bf16.mxu1 %v4536_v41  ;;  %v4618_v41 = vld [vmem:[#allocation7 + $0x40] ss:$24 sps:$4 sm:$0xff]  }
 0x1f2   : > { %2358 = vmatpush1.bf16.msra.mxu0 %v4531_v45  ;;  %v4623_v45 = vld [vmem:[#allocation7 + $0x74] ss:$24 sps:$4 sm:$0xff]  }
 0x1f3   : > { %2487 = vmatpush1.bf16.msra.mxu1 %v4534_v46  ;;  %2359 = vmatprep.subr.bf16.mxu0 %v4539_v47  ;;  %v4621_v46 = vld [vmem:[#allocation7 + $0x70] ss:$24 sps:$4 sm:$0xff]   ;;  %v4626_v47 = vld [vmem:[#allocation7 + $0xa4] ss:$24 sps:$4 sm:$0xff]  }
 0x1f4   : > { %2488 = vmatprep.subr.bf16.mxu1 %v4542_v4  ;;  %v4624_v4 = vld [vmem:[#allocation7 + $0xa0] ss:$24 sps:$4 sm:$0xff]  }
 0x1f6   : > { %2360 = vmatpush1.bf16.msra.mxu0 %v4537_v3  ;;  %v4629_v3 = vld [vmem:[#allocation7 + $0xd4] ss:$24 sps:$4 sm:$0xff]  }
 0x1f7   : > { %2489 = vmatpush1.bf16.msra.mxu1 %v4540_v11  ;;  %2361 = vmatprep.subr.bf16.mxu0 %v4545_v12  ;;  %v4627_v11 = vld [vmem:[#allocation7 + $0xd0] ss:$24 sps:$4 sm:$0xff]   ;;  %v4632_v12 = vld [vmem:[#allocation7 + $0x104] ss:$24 sps:$4 sm:$0xff]  }
 0x1f8   : > { %2490 = vmatprep.subr.bf16.mxu1 %v4548_v6  ;;  %v4630_v6 = vld [vmem:[#allocation7 + $0x100] ss:$24 sps:$4 sm:$0xff]  }
 0x1fa   : > { %2362 = vmatpush1.bf16.msra.mxu0 %v4543_v5  ;;  %v4635_v5 = vld [vmem:[#allocation7 + $0x134] ss:$24 sps:$4 sm:$0xff]  }
 0x1fb   : > { %2491 = vmatpush1.bf16.msra.mxu1 %v4546_v20  ;;  %2363 = vmatprep.subr.bf16.mxu0 %v4551_v21  ;;  %v4638_v20 = vld [vmem:[#allocation7 + $0x164] ss:$24 sps:$4 sm:$0xff]   ;;  %v4636_v21 = vld [vmem:[#allocation7 + $0x160] ss:$24 sps:$4 sm:$0xff]  }
 0x1fc   : > { %2492 = vmatprep.subr.bf16.mxu1 %v4554_v48  ;;  %v4732_v48 = vld [vmem:[#allocation8] ss:$8 sps:$4 sm:$0xff]  }
 0x1fe   : > { %2364 = vmatpush1.bf16.msra.mxu0 %v4549_v49  ;;  %v4734_v49 = vld [vmem:[#allocation8 + $0x4] ss:$8 sps:$4 sm:$0xff]  }
 0x1ff   : > { %2493 = vmatpush1.bf16.msra.mxu1 %v4552_v43  ;;  %2365 = vmatprep.subr.bf16.mxu0 %v4557_v32  ;;  %v4641_v43 = vld [vmem:[#allocation7 + $0x194] ss:$24 sps:$4 sm:$0xff]   ;;  %v4639_v32 = vld [vmem:[#allocation7 + $0x190] ss:$24 sps:$4 sm:$0xff]  }
 0x200   : > { %2494 = vmatprep.subr.bf16.mxu1 %v4560_v7  ;;  %v4738_v7 = vld [vmem:[#allocation8 + $0x10] ss:$8 sps:$4 sm:$0xff]  }
 0x202   : > { %2366 = vmatpush1.bf16.msra.mxu0 %v4555_v50  ;;  %v4740_v50 = vld [vmem:[#allocation8 + $0x14] ss:$8 sps:$4 sm:$0xff]  }
 0x203   : > { %2495 = vmatpush1.bf16.msra.mxu1 %v4558_v44  ;;  %2367 = vmatprep.subr.bf16.mxu0 %v4563_v8  ;;  %v4644_v44 = vld [vmem:[#allocation7 + $0x1c4] ss:$24 sps:$4 sm:$0xff]   ;;  %v4642_v8 = vld [vmem:[#allocation7 + $0x1c0] ss:$24 sps:$4 sm:$0xff]  }
 0x204   : > { %2496 = vmatprep.subr.bf16.mxu1 %v4566_v14  ;;  %v4744_v14 = vld [vmem:[#allocation8 + $0x20] ss:$8 sps:$4 sm:$0xff]  }
 0x206   : > { %2368 = vmatpush1.bf16.msra.mxu0 %v4561_v15  ;;  %v4746_v15 = vld [vmem:[#allocation8 + $0x24] ss:$8 sps:$4 sm:$0xff]  }
 0x207   : > { %2497 = vmatpush1.bf16.msra.mxu1 %v4564_v51  ;;  %2369 = vmatprep.subr.bf16.mxu0 %v4569_v52  ;;  %v4647_v51 = vld [vmem:[#allocation7 + $0x1f4] ss:$24 sps:$4 sm:$0xff]   ;;  %v4645_v52 = vld [vmem:[#allocation7 + $0x1f0] ss:$24 sps:$4 sm:$0xff]  }
 0x208   : > { %2498 = vmatprep.subr.bf16.mxu1 %v4572_v53  ;;  %v4750_v53 = vld [vmem:[#allocation8 + $0x30] ss:$8 sps:$4 sm:$0xff]  }
 0x20a   : > { %2370 = vmatpush1.bf16.msra.mxu0 %v4567_v54  ;;  %v4752_v54 = vld [vmem:[#allocation8 + $0x34] ss:$8 sps:$4 sm:$0xff]  }
 0x20b   : > { %2499 = vmatpush1.bf16.msra.mxu1 %v4570_v55  ;;  %2371 = vmatprep.subr.bf16.mxu0 %v4575_v56  ;;  %v4650_v55 = vld [vmem:[#allocation7 + $0x224] ss:$24 sps:$4 sm:$0xff]   ;;  %v4648_v56 = vld [vmem:[#allocation7 + $0x220] ss:$24 sps:$4 sm:$0xff]  }
 0x20c   : > { %2500 = vmatprep.subr.bf16.mxu1 %v4578_v57  ;;  %v4756_v57 = vld [vmem:[#allocation8 + $0x40] ss:$8 sps:$4 sm:$0xff]  }
 0x20e   : > { %2372 = vmatpush1.bf16.msra.mxu0 %v4573_v58  ;;  %v4758_v58 = vld [vmem:[#allocation8 + $0x44] ss:$8 sps:$4 sm:$0xff]  }
 0x20f   : > { %2501 = vmatpush1.bf16.msra.mxu1 %v4576_v59  ;;  %2373 = vmatprep.subr.bf16.mxu0 %v4581_v60  ;;  %v4653_v59 = vld [vmem:[#allocation7 + $0x254] ss:$24 sps:$4 sm:$0xff]   ;;  %v4651_v60 = vld [vmem:[#allocation7 + $0x250] ss:$24 sps:$4 sm:$0xff]  }
 0x210   : > { %2502 = vmatprep.subr.bf16.mxu1 %v4584_v61  ;;  %v4762_v61 = vld [vmem:[#allocation8 + $0x50] ss:$8 sps:$4 sm:$0xff]  }
 0x212   : > { %2374 = vmatpush1.bf16.msra.mxu0 %v4579_v62  ;;  %v4764_v62 = vld [vmem:[#allocation8 + $0x54] ss:$8 sps:$4 sm:$0xff]  }
 0x213   : > { %2503 = vmatpush1.bf16.msra.mxu1 %v4582_v63  ;;  %2375 = vmatprep.subr.bf16.mxu0 %v4587_v0  ;;  %v4656_v63 = vld [vmem:[#allocation7 + $0x284] ss:$24 sps:$4 sm:$0xff]   ;;  %v4654_v0 = vld [vmem:[#allocation7 + $0x280] ss:$24 sps:$4 sm:$0xff]  }
 0x214   : > { %2504 = vmatprep.subr.bf16.mxu1 %v4590_v1  ;;  %v4768_v1 = vld [vmem:[#allocation8 + $0x60] ss:$8 sps:$4 sm:$0xff]  }
 0x216   : > { %2376 = vmatpush1.bf16.msra.mxu0 %v4585_v2  ;;  %v4770_v2 = vld [vmem:[#allocation8 + $0x64] ss:$8 sps:$4 sm:$0xff]  }
 0x217   : > { %2505 = vmatpush1.bf16.msra.mxu1 %v4588_v9  ;;  %2377 = vmatprep.subr.bf16.mxu0 %v4593_v10  ;;  %v4659_v9 = vld [vmem:[#allocation7 + $0x2b4] ss:$24 sps:$4 sm:$0xff]   ;;  %v4657_v10 = vld [vmem:[#allocation7 + $0x2b0] ss:$24 sps:$4 sm:$0xff]  }
 0x218   : > { %2506 = vmatprep.subr.bf16.mxu1 %v4596_v13  ;;  %v4774_v13 = vld [vmem:[#allocation8 + $0x70] ss:$8 sps:$4 sm:$0xff]  }
 0x21a   : > { %2378 = vmatpush1.bf16.msra.mxu0 %v4591_v16  ;;  %v4776_v16 = vld [vmem:[#allocation8 + $0x74] ss:$8 sps:$4 sm:$0xff]  }
 0x21b   : > { %2507 = vmatpush1.bf16.msra.mxu1 %v4594_v17  ;;  %2379 = vmatprep.subr.bf16.mxu0 %v4599_v18  ;;  %v4662_v17 = vld [vmem:[#allocation7 + $0x2e4] ss:$24 sps:$4 sm:$0xff]   ;;  %v4660_v18 = vld [vmem:[#allocation7 + $0x2e0] ss:$24 sps:$4 sm:$0xff]  }
 0x21c   : > { %2508 = vmatprep.subr.bf16.mxu1 %v4602_v19  ;;  %v4780_v19 = vld [vmem:[#allocation8 + $0x80] ss:$8 sps:$4 sm:$0xff]  }
 0x21e   : > { %2380 = vmatpush1.bf16.msra.mxu0 %v4597_v22  ;;  %v4782_v22 = vld [vmem:[#allocation8 + $0x84] ss:$8 sps:$4 sm:$0xff]  }
 0x21f   : > { %2509 = vmatpush1.bf16.msra.mxu1 %v4600_v42  ;;  %2381 = vmatprep.subr.bf16.mxu0 %v4605_v25  ;;  %v4665_v42 = vld [vmem:[#allocation7 + $0x314] ss:$24 sps:$4 sm:$0xff]   ;;  %v4663_v25 = vld [vmem:[#allocation7 + $0x310] ss:$24 sps:$4 sm:$0xff]  }
 0x220   : > { %2510 = vmatprep.subr.bf16.mxu1 %v4608_v36  ;;  %v4786_v36 = vld [vmem:[#allocation8 + $0x90] ss:$8 sps:$4 sm:$0xff]  }
 0x222   : > { %2382 = vmatpush1.bf16.msra.mxu0 %v4603_v29  ;;  %v4788_v29 = vld [vmem:[#allocation8 + $0x94] ss:$8 sps:$4 sm:$0xff]  }
 0x223   : > { %2511 = vmatpush1.bf16.msra.mxu1 %v4606_v30  ;;  %2383 = vmatprep.subr.bf16.mxu0 %v4611_v31  ;;  %v4668_v30 = vld [vmem:[#allocation7 + $0x344] ss:$24 sps:$4 sm:$0xff]   ;;  %v4789_v31 = vld [vmem:[#allocation8 + $0xa0] ss:$8 sps:$4 sm:$0xff]  }
 0x224   : > { %2512 = vmatprep.subr.bf16.mxu1 %v4614_v33  ;;  %v4791_v33 = vld [vmem:[#allocation8 + $0xa4] ss:$8 sps:$4 sm:$0xff]  }
 0x226   : > { %2384 = vmatpush1.bf16.msra.mxu0 %v4609_v34  ;;  %v4666_v34 = vld [vmem:[#allocation7 + $0x340] ss:$24 sps:$4 sm:$0xff]  }
 0x227   : > { %2513 = vmatpush1.bf16.msra.mxu1 %v4612_v35  ;;  %2525 = vmatprep.subr.bf16.mxu0 %v4617_v37  ;;  %v4794_v35 = vld [vmem:[#allocation8 + $0xb4] ss:$8 sps:$4 sm:$0xff]  }
 0x228   : > { %3260 = vmatprep.subr.bf16.mxu1 %v4734_v49  ;;  %v4671_v37 = vld [vmem:[#allocation7 + $0x374] ss:$24 sps:$4 sm:$0xff]   ;;  %v4804_v49 = vld [vmem:[#allocation8 + $0xf0] ss:$8 sps:$4 sm:$0xff]  }
 0x229   : > { %2386 = vmatmul.mubr.bf16.vlgmr.msra.gmra.mrb[0].mxu0 %v5696_v28 }
 0x22a   : > { %2515 = vmatmul.mubr.bf16.vlgmr.msra.gmra.mrb[0].mxu1 %v5696_v28  ;;  %2526 = vmatpush1.bf16.msra.mxu0 %v4615_v39  ;;  %v4792_v39 = vld [vmem:[#allocation8 + $0xb0] ss:$8 sps:$4 sm:$0xff]  }
 0x22b   : > { %2557 = vmatprep.mubr.bf16.mxu0 %v5686_v23  ;;  %2527 = vmatprep.subr.bf16.mxu0 %v4620_v40  ;;  %v4633_v23 = vld [vmem:[#allocation7 + $0x130] ss:$24 sps:$4 sm:$0xff]  }
 0x22c   : > { %3261 = vmatpush1.bf16.msra.mxu1 %v4732_v48  ;;  %v4669_v40 = vld [vmem:[#allocation7 + $0x370] ss:$24 sps:$4 sm:$0xff]   ;;  %v4806_v48 = vld [vmem:[#allocation8 + $0xf4] ss:$8 sps:$4 sm:$0xff]  }
 0x22d   : > { %3262 = vmatprep.subr.bf16.mxu1 %v4740_v50  ;;  %v4687_v50 = vld [vmem:[#allocation7 + $0x490] ss:$24 sps:$4 sm:$0xff]  }
 0x22e   : > { %2528 = vmatpush1.bf16.msra.mxu0 %v4618_v41  ;;  %v4797_v41 = vld [vmem:[#allocation8 + $0xc4] ss:$8 sps:$4 sm:$0xff]  }
 0x22f   : > { %2529 = vmatprep.subr.bf16.mxu0 %v4623_v45  ;;  %v4674_v45 = vld [vmem:[#allocation7 + $0x3a4] ss:$24 sps:$4 sm:$0xff]  }
 0x230   : > { %3263 = vmatpush1.bf16.msra.mxu1 %v4738_v7  ;;  %v4809_v7 = vld [vmem:[#allocation8 + $0x104] ss:$8 sps:$4 sm:$0xff]  }
 0x231   : > { %3264 = vmatprep.subr.bf16.mxu1 %v4746_v15  ;;  %v4693_v15 = vld [vmem:[#allocation7 + $0x4f0] ss:$24 sps:$4 sm:$0xff]  }
 0x232   : > { %2530 = vmatpush1.bf16.msra.mxu0 %v4621_v46  ;;  %v4672_v46 = vld [vmem:[#allocation7 + $0x3a0] ss:$24 sps:$4 sm:$0xff]  }
 0x233   : > { %2531 = vmatprep.subr.bf16.mxu0 %v4626_v47  ;;  %v4800_v47 = vld [vmem:[#allocation8 + $0xd4] ss:$8 sps:$4 sm:$0xff]  }
 0x234   : > { %3265 = vmatpush1.bf16.msra.mxu1 %v4744_v14  ;;  %v4695_v14 = vld [vmem:[#allocation7 + $0x4f4] ss:$24 sps:$4 sm:$0xff]  }
 0x235   : > { %3266 = vmatprep.subr.bf16.mxu1 %v4752_v54  ;;  %v4699_v54 = vld [vmem:[#allocation7 + $0x550] ss:$24 sps:$4 sm:$0xff]  }
 0x236   : > { %2532 = vmatpush1.bf16.msra.mxu0 %v4624_v4  ;;  %v4798_v4 = vld [vmem:[#allocation8 + $0xd0] ss:$8 sps:$4 sm:$0xff]  }
 0x237   : > { %2533 = vmatprep.subr.bf16.mxu0 %v4629_v3  ;;  %v4675_v3 = vld [vmem:[#allocation7 + $0x3d0] ss:$24 sps:$4 sm:$0xff]  }
 0x238   : > { %3267 = vmatpush1.bf16.msra.mxu1 %v4750_v53  ;;  %v4701_v53 = vld [vmem:[#allocation7 + $0x554] ss:$24 sps:$4 sm:$0xff]  }
 0x239   : > { %3268 = vmatprep.subr.bf16.mxu1 %v4758_v58  ;;  %v4705_v58 = vld [vmem:[#allocation7 + $0x5b0] ss:$24 sps:$4 sm:$0xff]  }
 0x23a   : > { %2534 = vmatpush1.bf16.msra.mxu0 %v4627_v11  ;;  %v4680_v11 = vld [vmem:[#allocation7 + $0x404] ss:$24 sps:$4 sm:$0xff]  }
 0x23b   : > { %2535 = vmatprep.subr.bf16.mxu0 %v4632_v12  ;;  %v4678_v12 = vld [vmem:[#allocation7 + $0x400] ss:$24 sps:$4 sm:$0xff]  }
 0x23c   : > { %3269 = vmatpush1.bf16.msra.mxu1 %v4756_v57  ;;  %v4707_v57 = vld [vmem:[#allocation7 + $0x5b4] ss:$24 sps:$4 sm:$0xff]  }
 0x23d   : > { %3270 = vmatprep.subr.bf16.mxu1 %v4764_v62  ;;  %v4711_v62 = vld [vmem:[#allocation7 + $0x610] ss:$24 sps:$4 sm:$0xff]  }
 0x23e   : > { %2536 = vmatpush1.bf16.msra.mxu0 %v4630_v6  ;;  %v4683_v6 = vld [vmem:[#allocation7 + $0x434] ss:$24 sps:$4 sm:$0xff]  }
 0x23f   : > { %2537 = vmatprep.subr.bf16.mxu0 %v4635_v5  ;;  %v4803_v5 = vld [vmem:[#allocation8 + $0xe4] ss:$8 sps:$4 sm:$0xff]  }
 0x240   : > { %3271 = vmatpush1.bf16.msra.mxu1 %v4762_v61  ;;  %v4713_v61 = vld [vmem:[#allocation7 + $0x614] ss:$24 sps:$4 sm:$0xff]  }
 0x241   : > { %3272 = vmatprep.subr.bf16.mxu1 %v4770_v2  ;;  %v4717_v2 = vld [vmem:[#allocation7 + $0x670] ss:$24 sps:$4 sm:$0xff]  }
 0x242   : > { %2538 = vmatpush1.bf16.msra.mxu0 %v4633_v23  ;;  %v4801_v23 = vld [vmem:[#allocation8 + $0xe0] ss:$8 sps:$4 sm:$0xff]  }
 0x243   : > { %2539 = vmatprep.subr.bf16.mxu0 %v4638_v20  ;;  %v4681_v20 = vld [vmem:[#allocation7 + $0x430] ss:$24 sps:$4 sm:$0xff]  }
 0x244   : > { %3273 = vmatpush1.bf16.msra.mxu1 %v4768_v1  ;;  %v4719_v1 = vld [vmem:[#allocation7 + $0x674] ss:$24 sps:$4 sm:$0xff]  }
 0x245   : > { %3274 = vmatprep.subr.bf16.mxu1 %v4776_v16  ;;  %v4723_v16 = vld [vmem:[#allocation7 + $0x6d0] ss:$24 sps:$4 sm:$0xff]  }
 0x246   : > { %2540 = vmatpush1.bf16.msra.mxu0 %v4636_v21  ;;  %v4686_v21 = vld [vmem:[#allocation7 + $0x464] ss:$24 sps:$4 sm:$0xff]  }
 0x247   : > { %2541 = vmatprep.subr.bf16.mxu0 %v4641_v43  ;;  %v4684_v43 = vld [vmem:[#allocation7 + $0x460] ss:$24 sps:$4 sm:$0xff]  }
 0x248   : > { %3275 = vmatpush1.bf16.msra.mxu1 %v4774_v13  ;;  %v4725_v13 = vld [vmem:[#allocation7 + $0x6d4] ss:$24 sps:$4 sm:$0xff]  }
 0x249   : > { %3276 = vmatprep.subr.bf16.mxu1 %v4782_v22  ;;  %v4735_v22 = vld [vmem:[#allocation7 + $0x760] ss:$24 sps:$4 sm:$0xff]  }
 0x24a   : > { %2542 = vmatpush1.bf16.msra.mxu0 %v4639_v32  ;;  %v4689_v32 = vld [vmem:[#allocation7 + $0x494] ss:$24 sps:$4 sm:$0xff]  }
 0x24b   : > { %2543 = vmatprep.subr.bf16.mxu0 %v4644_v44  ;;  %v4692_v44 = vld [vmem:[#allocation7 + $0x4c4] ss:$24 sps:$4 sm:$0xff]  }
 0x24c   : > { %3277 = vmatpush1.bf16.msra.mxu1 %v4780_v19  ;;  %v4737_v19 = vld [vmem:[#allocation7 + $0x764] ss:$24 sps:$4 sm:$0xff]  }
 0x24d   : > { %3278 = vmatprep.subr.bf16.mxu1 %v4788_v29  ;;  %v4747_v29 = vld [vmem:[#allocation7 + $0x7c0] ss:$24 sps:$4 sm:$0xff]  }
 0x24e   : > { %2544 = vmatpush1.bf16.msra.mxu0 %v4642_v8  ;;  %v4690_v8 = vld [vmem:[#allocation7 + $0x4c0] ss:$24 sps:$4 sm:$0xff]  }
 0x24f   : > { %2545 = vmatprep.subr.bf16.mxu0 %v4647_v51  ;;  %v4698_v51 = vld [vmem:[#allocation7 + $0x524] ss:$24 sps:$4 sm:$0xff]  }
 0x250   : > { %3279 = vmatpush1.bf16.msra.mxu1 %v4786_v36  ;;  %v4749_v36 = vld [vmem:[#allocation7 + $0x7c4] ss:$24 sps:$4 sm:$0xff]  }
 0x251   : > { %3280 = vmatprep.subr.bf16.mxu1 %v4791_v33  ;;  %v4761_v33 = vld [vmem:[#allocation7 + $0x824] ss:$24 sps:$4 sm:$0xff]  }
 0x252   : > { %2546 = vmatpush1.bf16.msra.mxu0 %v4645_v52  ;;  %v4696_v52 = vld [vmem:[#allocation7 + $0x520] ss:$24 sps:$4 sm:$0xff]  }
 0x253   : > { %2547 = vmatprep.subr.bf16.mxu0 %v4650_v55  ;;  %v4704_v55 = vld [vmem:[#allocation7 + $0x584] ss:$24 sps:$4 sm:$0xff]  }
 0x254   : > { %3281 = vmatpush1.bf16.msra.mxu1 %v4789_v31  ;;  %v4753_v31 = vld [vmem:[#allocation7 + $0x7f0] ss:$24 sps:$4 sm:$0xff]  }
 0x255   : > { %3282 = vmatprep.subr.bf16.mxu1 %v4794_v35  ;;  %v4767_v35 = vld [vmem:[#allocation7 + $0x854] ss:$24 sps:$4 sm:$0xff]  }
 0x256   : > { %2548 = vmatpush1.bf16.msra.mxu0 %v4648_v56  ;;  %v4702_v56 = vld [vmem:[#allocation7 + $0x580] ss:$24 sps:$4 sm:$0xff]  }
 0x257   : > { %2549 = vmatprep.subr.bf16.mxu0 %v4653_v59  ;;  %v4710_v59 = vld [vmem:[#allocation7 + $0x5e4] ss:$24 sps:$4 sm:$0xff]  }
 0x258   : > { %3283 = vmatpush1.bf16.msra.mxu1 %v4792_v39  ;;  %v4773_v39 = vld [vmem:[#allocation7 + $0x884] ss:$24 sps:$4 sm:$0xff]  }
 0x259   : > { %3284 = vmatprep.subr.bf16.mxu1 %v4797_v41  ;;  %v4779_v41 = vld [vmem:[#allocation7 + $0x8b4] ss:$24 sps:$4 sm:$0xff]  }
 0x25a   : > { %2550 = vmatpush1.bf16.msra.mxu0 %v4651_v60  ;;  %v4708_v60 = vld [vmem:[#allocation7 + $0x5e0] ss:$24 sps:$4 sm:$0xff]  }
 0x25b   : > { %2551 = vmatprep.subr.bf16.mxu0 %v4656_v63  ;;  %v4716_v63 = vld [vmem:[#allocation7 + $0x644] ss:$24 sps:$4 sm:$0xff]  }
 0x25e   : > { %2552 = vmatpush1.bf16.msra.mxu0 %v4654_v0  ;;  %v4714_v0 = vld [vmem:[#allocation7 + $0x640] ss:$24 sps:$4 sm:$0xff]  }
 0x25f   : > { %2553 = vmatprep.subr.bf16.mxu0 %v4659_v9  ;;  %v4722_v9 = vld [vmem:[#allocation7 + $0x6a4] ss:$24 sps:$4 sm:$0xff]  }
 0x262   : > { %2554 = vmatpush1.bf16.msra.mxu0 %v4657_v10  ;;  %v4720_v10 = vld [vmem:[#allocation7 + $0x6a0] ss:$24 sps:$4 sm:$0xff]  }
 0x263   : > { %2555 = vmatprep.subr.bf16.mxu0 %v4662_v17  ;;  %v4728_v17 = vld [vmem:[#allocation7 + $0x704] ss:$24 sps:$4 sm:$0xff]  }
 0x266   : > { %2556 = vmatpush1.bf16.msra.mxu0 %v4660_v18  ;;  %v4731_v18 = vld [vmem:[#allocation7 + $0x734] ss:$24 sps:$4 sm:$0xff]  }
 0x267   : > { %2568 = vmatprep.subr.bf16.mxu0 %v4665_v42  ;;  %v4743_v42 = vld [vmem:[#allocation7 + $0x794] ss:$24 sps:$4 sm:$0xff]  }
 0x269   : > { %2558 = vmatmul.mubr.bf16.vlgmr.msra.gmra.mrb[4].mxu0 %v5688_v38  ;;  %v4795_v38 = vld [vmem:[#allocation8 + $0xc0] ss:$8 sps:$4 sm:$0xff]  }
 0x26a   : > { %2569 = vmatpush1.bf16.msra.mxu0 %v4663_v25  ;;  %2600 = vmatprep.mubr.bf16.mxu0 %v5690_v24  ;;  %v4677_v24 = vld [vmem:[#allocation7 + $0x3d4] ss:$24 sps:$4 sm:$0xff]   ;;  %v4741_v25 = vld [vmem:[#allocation7 + $0x790] ss:$24 sps:$4 sm:$0xff]  }
 0x26b   : > { %2570 = vmatprep.subr.bf16.mxu0 %v4668_v30  ;;  %3285 = vmatpush1.bf16.msra.mxu1 %v4795_v38  ;;  %v4755_v30 = vld [vmem:[#allocation7 + $0x7f4] ss:$24 sps:$4 sm:$0xff]   ;;  %v4785_v38 = vld [vmem:[#allocation7 + $0x8e4] ss:$24 sps:$4 sm:$0xff]  }
 0x26c   : > { %3286 = vmatprep.subr.bf16.mxu1 %v4800_v47 }
 0x26e   : > { %2571 = vmatpush1.bf16.msra.mxu0 %v4666_v34  ;;  %v4759_v34 = vld [vmem:[#allocation7 + $0x820] ss:$24 sps:$4 sm:$0xff]  }
 0x26f   : > { %2572 = vmatprep.subr.bf16.mxu0 %v4671_v37  ;;  %3287 = vmatpush1.bf16.msra.mxu1 %v4798_v4  ;;  %v4765_v37 = vld [vmem:[#allocation7 + $0x850] ss:$24 sps:$4 sm:$0xff]  }
 0x270   : > { %3288 = vmatprep.subr.bf16.mxu1 %v4803_v5 }
 0x272   : > { %2573 = vmatpush1.bf16.msra.mxu0 %v4669_v40  ;;  %v4771_v40 = vld [vmem:[#allocation7 + $0x880] ss:$24 sps:$4 sm:$0xff]  }
 0x273   : > { %2574 = vmatprep.subr.bf16.mxu0 %v4674_v45  ;;  %3289 = vmatpush1.bf16.msra.mxu1 %v4801_v23  ;;  %v4777_v45 = vld [vmem:[#allocation7 + $0x8b0] ss:$24 sps:$4 sm:$0xff]  }
 0x274   : > { %3290 = vmatprep.subr.bf16.mxu1 %v4806_v48 }
 0x276   : > { %2575 = vmatpush1.bf16.msra.mxu0 %v4672_v46  ;;  %v4783_v46 = vld [vmem:[#allocation7 + $0x8e0] ss:$24 sps:$4 sm:$0xff]  }
 0x277   : > { %2576 = vmatprep.subr.bf16.mxu0 %v4677_v24  ;;  %3291 = vmatpush1.bf16.msra.mxu1 %v4804_v49 }
 0x278   : > { %3303 = vmatprep.subr.bf16.mxu1 %v4809_v7 }
 0x27a   : > { %2577 = vmatpush1.bf16.msra.mxu0 %v4675_v3 }
 0x27b   : > { %2578 = vmatprep.subr.bf16.mxu0 %v4680_v11 }
 0x27e   : > { %2579 = vmatpush1.bf16.msra.mxu0 %v4678_v12 }
 0x27f   : > { %2580 = vmatprep.subr.bf16.mxu0 %v4683_v6 }
 0x282   : > { %2581 = vmatpush1.bf16.msra.mxu0 %v4681_v20 }
 0x283   : > { %2582 = vmatprep.subr.bf16.mxu0 %v4686_v21 }
 0x286   : > { %2583 = vmatpush1.bf16.msra.mxu0 %v4684_v43 }
 0x287   : > { %2584 = vmatprep.subr.bf16.mxu0 %v4689_v32 }
 0x28a   : > { %2585 = vmatpush1.bf16.msra.mxu0 %v4687_v50 }
 0x28b   : > { %2586 = vmatprep.subr.bf16.mxu0 %v4692_v44 }
 0x28e   : > { %2587 = vmatpush1.bf16.msra.mxu0 %v4690_v8  ;;  %v4807_v8 = vld [vmem:[#allocation8 + $0x100] ss:$8 sps:$4 sm:$0xff]  }
 0x28f   : > { %2588 = vmatprep.subr.bf16.mxu0 %v4695_v14 }
 0x292   : > { %2589 = vmatpush1.bf16.msra.mxu0 %v4693_v15  ;;  %v4812_v15 = vld [vmem:[#allocation8 + $0x114] ss:$8 sps:$4 sm:$0xff]  }
 0x293   : > { %2590 = vmatprep.subr.bf16.mxu0 %v4698_v51  ;;  %v4810_v51 = vld [vmem:[#allocation8 + $0x110] ss:$8 sps:$4 sm:$0xff]  }
 0x296   : > { %2591 = vmatpush1.bf16.msra.mxu0 %v4696_v52  ;;  %v4815_v52 = vld [vmem:[#allocation8 + $0x124] ss:$8 sps:$4 sm:$0xff]  }
 0x297   : > { %2592 = vmatprep.subr.bf16.mxu0 %v4701_v53  ;;  %v4813_v53 = vld [vmem:[#allocation8 + $0x120] ss:$8 sps:$4 sm:$0xff]  }
 0x29a   : > { %2593 = vmatpush1.bf16.msra.mxu0 %v4699_v54  ;;  %v4818_v54 = vld [vmem:[#allocation8 + $0x134] ss:$8 sps:$4 sm:$0xff]  }
 0x29b   : > { %2594 = vmatprep.subr.bf16.mxu0 %v4704_v55  ;;  %v4816_v55 = vld [vmem:[#allocation8 + $0x130] ss:$8 sps:$4 sm:$0xff]  }
 0x29e   : > { %2595 = vmatpush1.bf16.msra.mxu0 %v4702_v56  ;;  %v4821_v56 = vld [vmem:[#allocation8 + $0x144] ss:$8 sps:$4 sm:$0xff]  }
 0x29f   : > { %2596 = vmatprep.subr.bf16.mxu0 %v4707_v57  ;;  %v4819_v57 = vld [vmem:[#allocation8 + $0x140] ss:$8 sps:$4 sm:$0xff]  }
 0x2a2   : > { %2597 = vmatpush1.bf16.msra.mxu0 %v4705_v58  ;;  %v4824_v58 = vld [vmem:[#allocation8 + $0x154] ss:$8 sps:$4 sm:$0xff]  }
 0x2a3   : > { %2598 = vmatprep.subr.bf16.mxu0 %v4710_v59  ;;  %v4822_v59 = vld [vmem:[#allocation8 + $0x150] ss:$8 sps:$4 sm:$0xff]  }
 0x2a6   : > { %2599 = vmatpush1.bf16.msra.mxu0 %v4708_v60  ;;  %v4827_v60 = vld [vmem:[#allocation8 + $0x164] ss:$8 sps:$4 sm:$0xff]  }
 0x2a7   : > { %2611 = vmatprep.subr.bf16.mxu0 %v4713_v61  ;;  %v4825_v61 = vld [vmem:[#allocation8 + $0x160] ss:$8 sps:$4 sm:$0xff]  }
 0x2a9   : > { %2601 = vmatmul.mubr.bf16.vlgmr.msra.gmra.mrb[4].mxu0 %v5692_v26  ;;  %v4726_v26 = vld [vmem:[#allocation7 + $0x700] ss:$24 sps:$4 sm:$0xff]  }
 0x2aa   : > { %2612 = vmatpush1.bf16.msra.mxu0 %v4711_v62  ;;  %2643 = vmatprep.mubr.bf16.mxu0 %v5694_v27  ;;  %v4729_v27 = vld [vmem:[#allocation7 + $0x730] ss:$24 sps:$4 sm:$0xff]   ;;  %v4830_v62 = vld [vmem:[#allocation8 + $0x174] ss:$8 sps:$4 sm:$0xff]  }
 0x2ab   : > { %2613 = vmatprep.subr.bf16.mxu0 %v4716_v63  ;;  %v4828_v63 = vld [vmem:[#allocation8 + $0x170] ss:$8 sps:$4 sm:$0xff]  }
 0x2ae   : > { %2614 = vmatpush1.bf16.msra.mxu0 %v4714_v0  ;;  %v4833_v0 = vld [vmem:[#allocation8 + $0x184] ss:$8 sps:$4 sm:$0xff]  }
 0x2af   : > { %2615 = vmatprep.subr.bf16.mxu0 %v4719_v1  ;;  %v4831_v1 = vld [vmem:[#allocation8 + $0x180] ss:$8 sps:$4 sm:$0xff]  }
 0x2b2   : > { %2616 = vmatpush1.bf16.msra.mxu0 %v4717_v2  ;;  %v4836_v2 = vld [vmem:[#allocation8 + $0x194] ss:$8 sps:$4 sm:$0xff]  }
 0x2b3   : > { %2617 = vmatprep.subr.bf16.mxu0 %v4722_v9  ;;  %v4834_v9 = vld [vmem:[#allocation8 + $0x190] ss:$8 sps:$4 sm:$0xff]  }
 0x2b6   : > { %2618 = vmatpush1.bf16.msra.mxu0 %v4720_v10  ;;  %v4839_v10 = vld [vmem:[#allocation8 + $0x1a4] ss:$8 sps:$4 sm:$0xff]  }
 0x2b7   : > { %2619 = vmatprep.subr.bf16.mxu0 %v4725_v13  ;;  %v4837_v13 = vld [vmem:[#allocation8 + $0x1a0] ss:$8 sps:$4 sm:$0xff]  }
 0x2ba   : > { %2620 = vmatpush1.bf16.msra.mxu0 %v4723_v16  ;;  %v4842_v16 = vld [vmem:[#allocation8 + $0x1b4] ss:$8 sps:$4 sm:$0xff]  }
 0x2bb   : > { %2621 = vmatprep.subr.bf16.mxu0 %v4728_v17  ;;  %v4840_v17 = vld [vmem:[#allocation8 + $0x1b0] ss:$8 sps:$4 sm:$0xff]  }
 0x2be   : > { %2622 = vmatpush1.bf16.msra.mxu0 %v4726_v26  ;;  %v4845_v26 = vld [vmem:[#allocation8 + $0x1c4] ss:$8 sps:$4 sm:$0xff]  }
 0x2bf   : > { %2623 = vmatprep.subr.bf16.mxu0 %v4731_v18  ;;  %v4843_v18 = vld [vmem:[#allocation8 + $0x1c0] ss:$8 sps:$4 sm:$0xff]  }
 0x2c2   : > { %2624 = vmatpush1.bf16.msra.mxu0 %v4729_v27  ;;  %v4848_v27 = vld [vmem:[#allocation8 + $0x1d4] ss:$8 sps:$4 sm:$0xff]  }
 0x2c3   : > { %2625 = vmatprep.subr.bf16.mxu0 %v4737_v19  ;;  %v4846_v19 = vld [vmem:[#allocation8 + $0x1d0] ss:$8 sps:$4 sm:$0xff]  }
 0x2c6   : > { %2626 = vmatpush1.bf16.msra.mxu0 %v4735_v22  ;;  %v4851_v22 = vld [vmem:[#allocation8 + $0x1e4] ss:$8 sps:$4 sm:$0xff]  }
 0x2c7   : > { %2627 = vmatprep.subr.bf16.mxu0 %v4743_v42  ;;  %v4849_v42 = vld [vmem:[#allocation8 + $0x1e0] ss:$8 sps:$4 sm:$0xff]  }
 0x2ca   : > { %2628 = vmatpush1.bf16.msra.mxu0 %v4741_v25  ;;  %v4854_v25 = vld [vmem:[#allocation8 + $0x1f4] ss:$8 sps:$4 sm:$0xff]  }
 0x2cb   : > { %2629 = vmatprep.subr.bf16.mxu0 %v4749_v36  ;;  %v4852_v36 = vld [vmem:[#allocation8 + $0x1f0] ss:$8 sps:$4 sm:$0xff]  }
 0x2ce   : > { %2630 = vmatpush1.bf16.msra.mxu0 %v4747_v29  ;;  %v4857_v29 = vld [vmem:[#allocation8 + $0x204] ss:$8 sps:$4 sm:$0xff]  }
 0x2cf   : > { %2631 = vmatprep.subr.bf16.mxu0 %v4755_v30  ;;  %v4855_v30 = vld [vmem:[#allocation8 + $0x200] ss:$8 sps:$4 sm:$0xff]  }
 0x2d2   : > { %2632 = vmatpush1.bf16.msra.mxu0 %v4753_v31  ;;  %v4860_v31 = vld [vmem:[#allocation8 + $0x214] ss:$8 sps:$4 sm:$0xff]  }
 0x2d3   : > { %2633 = vmatprep.subr.bf16.mxu0 %v4761_v33  ;;  %v4903_v33 = vld [vmem:[#allocation11 + $0x40] sm:$0xff]  }
 0x2d6   : > { %2634 = vmatpush1.bf16.msra.mxu0 %v4759_v34  ;;  %v4904_v34 = vld [vmem:[#allocation11] sm:$0xff]  }
 0x2d7   : > { %2635 = vmatprep.subr.bf16.mxu0 %v4767_v35  ;;  %v4905_v35 = vld [vmem:[#allocation11 + $0x48] sm:$0xff]  }
 0x2da   : > { %2636 = vmatpush1.bf16.msra.mxu0 %v4765_v37  ;;  %v4858_v37 = vld [vmem:[#allocation8 + $0x210] ss:$8 sps:$4 sm:$0xff]  }
 0x2db   : > { %2637 = vmatprep.subr.bf16.mxu0 %v4773_v39  ;;  %v4863_v39 = vld [vmem:[#allocation8 + $0x224] ss:$8 sps:$4 sm:$0xff]  }
 0x2de   : > { %2638 = vmatpush1.bf16.msra.mxu0 %v4771_v40  ;;  %v4906_v40 = vld [vmem:[#allocation11 + $0x8] sm:$0xff]  }
 0x2df   : > { %2639 = vmatprep.subr.bf16.mxu0 %v4779_v41  ;;  %v4907_v41 = vld [vmem:[#allocation11 + $0x50] sm:$0xff]  }
 0x2e2   : > { %2640 = vmatpush1.bf16.msra.mxu0 %v4777_v45  ;;  %v4861_v45 = vld [vmem:[#allocation8 + $0x220] ss:$8 sps:$4 sm:$0xff]  }
 0x2e3   : > { %2641 = vmatprep.subr.bf16.mxu0 %v4785_v38  ;;  %v4866_v38 = vld [vmem:[#allocation8 + $0x234] ss:$8 sps:$4 sm:$0xff]  }
 0x2e6   : > { %2642 = vmatpush1.bf16.msra.mxu0 %v4783_v46  ;;  %v4908_v46 = vld [vmem:[#allocation11 + $0x10] sm:$0xff]  }
 0x2e7   : > { %4154 = vmatprep.subr.bf16.mxu0 %v4903_v33 }
 0x2e9   : > { %2644 = vmatmul.mubr.bf16.vlgmr.msra.gmra.mrb[4].mxu0 %v5696_v28 }
 0x2ea   : > { %4155 = vmatpush3.bf16.msra.mxu0 %v4904_v34 }
 0x2eb   : > { %4156 = vmatprep.subr.bf16.mxu0 %v4905_v35 }
 0x2ee   : > { %4157 = vmatpush3.bf16.msra.mxu0 %v4906_v40 }
 0x2ef   : > { %4158 = vmatprep.subr.bf16.mxu0 %v4907_v41 }
 0x2f2   : > { %4159 = vmatpush3.bf16.msra.mxu0 %v4908_v46  ;;  %v4131_v46 = vld [vmem:[#allocation13] ss:$0 sm:$0xff] }
 0x2fc   : > { %v2387_v47 = vpop.f32.mrb[0].mxu0 }
 0x2fd   : > { %v2516_v24 = vpop.f32.mrb[0].mxu1  ;;  %v2389_v4 = vpop.f32.mrb[1].mxu0  ;;  %v2654_v12 = vmax.f32 %v2387_v47, 0.0  ;;  %v4909_v47 = vld [vmem:[#allocation11 + $0x58] sm:$0xff]  }
 0x2fe   : > { %v2518_v3 = vpop.f32.mrb[1].mxu1  ;;  %v2391_v11 = vpop.f32.mrb[2].mxu0  ;;  %v2656_v20 = vmax.f32 %v2516_v24, 0.0  ;;  %v2655_v21 = vmax.f32 %v2389_v4, 0.0  ;;  %v4864_v24 = vld [vmem:[#allocation8 + $0x230] ss:$8 sps:$4 sm:$0xff]   ;;  %4160 = vmatprep.subr.bf16.mxu0 %v4909_v47 }
 0x2ff   : > { %v2660_v6 = vmax.f32 %v2391_v11, 0.0  ;;  %v2520_v5 = vpop.f32.mrb[2].mxu1  ;;  %v2393_v23 = vpop.f32.mrb[3].mxu0  ;;  %v2657_v32 = vmax.f32 %v2518_v3, 0.0  ;;  %v4869_v4 = vld [vmem:[#allocation8 + $0x244] ss:$8 sps:$4 sm:$0xff]  }
 0x300   : > { %v2662_v48 = vmax.f32 %v2520_v5, 0.0  ;;  %v2661_v49 = vmax.f32 %v2393_v23, 0.0  ;;  %v2522_v43 = vpop.f32.mrb[3].mxu1  ;;  %v4910_v3 = vld [vmem:[#allocation11 + $0x18] sm:$0xff]   ;;  %v4911_v11 = vld [vmem:[#allocation11 + $0x60] sm:$0xff]   ;;  %v4913_v23 = vld [vmem:[#allocation11 + $0x68] sm:$0xff]  }
 0x301   : > { %v2666_v7 = vpack.c.bf16 %v2660_v6, %v2654_v12  ;;  %v2663_v50 = vmax.f32 %v2522_v43, 0.0  ;;  %v4867_v12 = vld [vmem:[#allocation8 + $0x240] ss:$8 sps:$4 sm:$0xff]   ;;  %v4872_v6 = vld [vmem:[#allocation8 + $0x254] ss:$8 sps:$4 sm:$0xff]   ;;  %4161 = vmatpush3.bf16.msra.mxu0 %v4910_v3 }
 0x302   : > { %v5716_v44 = vpack.c.bf16 %v2662_v48, %v2656_v20  ;;  %v2667_v28 = vpack.c.bf16 %v2661_v49, %v2655_v21  ;;  %v4912_v5 = vld [vmem:[#allocation11 + $0x20] sm:$0xff]   ;;  %4162 = vmatprep.subr.bf16.mxu0 %v4911_v11  ;;  %v4870_v20 = vld [vmem:[#allocation8 + $0x250] ss:$8 sps:$4 sm:$0xff]   ;;  %v4878_v43 = vld [vmem:[#allocation8 + $0x274] ss:$8 sps:$4 sm:$0xff]  }
 0x303   : > { %v2669_v14 = vpack.c.bf16 %v2663_v50, %v2657_v32  ;;  %v4875_v21 = vld [vmem:[#allocation8 + $0x264] ss:$8 sps:$4 sm:$0xff]   ;;  %v4873_v49 = vld [vmem:[#allocation8 + $0x260] ss:$8 sps:$4 sm:$0xff]   ;;  %v4876_v32 = vld [vmem:[#allocation8 + $0x270] ss:$8 sps:$4 sm:$0xff]  }
 0x304   : > { %3292 = vmatprep.mubr.bf16.mxu1 %v2667_v28  ;;  %v4914_v48 = vld [vmem:[#allocation11 + $0x28] sm:$0xff]  }
 0x305   : > { %3293 = vmatmul.mubr.bf16.vlgmr.msra.gmra.mrb[4].mxu1 %v2666_v7  ;;  %4163 = vmatpush3.bf16.msra.mxu0 %v4912_v5  ;;  %v4881_v7 = vld [vmem:[#allocation8 + $0x284] ss:$8 sps:$4 sm:$0xff]   ;;  %v4879_v50 = vld [vmem:[#allocation8 + $0x280] ss:$8 sps:$4 sm:$0xff]   ;;  %v4882_v28 = vld [vmem:[#allocation8 + $0x290] ss:$8 sps:$4 sm:$0xff]  }
 0x306   : > { %3304 = vmatpush1.bf16.msra.mxu1 %v4807_v8  ;;  %3335 = vmatprep.mubr.bf16.mxu1 %v2669_v14  ;;  %v4887_v8 = vld [vmem:[#allocation8 + $0x2a4] ss:$8 sps:$4 sm:$0xff]   ;;  %v4885_v14 = vld [vmem:[#allocation8 + $0x2a0] ss:$8 sps:$4 sm:$0xff]  }
 0x307   : > { %3305 = vmatprep.subr.bf16.mxu1 %v4812_v15  ;;  %4164 = vmatprep.subr.bf16.mxu0 %v4913_v23  ;;  %v4890_v15 = vld [vmem:[#allocation8 + $0x2b4] ss:$8 sps:$4 sm:$0xff]  }
 0x309   : > { %4165 = vmatpush3.bf16.msra.mxu0 %v4914_v48 }
 0x30a   : > { %3306 = vmatpush1.bf16.msra.mxu1 %v4810_v51  ;;  %v4888_v51 = vld [vmem:[#allocation8 + $0x2b0] ss:$8 sps:$4 sm:$0xff]  }
 0x30b   : > { %3307 = vmatprep.subr.bf16.mxu1 %v4815_v52  ;;  %v4893_v52 = vld [vmem:[#allocation8 + $0x2c4] ss:$8 sps:$4 sm:$0xff]  }
 0x30e   : > { %3308 = vmatpush1.bf16.msra.mxu1 %v4813_v53  ;;  %v4891_v53 = vld [vmem:[#allocation8 + $0x2c0] ss:$8 sps:$4 sm:$0xff]  }
 0x30f   : > { %3309 = vmatprep.subr.bf16.mxu1 %v4818_v54  ;;  %v4896_v54 = vld [vmem:[#allocation8 + $0x2d4] ss:$8 sps:$4 sm:$0xff]  }
 0x312   : > { %3310 = vmatpush1.bf16.msra.mxu1 %v4816_v55  ;;  %v4894_v55 = vld [vmem:[#allocation8 + $0x2d0] ss:$8 sps:$4 sm:$0xff]  }
 0x313   : > { %3311 = vmatprep.subr.bf16.mxu1 %v4821_v56  ;;  %v4899_v56 = vld [vmem:[#allocation8 + $0x2e4] ss:$8 sps:$4 sm:$0xff]  }
 0x316   : > { %3312 = vmatpush1.bf16.msra.mxu1 %v4819_v57  ;;  %v4897_v57 = vld [vmem:[#allocation8 + $0x2e0] ss:$8 sps:$4 sm:$0xff]  }
 0x317   : > { %3313 = vmatprep.subr.bf16.mxu1 %v4824_v58  ;;  %v4902_v58 = vld [vmem:[#allocation8 + $0x2f4] ss:$8 sps:$4 sm:$0xff]  }
 0x31a   : > { %3314 = vmatpush1.bf16.msra.mxu1 %v4822_v59  ;;  %v4900_v59 = vld [vmem:[#allocation8 + $0x2f0] ss:$8 sps:$4 sm:$0xff]  }
 0x31b   : > { %3315 = vmatprep.subr.bf16.mxu1 %v4827_v60 }
 0x31e   : > { %3316 = vmatpush1.bf16.msra.mxu1 %v4825_v61 }
 0x31f   : > { %3317 = vmatprep.subr.bf16.mxu1 %v4830_v62 }
 0x322   : > { %3318 = vmatpush1.bf16.msra.mxu1 %v4828_v63 }
 0x323   : > { %3319 = vmatprep.subr.bf16.mxu1 %v4833_v0 }
 0x326   : > { %3320 = vmatpush1.bf16.msra.mxu1 %v4831_v1 }
 0x327   : > { %3321 = vmatprep.subr.bf16.mxu1 %v4836_v2 }
 0x32a   : > { %3322 = vmatpush1.bf16.msra.mxu1 %v4834_v9 }
 0x32b   : > { %3323 = vmatprep.subr.bf16.mxu1 %v4839_v10 }
 0x32e   : > { %3324 = vmatpush1.bf16.msra.mxu1 %v4837_v13 }
 0x32f   : > { %3325 = vmatprep.subr.bf16.mxu1 %v4842_v16  ;;  %v4915_v16 = vld [vmem:[#allocation11 + $0x70] sm:$0xff]  }
 0x330   : > { %4166 = vmatprep.subr.bf16.mxu0 %v4915_v16 }
 0x332   : > { %3326 = vmatpush1.bf16.msra.mxu1 %v4840_v17  ;;  %v4916_v17 = vld [vmem:[#allocation11 + $0x30] sm:$0xff]  }
 0x333   : > { %3327 = vmatprep.subr.bf16.mxu1 %v4845_v26  ;;  %4167 = vmatpush3.bf16.msra.mxu0 %v4916_v17  ;;  %v4917_v26 = vld [vmem:[#allocation11 + $0x78] sm:$0xff]  }
 0x334   : > { %4168 = vmatprep.subr.bf16.mxu0 %v4917_v26 }
 0x336   : > { %3328 = vmatpush1.bf16.msra.mxu1 %v4843_v18  ;;  %v4918_v18 = vld [vmem:[#allocation11 + $0x38] sm:$0xff]  }
 0x337   : > { %3329 = vmatprep.subr.bf16.mxu1 %v4848_v27  ;;  %4169 = vmatpush3.bf16.msra.mxu0 %v4918_v18  ;;  %v2770_v27 = vlaneseq }
 0x33a   : > { %3330 = vmatpush1.bf16.msra.mxu1 %v4846_v19  ;;  %v2771_v19 = vshrl.u32 %v2770_v27, 7 }
 0x33b   : > { %3331 = vmatprep.subr.bf16.mxu1 %v4851_v22 }
 0x33c   : > { %v2772_v22 = vsub.s32 0, %v2771_v19 }
 0x33e   : > { %3332 = vmatpush1.bf16.msra.mxu1 %v4849_v42  ;;  %v2768_v42 = vld [vmem:[#allocation10] sm:$0x3] }
 0x33f   : > { %3333 = vmatprep.subr.bf16.mxu1 %v4854_v25  ;;  %v2776_v25 = vsub.s32 1, %v2771_v19 }
 0x342   : > { %3334 = vmatpush1.bf16.msra.mxu1 %v4852_v36  ;;  %v2773_v36 = vrot.slane %v2768_v42, %v2772_v22 }
 0x343   : > { %3346 = vmatprep.subr.bf16.mxu1 %v4857_v29 }
 0x345   : > { %3336 = vmatmul.mubr.bf16.vlgmr.msra.gmra.mrb[4].mxu1 %v5716_v44  ;;  %v4884_v44 = vld [vmem:[#allocation8 + $0x294] ss:$8 sps:$4 sm:$0xff]  }
 0x346   : > { %3347 = vmatpush1.bf16.msra.mxu1 %v4855_v30  ;;  %v2777_v30 = vrot.slane %v2768_v42, %v2776_v25 }
 0x347   : > { %3348 = vmatprep.subr.bf16.mxu1 %v4860_v31 }
 0x34a   : > { %3349 = vmatpush1.bf16.msra.mxu1 %v4858_v37 }
 0x34b   : > { %3350 = vmatprep.subr.bf16.mxu1 %v4863_v39 }
 0x34e   : > { %3351 = vmatpush1.bf16.msra.mxu1 %v4861_v45 }
 0x34f   : > { %3352 = vmatprep.subr.bf16.mxu1 %v4866_v38 }
 0x352   : > { %3353 = vmatpush1.bf16.msra.mxu1 %v4864_v24 }
 0x353   : > { %3354 = vmatprep.subr.bf16.mxu1 %v4869_v4 }
 0x356   : > { %3355 = vmatpush1.bf16.msra.mxu1 %v4867_v12 }
 0x357   : > { %3356 = vmatprep.subr.bf16.mxu1 %v4872_v6 }
 0x35a   : > { %3357 = vmatpush1.bf16.msra.mxu1 %v4870_v20 }
 0x35b   : > { %3358 = vmatprep.subr.bf16.mxu1 %v4875_v21 }
 0x35e   : > { %3359 = vmatpush1.bf16.msra.mxu1 %v4873_v49 }
 0x35f   : > { %3360 = vmatprep.subr.bf16.mxu1 %v4878_v43 }
 0x362   : > { %3361 = vmatpush1.bf16.msra.mxu1 %v4876_v32 }
 0x363   : > { %3362 = vmatprep.subr.bf16.mxu1 %v4881_v7 }
 0x366   : > { %3363 = vmatpush1.bf16.msra.mxu1 %v4879_v50 }
 0x367   : > { %3364 = vmatprep.subr.bf16.mxu1 %v4884_v44 }
 0x36a   : > { %3365 = vmatpush1.bf16.msra.mxu1 %v4882_v28 }
 0x36b   : > { %3366 = vmatprep.subr.bf16.mxu1 %v4887_v8 }
 0x36e   : > { %3367 = vmatpush1.bf16.msra.mxu1 %v4885_v14 }
 0x36f   : > { %3368 = vmatprep.subr.bf16.mxu1 %v4890_v15 }
 0x372   : > { %3369 = vmatpush1.bf16.msra.mxu1 %v4888_v51 }
 0x373   : > { %3370 = vmatprep.subr.bf16.mxu1 %v4893_v52 }
 0x376   : > { %3371 = vmatpush1.bf16.msra.mxu1 %v4891_v53 }
 0x377   : > { %3372 = vmatprep.subr.bf16.mxu1 %v4896_v54 }
 0x37a   : > { %3373 = vmatpush1.bf16.msra.mxu1 %v4894_v55 }
 0x37b   : > { %3374 = vmatprep.subr.bf16.mxu1 %v4899_v56 }
 0x37e   : > { %3375 = vmatpush1.bf16.msra.mxu1 %v4897_v57 }
 0x37f   : > { %3376 = vmatprep.subr.bf16.mxu1 %v4902_v58 }
 0x382   : > { %3377 = vmatpush1.bf16.msra.mxu1 %v4900_v59 }
 0x3bc   : > { %v2645_v60 = vpop.f32.mrb[4].mxu0 }
 0x3bd   : > { %v2647_v61 = vpop.f32.mrb[5].mxu0  ;;  %v2658_v63 = vmax.f32 %v2645_v60, 0.0 }
 0x3be   : > { %v2649_v62 = vpop.f32.mrb[6].mxu0  ;;  %v2659_v2 = vmax.f32 %v2647_v61, 0.0 }
 0x3bf   : > { %v2664_v0 = vmax.f32 %v2649_v62, 0.0  ;;  %v2651_v1 = vpop.f32.mrb[7].mxu0 }
 0x3c0   : > { %v2665_v9 = vmax.f32 %v2651_v1, 0.0 }
 0x3c1   : > { %v2670_v10 = vpack.c.bf16 %v2664_v0, %v2658_v63 }
 0x3c2   : > { %v2671_v13 = vpack.c.bf16 %v2665_v9, %v2659_v2 }
 0x3c4   : > { %3378 = vmatprep.mubr.bf16.mxu1 %v2671_v13 }
 0x3c5   : > { %3379 = vmatmul.mubr.bf16.vlgmr.msra.gmra.mrb[4].mxu1 %v2670_v10 }
 0x498   : > { %v3380_v29 = vpop.f32.mrb[4].mxu1 }
 0x499   : > { %v3382_v31 = vpop.f32.mrb[5].mxu1  ;;  %v4176_v34 = vadd.f32 %v3380_v29, %v2773_v36 }
 0x49a   : > { %v3384_v33 = vpop.f32.mrb[6].mxu1  ;;  %v4177_v39 = vadd.f32 %v3382_v31, %v2777_v30 }
 0x49b   : > { %v4178_v35 = vadd.f32 %v3384_v33, %v2773_v36  ;;  %v3386_v37 = vpop.f32.mrb[7].mxu1 }
 0x49c   : > { %v4179_v40 = vadd.f32 %v3386_v37, %v2777_v30 }
 0x49d   : > { %v3389_v41 = vpack.c.bf16 %v4178_v35, %v4176_v34 }
 0x49e   : > { %v3390_v45 = vpack.c.bf16 %v4179_v40, %v4177_v39 }
 0x4a0   : > { %3558 = vmatprep.mubr.bf16.mxu0 %v3390_v45 }
 0x4a1   : > { %3559 = vmatmul.mubr.bf16.vlgmr.msra.gmra.mrb[8].mxu0 %v3389_v41 }
 0x574   : > { %v4170_v38 = vpop.f32.mrb[8].mxu0 }
 0x575   : > { %v4171_v47 = vpop.f32.mrb[9].mxu0 }
 0x576   : > { %v4172_v24 = vadd.f32 %v4171_v47, %v4170_v38  ;;  %v4173_v4 = vpop.f32.mrb[10].mxu0 }
 0x577   : > { %v4174_v3 = vpop.f32.mrb[11].mxu0 }
 0x578   : > { %v3561_v11 = vadd.f32 %v4172_v24, %v4131_v46  ;;  %v4175_v12 = vadd.f32 %v4174_v3, %v4173_v4 }
 0x57a   : > { %3567 = vst [vmem:[%s406_s15] sm:$0xff] %v3561_v11  ;;  %v3564_v6 = vadd.f32 %v4175_v12, %v4131_v46 }
 0x57c   : > { %3568 = vst [vmem:[%s406_s15 + $0x8] sm:$0xff] %v3564_v6 }
 0x57d   : > { %5140 = shalt.err (!%p5137_p8)
}
 0x57e   : > { %s5141_s16 = scalar_lea.hbm %s5726_s20, 256  ;;  %s5145_s3 = scalar_lea.hbm %s5777_s7, 512 }
 0x57f   : > { %p5142_p4 = scmp.ne.s32.totalorder %s5726_s20, %s5141_s16  ;;  %p5146_p1 = scmp.lt.u32.totalorder %s5726_s20, %s5777_s7 }
 0x580   : > { %p5147_p11 = scmp.lt.u32.totalorder %s5145_s3, %s5141_s16  ;;  %p5149_p6 = scmp.lt.u32.totalorder %s5141_s16, %s5726_s20 }
 0x581   : > { %p5143_p3 = pnand %p5142_p4, %p5813_p13 }
 0x582   : > { %p5148_p12 = por %p5147_p11, %p5146_p1 }
 0x583   : > { %p5144_p10 = pneg %p5143_p3 }
 0x584   : > { %p5150_p2 = por %p5149_p6, %p5148_p12 }
 0x586   : > { %p5151_p9 = pnand %p5150_p2, %p5144_p10 }
 0x588   : > { %5154 = shalt.err (!%p5151_p9)
}
 0x589   : > { %s5225_s18 = smov 128   ;;  %s5226_s15 = smov 8  }
 0x58a   : > { %4241 = dma.vmem_to_hbm [thread:$0]  (%p5813_p13), %s5721_s12, 256, %s5726_s20, %s3570_s0, %s5225_s18, %s5225_s18, %s5226_s15  }
 0x58b PF: > { %s3598_s2 = sand.u32 1, %s5197_s24   ;;  %p5814_p0 = scmp.ne.s32.totalorder %s5799_s28, 0 }
 0x58c   : > { %p5815_p5 = scmp.ge.s32.totalorder %s5209_s27, 2  ;;  %s3599_s14 = scalar_lea.sflag [#allocation4], %s3598_s2 }
 0x58e   : > { %p4267_p7 = pnand %p5815_p5, %p5814_p0 }
 0x590   : > { %5192 = dma.done.wait (!%p4267_p7), %s3599_s14, 256  }
 0x591   : > { %5194 = vsyncadd (!%p4267_p7), %s3599_s14, 4294967040  ;;  %p25_p8 = scmp.ge.s32.totalorder %s5424_s11, 4   ;;  %s5816_s24 = smov %s5201_s25 }
 0x592   : > { %s5817_s25 = smov %s5205_s26  ;;  %s5818_s26 = smov %s5436_s23 }
 0x593   : > { %s5819_s27 = smov %s5424_s11  ;;  %27 = sbr.rel (!%p25_p8) target bundleno = 14 (0xe), region = 126 }
 0x59a   :  { %3604 = vsyncpa [#allocation3], 1 }
 0x59b   :  { %3606 = vsyncpa [#allocation3 + $0x1], 1 }
 0x59c   :  { %3607 = vsyncpa [#allocation6], 1 }
 0x59d   :  { %3609 = vsyncpa [#allocation6 + $0x1], 1 }
 0x59e   :  { %3610 = vsyncpa [#allocation9], 1 }
 0x59f   :  { %3611 = vsyncpa [#allocation12], 1 }
 0x5a0   :  { %3612 = vsyncpa [#allocation4], 1 }
 0x5a1   :  { %3614 = vsyncpa [#allocation4 + $0x1], 1 }

</bundles_post_ra>
